<compile_context>
chip_gen: v6e
topology: v6e:2x2x1
jax: 0.10.0
libtpu: 0.0.40
codegen_flags: <defaults>
</compile_context>

<pallas_src>
import numpy as np
import jax
import jax.numpy as jnp
from jax.experimental import pallas as pl
from jax.experimental.pallas import tpu as pltpu

K = 3  # every conv / transposed conv in the module is 3x3


# ----------------------------------------------------------------------------
# One-hot gather / unpack matrices (built once on the host, per image).
# Activation rows are always the per-image row-major raster (i * W + j).
# ----------------------------------------------------------------------------
def _enc_selects(hi, wi):
  """9 one-hot matrices mapping stride-2 conv outputs to their input taps.

  tap t = kh*3 + kw reads input (2*oh + kh - 1, 2*ow + kw - 1); out-of-range
  taps (the padding=1 border) are all-zero rows.
  Shape: (9, ho*wo, hi*wi).
  """
  ho, wo = (hi + 1) // 2, (wi + 1) // 2
  s = np.zeros((9, ho * wo, hi * wi), np.float32)
  for kh in range(K):
    for kw in range(K):
      t = kh * K + kw
      for oh in range(ho):
        ih = 2 * oh + kh - 1
        if not (0 <= ih < hi):
          continue
        for ow in range(wo):
          iw = 2 * ow + kw - 1
          if 0 <= iw < wi:
            s[t, oh * wo + ow, ih * wi + iw] = 1.0
  return s


def _dec_tap_selects(h, w):
  """4 one-hot matrices gathering x[i,j], x[i,j+1], x[i+1,j], x[i+1,j+1]
  (zero when the +1 neighbour is out of range).  Shape: (4, h*w, h*w)."""
  s = np.zeros((4, h * w, h * w), np.float32)
  for t, (di, dj) in enumerate(((0, 0), (0, 1), (1, 0), (1, 1))):
    for i in range(h):
      ii = i + di
      if ii >= h:
        continue
      for j in range(w):
        jj = j + dj
        if jj < w:
          s[t, i * w + j, ii * w + jj] = 1.0
  return s


def _dec_unpack(h, w):
  """4 one-hot matrices scattering phase (r, s) of a ConvTranspose output back
  to the interleaved (2h, 2w) raster: row (2i+r)*(2w) + (2j+s) <- (i*w + j).
  Shape: (4, 4*h*w, h*w), phase order p = 2*r + s."""
  u = np.zeros((4, 4 * h * w, h * w), np.float32)
  for p, (r, s) in enumerate(((0, 0), (0, 1), (1, 0), (1, 1))):
    for i in range(h):
      for j in range(w):
        u[p, (2 * i + r) * (2 * w) + (2 * j + s), i * w + j] = 1.0
  return u


# ----------------------------------------------------------------------------
# Weight packing (done once in prepack()).
# ----------------------------------------------------------------------------
def _pack_deconv_w(w_t):
  """PyTorch ConvTranspose2d weight (Cin, Cout, 3, 3) -> phase-packed (4Cin, 4Cout).

  Output column block p = 2r+s is output phase (oy%2, ox%2) = (r, s); input row
  blocks are the taps [x[i,j], x[i,j+1], x[i+1,j], x[i+1,j+1]].  Derived from
  oy = 2*iy - 1 + ky, ox = 2*ix - 1 + kx (stride 2, padding 1, output_padding 1).
  """
  wk = lambda ky, kx: w_t[:, :, ky, kx]          # (Cin, Cout)
  z = jnp.zeros_like(wk(0, 0))
  rows = [
      #            p=(0,0)   p=(0,1)   p=(1,0)   p=(1,1)
      jnp.concatenate([wk(1, 1), wk(1, 2), wk(2, 1), wk(2, 2)], axis=1),  # x[i, j]
      jnp.concatenate([z,        wk(1, 0), z,        wk(2, 0)], axis=1),  # x[i, j+1]
      jnp.concatenate([z,        z,        wk(0, 1), wk(0, 2)], axis=1),  # x[i+1, j]
      jnp.concatenate([z,        z,        z,        wk(0, 0)], axis=1),  # x[i+1, j+1]
  ]
  return jnp.concatenate(rows, axis=0)           # (4*Cin, 4*Cout)


def prepack(params, height, width):
  """One-time packing of weights + gather matrices for a (height, width) input."""
  assert height % 8 == 0 and width % 8 == 0, "spatial dims must be divisible by 8"
  h1, w1 = height // 2, width // 2   # after enc1 (and input grid of dec3)
  h2, w2 = h1 // 2, w1 // 2          # after enc2 (and input grid of dec2)
  h3, w3 = h2 // 2, w2 // 2          # after enc3 (and input grid of dec1)
  bf = jnp.bfloat16
  c = []
  # encoder 1: Conv2d(1, 32)  -- taps are built in the wrapper (Cin = 1)
  c.append(params["enc0_w"].reshape(9 * 1, 32).astype(bf))
  c.append(params["enc0_b"].reshape(1, 32))
  # encoder 2: Conv2d(32, 64)
  c.append(jnp.asarray(_enc_selects(h1, w1), bf))                 # (9, h2*w2, h1*w1)
  c.append(params["enc1_w"].reshape(9 * 32, 64).astype(bf))
  c.append(params["enc1_b"].reshape(1, 64))
  # encoder 3: Conv2d(64, 128)
  c.append(jnp.asarray(_enc_selects(h2, w2), bf))                 # (9, h3*w3, h2*w2)
  c.append(params["enc2_w"].reshape(9 * 64, 128).astype(bf))
  c.append(params["enc2_b"].reshape(1, 128))
  # decoder 1: ConvTranspose2d(128, 64), h3 x w3 -> h2 x w2
  c.append(jnp.asarray(_dec_tap_selects(h3, w3), bf))             # (4, h3*w3, h3*w3)
  c.append(_pack_deconv_w(params["dec0_w"]).astype(bf))           # (512, 256)
  c.append(jnp.tile(params["dec0_b"], 4).reshape(1, 4 * 64))
  c.append(jnp.asarray(_dec_unpack(h3, w3), bf))                  # (4, h2*w2, h3*w3)
  # decoder 2: ConvTranspose2d(64, 32), h2 x w2 -> h1 x w1
  c.append(jnp.asarray(_dec_tap_selects(h2, w2), bf))             # (4, h2*w2, h2*w2)
  c.append(_pack_deconv_w(params["dec1_w"]).astype(bf))           # (256, 128)
  c.append(jnp.tile(params["dec1_b"], 4).reshape(1, 4 * 32))
  c.append(jnp.asarray(_dec_unpack(h2, w2), bf))                  # (4, h1*w1, h2*w2)
  # decoder 3: ConvTranspose2d(32, 1), h1 x w1 -> height x width (stays phase-packed)
  c.append(jnp.asarray(_dec_tap_selects(h1, w1), bf))             # (4, h1*w1, h1*w1)
  c.append(_pack_deconv_w(params["dec2_w"]).astype(bf))           # (128, 4)
  c.append(jnp.tile(params["dec2_b"], 4).reshape(1, 4 * 1))
  return tuple(c)


# ----------------------------------------------------------------------------
# The fused Pallas kernel: whole autoencoder for one image per grid step.
# ----------------------------------------------------------------------------
def _fused_kernel(t1_ref, w1_ref, b1_ref,
                  se2_ref, w2_ref, b2_ref,
                  se3_ref, w3_ref, b3_ref,
                  sd1_ref, wd1_ref, bd1_ref, u1_ref,
                  sd2_ref, wd2_ref, bd2_ref, u2_ref,
                  sd3_ref, wd3_ref, bd3_ref,
                  out_ref):
  bf16, f32 = jnp.bfloat16, jnp.float32
  relu = lambda v: jnp.maximum(v, 0.0)

  def gather_taps(sel_ref, a):
    # sel_ref: (T, m_out, m_in) one-hot; a: (m_in, C) -> (m_out, T*C)
    a16 = a.astype(bf16)
    return jnp.concatenate(
        [jnp.dot(sel_ref[t], a16, preferred_element_type=f32)
         for t in range(sel_ref.shape[0])], axis=-1)

  def conv(taps, w_ref, b_ref, act):
    # single MXU matmul over the packed contraction axis, f32 acc + bias + act
    y = jnp.dot(taps.astype(bf16), w_ref[...], preferred_element_type=f32)
    return act(y + b_ref[...])

  def unpack(u_ref, z):
    # phase-packed (m_in, 4*Co) -> interleaved raster (4*m_in, Co)
    co = z.shape[-1] // 4
    z16 = z.astype(bf16)
    parts = [jnp.dot(u_ref[p], z16[:, p * co:(p + 1) * co],
                     preferred_element_type=f32) for p in range(4)]
    return parts[0] + parts[1] + parts[2] + parts[3]

  # ---- encoder: 3x (stride-2 conv + ReLU) ----
  a1 = conv(t1_ref[...], w1_ref, b1_ref, relu)                       # (m1, 32)
  a2 = conv(gather_taps(se2_ref, a1), w2_ref, b2_ref, relu)          # (m2, 64)
  a3 = conv(gather_taps(se3_ref, a2), w3_ref, b3_ref, relu)          # (m3, 128)

  # ---- decoder: 2x (phase ConvTranspose + ReLU) + (phase ConvTranspose + Sigmoid)
  z1 = conv(gather_taps(sd1_ref, a3), wd1_ref, bd1_ref, relu)        # (m3, 256)
  a4 = unpack(u1_ref, z1)                                            # (m2, 64)
  z2 = conv(gather_taps(sd2_ref, a4), wd2_ref, bd2_ref, relu)        # (m2, 128)
  a5 = unpack(u2_ref, z2)                                            # (m1, 32)
  z3 = conv(gather_taps(sd3_ref, a5), wd3_ref, bd3_ref, jax.nn.sigmoid)  # (m1, 4)

  out_ref[...] = z3.astype(out_ref.dtype)


# ----------------------------------------------------------------------------
# Forward pass (NCHW in / NCHW out, like the PyTorch module).
# ----------------------------------------------------------------------------
def cnn_autoencoder_forward(packed, x_nchw):
  n, c, h, w = x_nchw.shape
  x = jnp.transpose(x_nchw, (0, 2, 3, 1))                 # NCHW -> NHWC
  ho, wo = h // 2, w // 2
  m1 = ho * wo                                            # per-image rows

  # Layer-1 im2col (9 taps, Cin = 1) at the kernel input boundary.
  xp = jnp.pad(x, ((0, 0), (1, 1), (1, 1), (0, 0)))
  taps = []
  for kh in range(K):
    for kw in range(K):
      taps.append(xp[:, kh:kh + 2 * ho - 1:2, kw:kw + 2 * wo - 1:2, :])
  taps1 = jnp.concatenate(taps, axis=-1).reshape(n * m1, 9 * c).astype(jnp.bfloat16)

  def _const_spec(arr):
    zeros = (0,) * arr.ndim
    return pl.BlockSpec(arr.shape, lambda b: zeros)

  in_specs = [pl.BlockSpec((m1, 9 * c), lambda b: (b, 0))]
  in_specs += [_const_spec(a) for a in packed]

  z = pl.pallas_call(
      _fused_kernel,
      grid=(n,),
      out_shape=jax.ShapeDtypeStruct((n * m1, 4), jnp.float32),
      in_specs=in_specs,
      out_specs=pl.BlockSpec((m1, 4), lambda b: (b, 0)),
      compiler_params=pltpu.CompilerParams(dimension_semantics=("parallel",)),
  )(taps1, *packed)

  # Interleave the 4 output phases: rows (n, i, j), cols (r, s, co=1).
  y = z.reshape(n, ho, wo, 2, 2, 1)
  y = jnp.transpose(y, (0, 1, 3, 2, 4, 5)).reshape(n, h, w, 1)
  return jnp.transpose(y, (0, 3, 1, 2))                   # NHWC -> NCHW


# ----------------------------------------------------------------------------
# Parameters (deterministic synthetic init, same shapes / init as the nn.Module)
# ----------------------------------------------------------------------------
def init_params(key):
  def uniform(k, shape, fan_in):
    bound = 1.0 / jnp.sqrt(jnp.float32(fan_in))
    return jax.random.uniform(k, shape, jnp.float32, -bound, bound)

  enc_io = [(1, 32), (32, 64), (64, 128)]     # Conv2d(ci, co, 3, s=2, p=1)
  dec_io = [(128, 64), (64, 32), (32, 1)]     # ConvTranspose2d(ci, co, 3, ...)
  keys = jax.random.split(key, 12)
  p = {}
  for i, (ci, co) in enumerate(enc_io):
    fan_in = ci * K * K
    p[f"enc{i}_w"] = uniform(keys[2 * i], (K, K, ci, co), fan_in)      # HWIO
    p[f"enc{i}_b"] = uniform(keys[2 * i + 1], (co,), fan_in)
  for i, (ci, co) in enumerate(dec_io):
    fan_in = co * K * K
    p[f"dec{i}_w"] = uniform(keys[6 + 2 * i], (ci, co, K, K), fan_in)  # torch layout
    p[f"dec{i}_b"] = uniform(keys[6 + 2 * i + 1], (co,), fan_in)
  return p


# ----------------------------------------------------------------------------
# Pure-JAX (XLA) reference with matching bf16 operand rounding, for validation.
# ----------------------------------------------------------------------------
def _reference_forward(params, x_nchw):
  rt = lambda a: a.astype(jnp.bfloat16).astype(jnp.float32)
  dn = ("NHWC", "HWIO", "NHWC")
  x = jnp.transpose(x_nchw, (0, 2, 3, 1))
  for i in range(3):  # encoder
    x = jax.lax.conv_general_dilated(
        rt(x), rt(params[f"enc{i}_w"]), window_strides=(2, 2),
        padding=((1, 1), (1, 1)), dimension_numbers=dn)
    x = jnp.maximum(x + params[f"enc{i}_b"], 0.0)
  for i in range(3):  # decoder: dilate by 2, pad (1, 2), flipped kernel, stride 1
    w_t = params[f"dec{i}_w"]
    w = rt(jnp.transpose(w_t[:, :, ::-1, ::-1], (2, 3, 0, 1)))
    x = jax.lax.conv_general_dilated(
        rt(x), w, window_strides=(1, 1), padding=((1, 2), (1, 2)),
        lhs_dilation=(2, 2), dimension_numbers=dn)
    x = x + params[f"dec{i}_b"]
    x = jnp.maximum(x, 0.0) if i < 2 else jax.nn.sigmoid(x)
  return jnp.transpose(x, (0, 3, 1, 2))


if __name__ == "__main__":
  key = jax.random.PRNGKey(0)
  pkey, xkey = jax.random.split(key)
  params = init_params(pkey)
  x = jax.random.normal(xkey, (2, 1, 16, 16), jnp.float32)   # NCHW like PyTorch

  packed = prepack(params, 16, 16)                           # one-time weight packing
  fwd = jax.jit(cnn_autoencoder_forward)
  y = jax.block_until_ready(fwd(packed, x))

  assert y.shape == (2, 1, 16, 16), y.shape
  assert y.dtype == jnp.float32
  assert bool(jnp.all(y >= 0.0)) and bool(jnp.all(y <= 1.0))  # sigmoid range

  # Numerical check against the pure-JAX reference (same bf16 operand rounding).
  y_ref = jax.block_until_ready(jax.jit(_reference_forward)(params, x))
  max_err = float(jnp.max(jnp.abs(y - y_ref)))
  assert max_err < 5e-3, f"mismatch vs reference: {max_err}"

  print("KERNEL_OK")
</pallas_src>

<mosaic_0001>
module attributes {stable_mosaic.version = 11 : i64} {
  func.func @_fused_kernel(%arg0: i32, %arg1: memref<64x9xbf16, #tpu.memory_space<vmem>>, %arg2: memref<9x32xbf16, #tpu.memory_space<vmem>>, %arg3: memref<1x32xf32, #tpu.memory_space<vmem>>, %arg4: memref<9x16x64xbf16, #tpu.memory_space<vmem>>, %arg5: memref<288x64xbf16, #tpu.memory_space<vmem>>, %arg6: memref<1x64xf32, #tpu.memory_space<vmem>>, %arg7: memref<9x4x16xbf16, #tpu.memory_space<vmem>>, %arg8: memref<576x128xbf16, #tpu.memory_space<vmem>>, %arg9: memref<1x128xf32, #tpu.memory_space<vmem>>, %arg10: memref<4x4x4xbf16, #tpu.memory_space<vmem>>, %arg11: memref<512x256xbf16, #tpu.memory_space<vmem>>, %arg12: memref<1x256xf32, #tpu.memory_space<vmem>>, %arg13: memref<4x16x4xbf16, #tpu.memory_space<vmem>>, %arg14: memref<4x16x16xbf16, #tpu.memory_space<vmem>>, %arg15: memref<256x128xbf16, #tpu.memory_space<vmem>>, %arg16: memref<1x128xf32, #tpu.memory_space<vmem>>, %arg17: memref<4x64x16xbf16, #tpu.memory_space<vmem>>, %arg18: memref<4x64x64xbf16, #tpu.memory_space<vmem>>, %arg19: memref<128x4xbf16, #tpu.memory_space<vmem>>, %arg20: memref<1x4xf32, #tpu.memory_space<vmem>>, %arg21: memref<64x4xf32, #tpu.memory_space<vmem>>) attributes {dimension_semantics = [#tpu.dimension_semantics<parallel>], iteration_bounds = array<i64: 2>, scalar_prefetch = 0 : i64, scratch_operands = 0 : i64, tpu.core_type = #tpu.core_type<tc>, window_params = [{transform_indices = @transform_0, window_bounds = array<i64: 64, 9>}, {pipeline_mode = #tpu.pipeline_mode<synchronous>, transform_indices = @transform_1, window_bounds = array<i64: 9, 32>}, {pipeline_mode = #tpu.pipeline_mode<synchronous>, transform_indices = @transform_2, window_bounds = array<i64: 1, 32>}, {pipeline_mode = #tpu.pipeline_mode<synchronous>, transform_indices = @transform_3, window_bounds = array<i64: 9, 16, 64>}, {pipeline_mode = #tpu.pipeline_mode<synchronous>, transform_indices = @transform_4, window_bounds = array<i64: 288, 64>}, {pipeline_mode = #tpu.pipeline_mode<synchronous>, transform_indices = @transform_5, window_bounds = array<i64: 1, 64>}, {pipeline_mode = #tpu.pipeline_mode<synchronous>, transform_indices = @transform_6, window_bounds = array<i64: 9, 4, 16>}, {pipeline_mode = #tpu.pipeline_mode<synchronous>, transform_indices = @transform_7, window_bounds = array<i64: 576, 128>}, {pipeline_mode = #tpu.pipeline_mode<synchronous>, transform_indices = @transform_8, window_bounds = array<i64: 1, 128>}, {pipeline_mode = #tpu.pipeline_mode<synchronous>, transform_indices = @transform_9, window_bounds = array<i64: 4, 4, 4>}, {pipeline_mode = #tpu.pipeline_mode<synchronous>, transform_indices = @transform_10, window_bounds = array<i64: 512, 256>}, {pipeline_mode = #tpu.pipeline_mode<synchronous>, transform_indices = @transform_11, window_bounds = array<i64: 1, 256>}, {pipeline_mode = #tpu.pipeline_mode<synchronous>, transform_indices = @transform_12, window_bounds = array<i64: 4, 16, 4>}, {pipeline_mode = #tpu.pipeline_mode<synchronous>, transform_indices = @transform_13, window_bounds = array<i64: 4, 16, 16>}, {pipeline_mode = #tpu.pipeline_mode<synchronous>, transform_indices = @transform_14, window_bounds = array<i64: 256, 128>}, {pipeline_mode = #tpu.pipeline_mode<synchronous>, transform_indices = @transform_15, window_bounds = array<i64: 1, 128>}, {pipeline_mode = #tpu.pipeline_mode<synchronous>, transform_indices = @transform_16, window_bounds = array<i64: 4, 64, 16>}, {pipeline_mode = #tpu.pipeline_mode<synchronous>, transform_indices = @transform_17, window_bounds = array<i64: 4, 64, 64>}, {pipeline_mode = #tpu.pipeline_mode<synchronous>, transform_indices = @transform_18, window_bounds = array<i64: 128, 4>}, {pipeline_mode = #tpu.pipeline_mode<synchronous>, transform_indices = @transform_19, window_bounds = array<i64: 1, 4>}, {transform_indices = @transform_20, window_bounds = array<i64: 64, 4>}]} {
    %c0 = arith.constant 0 : index
    %c0_0 = arith.constant 0 : index
    %0 = vector.load %arg1[%c0, %c0_0] : memref<64x9xbf16, #tpu.memory_space<vmem>>, vector<64x9xbf16>
    %c0_1 = arith.constant 0 : index
    %c0_2 = arith.constant 0 : index
    %1 = vector.load %arg2[%c0_1, %c0_2] : memref<9x32xbf16, #tpu.memory_space<vmem>>, vector<9x32xbf16>
    %cst = arith.constant dense<0.000000e+00> : vector<64x32xf32>
    %2 = tpu.matmul %0, %1, %cst {dimension_numbers = #tpu.dot_dimension_numbers<[1], [0], [0], [1], [0, 0, 1, 1], [], []>} : vector<64x9xbf16>, vector<9x32xbf16>, vector<64x32xf32> -> vector<64x32xf32>
    %c0_3 = arith.constant 0 : index
    %c0_4 = arith.constant 0 : index
    %3 = vector.load %arg3[%c0_3, %c0_4] : memref<1x32xf32, #tpu.memory_space<vmem>>, vector<1x32xf32>
    %4 = vector.broadcast %3 : vector<1x32xf32> to vector<64x32xf32>
    %5 = arith.addf %2, %4 : vector<64x32xf32>
    %cst_5 = arith.constant 0.000000e+00 : f32
    %6 = vector.broadcast %cst_5 : f32 to vector<64x32xf32>
    %7 = arith.maximumf %5, %6 : vector<64x32xf32>
    %8 = arith.truncf %7 : vector<64x32xf32> to vector<64x32xbf16>
    %c0_6 = arith.constant 0 : index
    %c0_7 = arith.constant 0 : index
    %c0_8 = arith.constant 0 : index
    %9 = vector.load %arg4[%c0_6, %c0_7, %c0_8] : memref<9x16x64xbf16, #tpu.memory_space<vmem>>, vector<1x16x64xbf16>
    %10 = vector.shape_cast %9 : vector<1x16x64xbf16> to vector<16x64xbf16>
    %cst_9 = arith.constant dense<0.000000e+00> : vector<16x32xf32>
    %11 = tpu.matmul %10, %8, %cst_9 {dimension_numbers = #tpu.dot_dimension_numbers<[1], [0], [0], [1], [0, 0, 1, 1], [], []>} : vector<16x64xbf16>, vector<64x32xbf16>, vector<16x32xf32> -> vector<16x32xf32>
    %c1 = arith.constant 1 : index
    %c0_10 = arith.constant 0 : index
    %c0_11 = arith.constant 0 : index
    %12 = vector.load %arg4[%c1, %c0_10, %c0_11] : memref<9x16x64xbf16, #tpu.memory_space<vmem>>, vector<1x16x64xbf16>
    %13 = vector.shape_cast %12 : vector<1x16x64xbf16> to vector<16x64xbf16>
    %cst_12 = arith.constant dense<0.000000e+00> : vector<16x32xf32>
    %14 = tpu.matmul %13, %8, %cst_12 {dimension_numbers = #tpu.dot_dimension_numbers<[1], [0], [0], [1], [0, 0, 1, 1], [], []>} : vector<16x64xbf16>, vector<64x32xbf16>, vector<16x32xf32> -> vector<16x32xf32>
    %c2 = arith.constant 2 : index
    %c0_13 = arith.constant 0 : index
    %c0_14 = arith.constant 0 : index
    %15 = vector.load %arg4[%c2, %c0_13, %c0_14] : memref<9x16x64xbf16, #tpu.memory_space<vmem>>, vector<1x16x64xbf16>
    %16 = vector.shape_cast %15 : vector<1x16x64xbf16> to vector<16x64xbf16>
    %cst_15 = arith.constant dense<0.000000e+00> : vector<16x32xf32>
    %17 = tpu.matmul %16, %8, %cst_15 {dimension_numbers = #tpu.dot_dimension_numbers<[1], [0], [0], [1], [0, 0, 1, 1], [], []>} : vector<16x64xbf16>, vector<64x32xbf16>, vector<16x32xf32> -> vector<16x32xf32>
    %c3 = arith.constant 3 : index
    %c0_16 = arith.constant 0 : index
    %c0_17 = arith.constant 0 : index
    %18 = vector.load %arg4[%c3, %c0_16, %c0_17] : memref<9x16x64xbf16, #tpu.memory_space<vmem>>, vector<1x16x64xbf16>
    %19 = vector.shape_cast %18 : vector<1x16x64xbf16> to vector<16x64xbf16>
    %cst_18 = arith.constant dense<0.000000e+00> : vector<16x32xf32>
    %20 = tpu.matmul %19, %8, %cst_18 {dimension_numbers = #tpu.dot_dimension_numbers<[1], [0], [0], [1], [0, 0, 1, 1], [], []>} : vector<16x64xbf16>, vector<64x32xbf16>, vector<16x32xf32> -> vector<16x32xf32>
    %c4 = arith.constant 4 : index
    %c0_19 = arith.constant 0 : index
    %c0_20 = arith.constant 0 : index
    %21 = vector.load %arg4[%c4, %c0_19, %c0_20] : memref<9x16x64xbf16, #tpu.memory_space<vmem>>, vector<1x16x64xbf16>
    %22 = vector.shape_cast %21 : vector<1x16x64xbf16> to vector<16x64xbf16>
    %cst_21 = arith.constant dense<0.000000e+00> : vector<16x32xf32>
    %23 = tpu.matmul %22, %8, %cst_21 {dimension_numbers = #tpu.dot_dimension_numbers<[1], [0], [0], [1], [0, 0, 1, 1], [], []>} : vector<16x64xbf16>, vector<64x32xbf16>, vector<16x32xf32> -> vector<16x32xf32>
    %c5 = arith.constant 5 : index
    %c0_22 = arith.constant 0 : index
    %c0_23 = arith.constant 0 : index
    %24 = vector.load %arg4[%c5, %c0_22, %c0_23] : memref<9x16x64xbf16, #tpu.memory_space<vmem>>, vector<1x16x64xbf16>
    %25 = vector.shape_cast %24 : vector<1x16x64xbf16> to vector<16x64xbf16>
    %cst_24 = arith.constant dense<0.000000e+00> : vector<16x32xf32>
    %26 = tpu.matmul %25, %8, %cst_24 {dimension_numbers = #tpu.dot_dimension_numbers<[1], [0], [0], [1], [0, 0, 1, 1], [], []>} : vector<16x64xbf16>, vector<64x32xbf16>, vector<16x32xf32> -> vector<16x32xf32>
    %c6 = arith.constant 6 : index
    %c0_25 = arith.constant 0 : index
    %c0_26 = arith.constant 0 : index
    %27 = vector.load %arg4[%c6, %c0_25, %c0_26] : memref<9x16x64xbf16, #tpu.memory_space<vmem>>, vector<1x16x64xbf16>
    %28 = vector.shape_cast %27 : vector<1x16x64xbf16> to vector<16x64xbf16>
    %cst_27 = arith.constant dense<0.000000e+00> : vector<16x32xf32>
    %29 = tpu.matmul %28, %8, %cst_27 {dimension_numbers = #tpu.dot_dimension_numbers<[1], [0], [0], [1], [0, 0, 1, 1], [], []>} : vector<16x64xbf16>, vector<64x32xbf16>, vector<16x32xf32> -> vector<16x32xf32>
    %c7 = arith.constant 7 : index
    %c0_28 = arith.constant 0 : index
    %c0_29 = arith.constant 0 : index
    %30 = vector.load %arg4[%c7, %c0_28, %c0_29] : memref<9x16x64xbf16, #tpu.memory_space<vmem>>, vector<1x16x64xbf16>
    %31 = vector.shape_cast %30 : vector<1x16x64xbf16> to vector<16x64xbf16>
    %cst_30 = arith.constant dense<0.000000e+00> : vector<16x32xf32>
    %32 = tpu.matmul %31, %8, %cst_30 {dimension_numbers = #tpu.dot_dimension_numbers<[1], [0], [0], [1], [0, 0, 1, 1], [], []>} : vector<16x64xbf16>, vector<64x32xbf16>, vector<16x32xf32> -> vector<16x32xf32>
    %c8 = arith.constant 8 : index
    %c0_31 = arith.constant 0 : index
    %c0_32 = arith.constant 0 : index
    %33 = vector.load %arg4[%c8, %c0_31, %c0_32] : memref<9x16x64xbf16, #tpu.memory_space<vmem>>, vector<1x16x64xbf16>
    %34 = vector.shape_cast %33 : vector<1x16x64xbf16> to vector<16x64xbf16>
    %cst_33 = arith.constant dense<0.000000e+00> : vector<16x32xf32>
    %35 = tpu.matmul %34, %8, %cst_33 {dimension_numbers = #tpu.dot_dimension_numbers<[1], [0], [0], [1], [0, 0, 1, 1], [], []>} : vector<16x64xbf16>, vector<64x32xbf16>, vector<16x32xf32> -> vector<16x32xf32>
    %36 = tpu.concatenate %11, %14, %17, %20, %23, %26, %29, %32, %35 in 1 : vector<16x32xf32>, vector<16x32xf32>, vector<16x32xf32>, vector<16x32xf32>, vector<16x32xf32>, vector<16x32xf32>, vector<16x32xf32>, vector<16x32xf32>, vector<16x32xf32> -> vector<16x288xf32>
    %37 = arith.truncf %36 : vector<16x288xf32> to vector<16x288xbf16>
    %c0_34 = arith.constant 0 : index
    %c0_35 = arith.constant 0 : index
    %38 = vector.load %arg5[%c0_34, %c0_35] : memref<288x64xbf16, #tpu.memory_space<vmem>>, vector<288x64xbf16>
    %cst_36 = arith.constant dense<0.000000e+00> : vector<16x64xf32>
    %39 = tpu.matmul %37, %38, %cst_36 {dimension_numbers = #tpu.dot_dimension_numbers<[1], [0], [0], [1], [0, 0, 1, 1], [], []>} : vector<16x288xbf16>, vector<288x64xbf16>, vector<16x64xf32> -> vector<16x64xf32>
    %c0_37 = arith.constant 0 : index
    %c0_38 = arith.constant 0 : index
    %40 = vector.load %arg6[%c0_37, %c0_38] : memref<1x64xf32, #tpu.memory_space<vmem>>, vector<1x64xf32>
    %41 = vector.broadcast %40 : vector<1x64xf32> to vector<16x64xf32>
    %42 = arith.addf %39, %41 : vector<16x64xf32>
    %cst_39 = arith.constant 0.000000e+00 : f32
    %43 = vector.broadcast %cst_39 : f32 to vector<16x64xf32>
    %44 = arith.maximumf %42, %43 : vector<16x64xf32>
    %45 = arith.truncf %44 : vector<16x64xf32> to vector<16x64xbf16>
    %c0_40 = arith.constant 0 : index
    %c0_41 = arith.constant 0 : index
    %c0_42 = arith.constant 0 : index
    %46 = vector.load %arg7[%c0_40, %c0_41, %c0_42] : memref<9x4x16xbf16, #tpu.memory_space<vmem>>, vector<1x4x16xbf16>
    %47 = vector.shape_cast %46 : vector<1x4x16xbf16> to vector<4x16xbf16>
    %cst_43 = arith.constant dense<0.000000e+00> : vector<4x64xf32>
    %48 = tpu.matmul %47, %45, %cst_43 {dimension_numbers = #tpu.dot_dimension_numbers<[1], [0], [0], [1], [0, 0, 1, 1], [], []>} : vector<4x16xbf16>, vector<16x64xbf16>, vector<4x64xf32> -> vector<4x64xf32>
    %c1_44 = arith.constant 1 : index
    %c0_45 = arith.constant 0 : index
    %c0_46 = arith.constant 0 : index
    %49 = vector.load %arg7[%c1_44, %c0_45, %c0_46] : memref<9x4x16xbf16, #tpu.memory_space<vmem>>, vector<1x4x16xbf16>
    %50 = vector.shape_cast %49 : vector<1x4x16xbf16> to vector<4x16xbf16>
    %cst_47 = arith.constant dense<0.000000e+00> : vector<4x64xf32>
    %51 = tpu.matmul %50, %45, %cst_47 {dimension_numbers = #tpu.dot_dimension_numbers<[1], [0], [0], [1], [0, 0, 1, 1], [], []>} : vector<4x16xbf16>, vector<16x64xbf16>, vector<4x64xf32> -> vector<4x64xf32>
    %c2_48 = arith.constant 2 : index
    %c0_49 = arith.constant 0 : index
    %c0_50 = arith.constant 0 : index
    %52 = vector.load %arg7[%c2_48, %c0_49, %c0_50] : memref<9x4x16xbf16, #tpu.memory_space<vmem>>, vector<1x4x16xbf16>
    %53 = vector.shape_cast %52 : vector<1x4x16xbf16> to vector<4x16xbf16>
    %cst_51 = arith.constant dense<0.000000e+00> : vector<4x64xf32>
    %54 = tpu.matmul %53, %45, %cst_51 {dimension_numbers = #tpu.dot_dimension_numbers<[1], [0], [0], [1], [0, 0, 1, 1], [], []>} : vector<4x16xbf16>, vector<16x64xbf16>, vector<4x64xf32> -> vector<4x64xf32>
    %c3_52 = arith.constant 3 : index
    %c0_53 = arith.constant 0 : index
    %c0_54 = arith.constant 0 : index
    %55 = vector.load %arg7[%c3_52, %c0_53, %c0_54] : memref<9x4x16xbf16, #tpu.memory_space<vmem>>, vector<1x4x16xbf16>
    %56 = vector.shape_cast %55 : vector<1x4x16xbf16> to vector<4x16xbf16>
    %cst_55 = arith.constant dense<0.000000e+00> : vector<4x64xf32>
    %57 = tpu.matmul %56, %45, %cst_55 {dimension_numbers = #tpu.dot_dimension_numbers<[1], [0], [0], [1], [0, 0, 1, 1], [], []>} : vector<4x16xbf16>, vector<16x64xbf16>, vector<4x64xf32> -> vector<4x64xf32>
    %c4_56 = arith.constant 4 : index
    %c0_57 = arith.constant 0 : index
    %c0_58 = arith.constant 0 : index
    %58 = vector.load %arg7[%c4_56, %c0_57, %c0_58] : memref<9x4x16xbf16, #tpu.memory_space<vmem>>, vector<1x4x16xbf16>
    %59 = vector.shape_cast %58 : vector<1x4x16xbf16> to vector<4x16xbf16>
    %cst_59 = arith.constant dense<0.000000e+00> : vector<4x64xf32>
    %60 = tpu.matmul %59, %45, %cst_59 {dimension_numbers = #tpu.dot_dimension_numbers<[1], [0], [0], [1], [0, 0, 1, 1], [], []>} : vector<4x16xbf16>, vector<16x64xbf16>, vector<4x64xf32> -> vector<4x64xf32>
    %c5_60 = arith.constant 5 : index
    %c0_61 = arith.constant 0 : index
    %c0_62 = arith.constant 0 : index
    %61 = vector.load %arg7[%c5_60, %c0_61, %c0_62] : memref<9x4x16xbf16, #tpu.memory_space<vmem>>, vector<1x4x16xbf16>
    %62 = vector.shape_cast %61 : vector<1x4x16xbf16> to vector<4x16xbf16>
    %cst_63 = arith.constant dense<0.000000e+00> : vector<4x64xf32>
    %63 = tpu.matmul %62, %45, %cst_63 {dimension_numbers = #tpu.dot_dimension_numbers<[1], [0], [0], [1], [0, 0, 1, 1], [], []>} : vector<4x16xbf16>, vector<16x64xbf16>, vector<4x64xf32> -> vector<4x64xf32>
    %c6_64 = arith.constant 6 : index
    %c0_65 = arith.constant 0 : index
    %c0_66 = arith.constant 0 : index
    %64 = vector.load %arg7[%c6_64, %c0_65, %c0_66] : memref<9x4x16xbf16, #tpu.memory_space<vmem>>, vector<1x4x16xbf16>
    %65 = vector.shape_cast %64 : vector<1x4x16xbf16> to vector<4x16xbf16>
    %cst_67 = arith.constant dense<0.000000e+00> : vector<4x64xf32>
    %66 = tpu.matmul %65, %45, %cst_67 {dimension_numbers = #tpu.dot_dimension_numbers<[1], [0], [0], [1], [0, 0, 1, 1], [], []>} : vector<4x16xbf16>, vector<16x64xbf16>, vector<4x64xf32> -> vector<4x64xf32>
    %c7_68 = arith.constant 7 : index
    %c0_69 = arith.constant 0 : index
    %c0_70 = arith.constant 0 : index
    %67 = vector.load %arg7[%c7_68, %c0_69, %c0_70] : memref<9x4x16xbf16, #tpu.memory_space<vmem>>, vector<1x4x16xbf16>
    %68 = vector.shape_cast %67 : vector<1x4x16xbf16> to vector<4x16xbf16>
    %cst_71 = arith.constant dense<0.000000e+00> : vector<4x64xf32>
    %69 = tpu.matmul %68, %45, %cst_71 {dimension_numbers = #tpu.dot_dimension_numbers<[1], [0], [0], [1], [0, 0, 1, 1], [], []>} : vector<4x16xbf16>, vector<16x64xbf16>, vector<4x64xf32> -> vector<4x64xf32>
    %c8_72 = arith.constant 8 : index
    %c0_73 = arith.constant 0 : index
    %c0_74 = arith.constant 0 : index
    %70 = vector.load %arg7[%c8_72, %c0_73, %c0_74] : memref<9x4x16xbf16, #tpu.memory_space<vmem>>, vector<1x4x16xbf16>
    %71 = vector.shape_cast %70 : vector<1x4x16xbf16> to vector<4x16xbf16>
    %cst_75 = arith.constant dense<0.000000e+00> : vector<4x64xf32>
    %72 = tpu.matmul %71, %45, %cst_75 {dimension_numbers = #tpu.dot_dimension_numbers<[1], [0], [0], [1], [0, 0, 1, 1], [], []>} : vector<4x16xbf16>, vector<16x64xbf16>, vector<4x64xf32> -> vector<4x64xf32>
    %73 = tpu.concatenate %48, %51, %54, %57, %60, %63, %66, %69, %72 in 1 : vector<4x64xf32>, vector<4x64xf32>, vector<4x64xf32>, vector<4x64xf32>, vector<4x64xf32>, vector<4x64xf32>, vector<4x64xf32>, vector<4x64xf32>, vector<4x64xf32> -> vector<4x576xf32>
    %74 = arith.truncf %73 : vector<4x576xf32> to vector<4x576xbf16>
    %c0_76 = arith.constant 0 : index
    %c0_77 = arith.constant 0 : index
    %75 = vector.load %arg8[%c0_76, %c0_77] : memref<576x128xbf16, #tpu.memory_space<vmem>>, vector<576x128xbf16>
    %cst_78 = arith.constant dense<0.000000e+00> : vector<4x128xf32>
    %76 = tpu.matmul %74, %75, %cst_78 {dimension_numbers = #tpu.dot_dimension_numbers<[1], [0], [0], [1], [0, 0, 1, 1], [], []>} : vector<4x576xbf16>, vector<576x128xbf16>, vector<4x128xf32> -> vector<4x128xf32>
    %c0_79 = arith.constant 0 : index
    %c0_80 = arith.constant 0 : index
    %77 = vector.load %arg9[%c0_79, %c0_80] : memref<1x128xf32, #tpu.memory_space<vmem>>, vector<1x128xf32>
    %78 = vector.broadcast %77 : vector<1x128xf32> to vector<4x128xf32>
    %79 = arith.addf %76, %78 : vector<4x128xf32>
    %cst_81 = arith.constant 0.000000e+00 : f32
    %80 = vector.broadcast %cst_81 : f32 to vector<4x128xf32>
    %81 = arith.maximumf %79, %80 : vector<4x128xf32>
    %82 = arith.truncf %81 : vector<4x128xf32> to vector<4x128xbf16>
    %c0_82 = arith.constant 0 : index
    %c0_83 = arith.constant 0 : index
    %c0_84 = arith.constant 0 : index
    %83 = vector.load %arg10[%c0_82, %c0_83, %c0_84] : memref<4x4x4xbf16, #tpu.memory_space<vmem>>, vector<1x4x4xbf16>
    %84 = vector.shape_cast %83 : vector<1x4x4xbf16> to vector<4x4xbf16>
    %cst_85 = arith.constant dense<0.000000e+00> : vector<4x128xf32>
    %85 = tpu.matmul %84, %82, %cst_85 {dimension_numbers = #tpu.dot_dimension_numbers<[1], [0], [0], [1], [0, 0, 1, 1], [], []>} : vector<4x4xbf16>, vector<4x128xbf16>, vector<4x128xf32> -> vector<4x128xf32>
    %c1_86 = arith.constant 1 : index
    %c0_87 = arith.constant 0 : index
    %c0_88 = arith.constant 0 : index
    %86 = vector.load %arg10[%c1_86, %c0_87, %c0_88] : memref<4x4x4xbf16, #tpu.memory_space<vmem>>, vector<1x4x4xbf16>
    %87 = vector.shape_cast %86 : vector<1x4x4xbf16> to vector<4x4xbf16>
    %cst_89 = arith.constant dense<0.000000e+00> : vector<4x128xf32>
    %88 = tpu.matmul %87, %82, %cst_89 {dimension_numbers = #tpu.dot_dimension_numbers<[1], [0], [0], [1], [0, 0, 1, 1], [], []>} : vector<4x4xbf16>, vector<4x128xbf16>, vector<4x128xf32> -> vector<4x128xf32>
    %c2_90 = arith.constant 2 : index
    %c0_91 = arith.constant 0 : index
    %c0_92 = arith.constant 0 : index
    %89 = vector.load %arg10[%c2_90, %c0_91, %c0_92] : memref<4x4x4xbf16, #tpu.memory_space<vmem>>, vector<1x4x4xbf16>
    %90 = vector.shape_cast %89 : vector<1x4x4xbf16> to vector<4x4xbf16>
    %cst_93 = arith.constant dense<0.000000e+00> : vector<4x128xf32>
    %91 = tpu.matmul %90, %82, %cst_93 {dimension_numbers = #tpu.dot_dimension_numbers<[1], [0], [0], [1], [0, 0, 1, 1], [], []>} : vector<4x4xbf16>, vector<4x128xbf16>, vector<4x128xf32> -> vector<4x128xf32>
    %c3_94 = arith.constant 3 : index
    %c0_95 = arith.constant 0 : index
    %c0_96 = arith.constant 0 : index
    %92 = vector.load %arg10[%c3_94, %c0_95, %c0_96] : memref<4x4x4xbf16, #tpu.memory_space<vmem>>, vector<1x4x4xbf16>
    %93 = vector.shape_cast %92 : vector<1x4x4xbf16> to vector<4x4xbf16>
    %cst_97 = arith.constant dense<0.000000e+00> : vector<4x128xf32>
    %94 = tpu.matmul %93, %82, %cst_97 {dimension_numbers = #tpu.dot_dimension_numbers<[1], [0], [0], [1], [0, 0, 1, 1], [], []>} : vector<4x4xbf16>, vector<4x128xbf16>, vector<4x128xf32> -> vector<4x128xf32>
    %95 = tpu.concatenate %85, %88, %91, %94 in 1 : vector<4x128xf32>, vector<4x128xf32>, vector<4x128xf32>, vector<4x128xf32> -> vector<4x512xf32>
    %96 = arith.truncf %95 : vector<4x512xf32> to vector<4x512xbf16>
    %c0_98 = arith.constant 0 : index
    %c0_99 = arith.constant 0 : index
    %97 = vector.load %arg11[%c0_98, %c0_99] : memref<512x256xbf16, #tpu.memory_space<vmem>>, vector<512x256xbf16>
    %cst_100 = arith.constant dense<0.000000e+00> : vector<4x256xf32>
    %98 = tpu.matmul %96, %97, %cst_100 {dimension_numbers = #tpu.dot_dimension_numbers<[1], [0], [0], [1], [0, 0, 1, 1], [], []>} : vector<4x512xbf16>, vector<512x256xbf16>, vector<4x256xf32> -> vector<4x256xf32>
    %c0_101 = arith.constant 0 : index
    %c0_102 = arith.constant 0 : index
    %99 = vector.load %arg12[%c0_101, %c0_102] : memref<1x256xf32, #tpu.memory_space<vmem>>, vector<1x256xf32>
    %100 = vector.broadcast %99 : vector<1x256xf32> to vector<4x256xf32>
    %101 = arith.addf %98, %100 : vector<4x256xf32>
    %cst_103 = arith.constant 0.000000e+00 : f32
    %102 = vector.broadcast %cst_103 : f32 to vector<4x256xf32>
    %103 = arith.maximumf %101, %102 : vector<4x256xf32>
    %104 = arith.truncf %103 : vector<4x256xf32> to vector<4x256xbf16>
    %c0_104 = arith.constant 0 : index
    %c0_105 = arith.constant 0 : index
    %c0_106 = arith.constant 0 : index
    %105 = vector.load %arg13[%c0_104, %c0_105, %c0_106] : memref<4x16x4xbf16, #tpu.memory_space<vmem>>, vector<1x16x4xbf16>
    %106 = vector.shape_cast %105 : vector<1x16x4xbf16> to vector<16x4xbf16>
    %107 = vector.extract_strided_slice %104 {offsets = [0, 0], sizes = [4, 64], strides = [1, 1]} : vector<4x256xbf16> to vector<4x64xbf16>
    %cst_107 = arith.constant dense<0.000000e+00> : vector<16x64xf32>
    %108 = tpu.matmul %106, %107, %cst_107 {dimension_numbers = #tpu.dot_dimension_numbers<[1], [0], [0], [1], [0, 0, 1, 1], [], []>} : vector<16x4xbf16>, vector<4x64xbf16>, vector<16x64xf32> -> vector<16x64xf32>
    %c1_108 = arith.constant 1 : index
    %c0_109 = arith.constant 0 : index
    %c0_110 = arith.constant 0 : index
    %109 = vector.load %arg13[%c1_108, %c0_109, %c0_110] : memref<4x16x4xbf16, #tpu.memory_space<vmem>>, vector<1x16x4xbf16>
    %110 = vector.shape_cast %109 : vector<1x16x4xbf16> to vector<16x4xbf16>
    %111 = vector.extract_strided_slice %104 {offsets = [0, 64], sizes = [4, 64], strides = [1, 1]} : vector<4x256xbf16> to vector<4x64xbf16>
    %cst_111 = arith.constant dense<0.000000e+00> : vector<16x64xf32>
    %112 = tpu.matmul %110, %111, %cst_111 {dimension_numbers = #tpu.dot_dimension_numbers<[1], [0], [0], [1], [0, 0, 1, 1], [], []>} : vector<16x4xbf16>, vector<4x64xbf16>, vector<16x64xf32> -> vector<16x64xf32>
    %c2_112 = arith.constant 2 : index
    %c0_113 = arith.constant 0 : index
    %c0_114 = arith.constant 0 : index
    %113 = vector.load %arg13[%c2_112, %c0_113, %c0_114] : memref<4x16x4xbf16, #tpu.memory_space<vmem>>, vector<1x16x4xbf16>
    %114 = vector.shape_cast %113 : vector<1x16x4xbf16> to vector<16x4xbf16>
    %115 = vector.extract_strided_slice %104 {offsets = [0, 128], sizes = [4, 64], strides = [1, 1]} : vector<4x256xbf16> to vector<4x64xbf16>
    %cst_115 = arith.constant dense<0.000000e+00> : vector<16x64xf32>
    %116 = tpu.matmul %114, %115, %cst_115 {dimension_numbers = #tpu.dot_dimension_numbers<[1], [0], [0], [1], [0, 0, 1, 1], [], []>} : vector<16x4xbf16>, vector<4x64xbf16>, vector<16x64xf32> -> vector<16x64xf32>
    %c3_116 = arith.constant 3 : index
    %c0_117 = arith.constant 0 : index
    %c0_118 = arith.constant 0 : index
    %117 = vector.load %arg13[%c3_116, %c0_117, %c0_118] : memref<4x16x4xbf16, #tpu.memory_space<vmem>>, vector<1x16x4xbf16>
    %118 = vector.shape_cast %117 : vector<1x16x4xbf16> to vector<16x4xbf16>
    %119 = vector.extract_strided_slice %104 {offsets = [0, 192], sizes = [4, 64], strides = [1, 1]} : vector<4x256xbf16> to vector<4x64xbf16>
    %cst_119 = arith.constant dense<0.000000e+00> : vector<16x64xf32>
    %120 = tpu.matmul %118, %119, %cst_119 {dimension_numbers = #tpu.dot_dimension_numbers<[1], [0], [0], [1], [0, 0, 1, 1], [], []>} : vector<16x4xbf16>, vector<4x64xbf16>, vector<16x64xf32> -> vector<16x64xf32>
    %121 = arith.addf %108, %112 : vector<16x64xf32>
    %122 = arith.addf %121, %116 : vector<16x64xf32>
    %123 = arith.addf %122, %120 : vector<16x64xf32>
    %124 = arith.truncf %123 : vector<16x64xf32> to vector<16x64xbf16>
    %c0_120 = arith.constant 0 : index
    %c0_121 = arith.constant 0 : index
    %c0_122 = arith.constant 0 : index
    %125 = vector.load %arg14[%c0_120, %c0_121, %c0_122] : memref<4x16x16xbf16, #tpu.memory_space<vmem>>, vector<1x16x16xbf16>
    %126 = vector.shape_cast %125 : vector<1x16x16xbf16> to vector<16x16xbf16>
    %cst_123 = arith.constant dense<0.000000e+00> : vector<16x64xf32>
    %127 = tpu.matmul %126, %124, %cst_123 {dimension_numbers = #tpu.dot_dimension_numbers<[1], [0], [0], [1], [0, 0, 1, 1], [], []>} : vector<16x16xbf16>, vector<16x64xbf16>, vector<16x64xf32> -> vector<16x64xf32>
    %c1_124 = arith.constant 1 : index
    %c0_125 = arith.constant 0 : index
    %c0_126 = arith.constant 0 : index
    %128 = vector.load %arg14[%c1_124, %c0_125, %c0_126] : memref<4x16x16xbf16, #tpu.memory_space<vmem>>, vector<1x16x16xbf16>
    %129 = vector.shape_cast %128 : vector<1x16x16xbf16> to vector<16x16xbf16>
    %cst_127 = arith.constant dense<0.000000e+00> : vector<16x64xf32>
    %130 = tpu.matmul %129, %124, %cst_127 {dimension_numbers = #tpu.dot_dimension_numbers<[1], [0], [0], [1], [0, 0, 1, 1], [], []>} : vector<16x16xbf16>, vector<16x64xbf16>, vector<16x64xf32> -> vector<16x64xf32>
    %c2_128 = arith.constant 2 : index
    %c0_129 = arith.constant 0 : index
    %c0_130 = arith.constant 0 : index
    %131 = vector.load %arg14[%c2_128, %c0_129, %c0_130] : memref<4x16x16xbf16, #tpu.memory_space<vmem>>, vector<1x16x16xbf16>
    %132 = vector.shape_cast %131 : vector<1x16x16xbf16> to vector<16x16xbf16>
    %cst_131 = arith.constant dense<0.000000e+00> : vector<16x64xf32>
    %133 = tpu.matmul %132, %124, %cst_131 {dimension_numbers = #tpu.dot_dimension_numbers<[1], [0], [0], [1], [0, 0, 1, 1], [], []>} : vector<16x16xbf16>, vector<16x64xbf16>, vector<16x64xf32> -> vector<16x64xf32>
    %c3_132 = arith.constant 3 : index
    %c0_133 = arith.constant 0 : index
    %c0_134 = arith.constant 0 : index
    %134 = vector.load %arg14[%c3_132, %c0_133, %c0_134] : memref<4x16x16xbf16, #tpu.memory_space<vmem>>, vector<1x16x16xbf16>
    %135 = vector.shape_cast %134 : vector<1x16x16xbf16> to vector<16x16xbf16>
    %cst_135 = arith.constant dense<0.000000e+00> : vector<16x64xf32>
    %136 = tpu.matmul %135, %124, %cst_135 {dimension_numbers = #tpu.dot_dimension_numbers<[1], [0], [0], [1], [0, 0, 1, 1], [], []>} : vector<16x16xbf16>, vector<16x64xbf16>, vector<16x64xf32> -> vector<16x64xf32>
    %137 = tpu.concatenate %127, %130, %133, %136 in 1 : vector<16x64xf32>, vector<16x64xf32>, vector<16x64xf32>, vector<16x64xf32> -> vector<16x256xf32>
    %138 = arith.truncf %137 : vector<16x256xf32> to vector<16x256xbf16>
    %c0_136 = arith.constant 0 : index
    %c0_137 = arith.constant 0 : index
    %139 = vector.load %arg15[%c0_136, %c0_137] : memref<256x128xbf16, #tpu.memory_space<vmem>>, vector<256x128xbf16>
    %cst_138 = arith.constant dense<0.000000e+00> : vector<16x128xf32>
    %140 = tpu.matmul %138, %139, %cst_138 {dimension_numbers = #tpu.dot_dimension_numbers<[1], [0], [0], [1], [0, 0, 1, 1], [], []>} : vector<16x256xbf16>, vector<256x128xbf16>, vector<16x128xf32> -> vector<16x128xf32>
    %c0_139 = arith.constant 0 : index
    %c0_140 = arith.constant 0 : index
    %141 = vector.load %arg16[%c0_139, %c0_140] : memref<1x128xf32, #tpu.memory_space<vmem>>, vector<1x128xf32>
    %142 = vector.broadcast %141 : vector<1x128xf32> to vector<16x128xf32>
    %143 = arith.addf %140, %142 : vector<16x128xf32>
    %cst_141 = arith.constant 0.000000e+00 : f32
    %144 = vector.broadcast %cst_141 : f32 to vector<16x128xf32>
    %145 = arith.maximumf %143, %144 : vector<16x128xf32>
    %146 = arith.truncf %145 : vector<16x128xf32> to vector<16x128xbf16>
    %c0_142 = arith.constant 0 : index
    %c0_143 = arith.constant 0 : index
    %c0_144 = arith.constant 0 : index
    %147 = vector.load %arg17[%c0_142, %c0_143, %c0_144] : memref<4x64x16xbf16, #tpu.memory_space<vmem>>, vector<1x64x16xbf16>
    %148 = vector.shape_cast %147 : vector<1x64x16xbf16> to vector<64x16xbf16>
    %149 = vector.extract_strided_slice %146 {offsets = [0, 0], sizes = [16, 32], strides = [1, 1]} : vector<16x128xbf16> to vector<16x32xbf16>
    %cst_145 = arith.constant dense<0.000000e+00> : vector<64x32xf32>
    %150 = tpu.matmul %148, %149, %cst_145 {dimension_numbers = #tpu.dot_dimension_numbers<[1], [0], [0], [1], [0, 0, 1, 1], [], []>} : vector<64x16xbf16>, vector<16x32xbf16>, vector<64x32xf32> -> vector<64x32xf32>
    %c1_146 = arith.constant 1 : index
    %c0_147 = arith.constant 0 : index
    %c0_148 = arith.constant 0 : index
    %151 = vector.load %arg17[%c1_146, %c0_147, %c0_148] : memref<4x64x16xbf16, #tpu.memory_space<vmem>>, vector<1x64x16xbf16>
    %152 = vector.shape_cast %151 : vector<1x64x16xbf16> to vector<64x16xbf16>
    %153 = vector.extract_strided_slice %146 {offsets = [0, 32], sizes = [16, 32], strides = [1, 1]} : vector<16x128xbf16> to vector<16x32xbf16>
    %cst_149 = arith.constant dense<0.000000e+00> : vector<64x32xf32>
    %154 = tpu.matmul %152, %153, %cst_149 {dimension_numbers = #tpu.dot_dimension_numbers<[1], [0], [0], [1], [0, 0, 1, 1], [], []>} : vector<64x16xbf16>, vector<16x32xbf16>, vector<64x32xf32> -> vector<64x32xf32>
    %c2_150 = arith.constant 2 : index
    %c0_151 = arith.constant 0 : index
    %c0_152 = arith.constant 0 : index
    %155 = vector.load %arg17[%c2_150, %c0_151, %c0_152] : memref<4x64x16xbf16, #tpu.memory_space<vmem>>, vector<1x64x16xbf16>
    %156 = vector.shape_cast %155 : vector<1x64x16xbf16> to vector<64x16xbf16>
    %157 = vector.extract_strided_slice %146 {offsets = [0, 64], sizes = [16, 32], strides = [1, 1]} : vector<16x128xbf16> to vector<16x32xbf16>
    %cst_153 = arith.constant dense<0.000000e+00> : vector<64x32xf32>
    %158 = tpu.matmul %156, %157, %cst_153 {dimension_numbers = #tpu.dot_dimension_numbers<[1], [0], [0], [1], [0, 0, 1, 1], [], []>} : vector<64x16xbf16>, vector<16x32xbf16>, vector<64x32xf32> -> vector<64x32xf32>
    %c3_154 = arith.constant 3 : index
    %c0_155 = arith.constant 0 : index
    %c0_156 = arith.constant 0 : index
    %159 = vector.load %arg17[%c3_154, %c0_155, %c0_156] : memref<4x64x16xbf16, #tpu.memory_space<vmem>>, vector<1x64x16xbf16>
    %160 = vector.shape_cast %159 : vector<1x64x16xbf16> to vector<64x16xbf16>
    %161 = vector.extract_strided_slice %146 {offsets = [0, 96], sizes = [16, 32], strides = [1, 1]} : vector<16x128xbf16> to vector<16x32xbf16>
    %cst_157 = arith.constant dense<0.000000e+00> : vector<64x32xf32>
    %162 = tpu.matmul %160, %161, %cst_157 {dimension_numbers = #tpu.dot_dimension_numbers<[1], [0], [0], [1], [0, 0, 1, 1], [], []>} : vector<64x16xbf16>, vector<16x32xbf16>, vector<64x32xf32> -> vector<64x32xf32>
    %163 = arith.addf %150, %154 : vector<64x32xf32>
    %164 = arith.addf %163, %158 : vector<64x32xf32>
    %165 = arith.addf %164, %162 : vector<64x32xf32>
    %166 = arith.truncf %165 : vector<64x32xf32> to vector<64x32xbf16>
    %c0_158 = arith.constant 0 : index
    %c0_159 = arith.constant 0 : index
    %c0_160 = arith.constant 0 : index
    %167 = vector.load %arg18[%c0_158, %c0_159, %c0_160] : memref<4x64x64xbf16, #tpu.memory_space<vmem>>, vector<1x64x64xbf16>
    %168 = vector.shape_cast %167 : vector<1x64x64xbf16> to vector<64x64xbf16>
    %cst_161 = arith.constant dense<0.000000e+00> : vector<64x32xf32>
    %169 = tpu.matmul %168, %166, %cst_161 {dimension_numbers = #tpu.dot_dimension_numbers<[1], [0], [0], [1], [0, 0, 1, 1], [], []>} : vector<64x64xbf16>, vector<64x32xbf16>, vector<64x32xf32> -> vector<64x32xf32>
    %c1_162 = arith.constant 1 : index
    %c0_163 = arith.constant 0 : index
    %c0_164 = arith.constant 0 : index
    %170 = vector.load %arg18[%c1_162, %c0_163, %c0_164] : memref<4x64x64xbf16, #tpu.memory_space<vmem>>, vector<1x64x64xbf16>
    %171 = vector.shape_cast %170 : vector<1x64x64xbf16> to vector<64x64xbf16>
    %cst_165 = arith.constant dense<0.000000e+00> : vector<64x32xf32>
    %172 = tpu.matmul %171, %166, %cst_165 {dimension_numbers = #tpu.dot_dimension_numbers<[1], [0], [0], [1], [0, 0, 1, 1], [], []>} : vector<64x64xbf16>, vector<64x32xbf16>, vector<64x32xf32> -> vector<64x32xf32>
    %c2_166 = arith.constant 2 : index
    %c0_167 = arith.constant 0 : index
    %c0_168 = arith.constant 0 : index
    %173 = vector.load %arg18[%c2_166, %c0_167, %c0_168] : memref<4x64x64xbf16, #tpu.memory_space<vmem>>, vector<1x64x64xbf16>
    %174 = vector.shape_cast %173 : vector<1x64x64xbf16> to vector<64x64xbf16>
    %cst_169 = arith.constant dense<0.000000e+00> : vector<64x32xf32>
    %175 = tpu.matmul %174, %166, %cst_169 {dimension_numbers = #tpu.dot_dimension_numbers<[1], [0], [0], [1], [0, 0, 1, 1], [], []>} : vector<64x64xbf16>, vector<64x32xbf16>, vector<64x32xf32> -> vector<64x32xf32>
    %c3_170 = arith.constant 3 : index
    %c0_171 = arith.constant 0 : index
    %c0_172 = arith.constant 0 : index
    %176 = vector.load %arg18[%c3_170, %c0_171, %c0_172] : memref<4x64x64xbf16, #tpu.memory_space<vmem>>, vector<1x64x64xbf16>
    %177 = vector.shape_cast %176 : vector<1x64x64xbf16> to vector<64x64xbf16>
    %cst_173 = arith.constant dense<0.000000e+00> : vector<64x32xf32>
    %178 = tpu.matmul %177, %166, %cst_173 {dimension_numbers = #tpu.dot_dimension_numbers<[1], [0], [0], [1], [0, 0, 1, 1], [], []>} : vector<64x64xbf16>, vector<64x32xbf16>, vector<64x32xf32> -> vector<64x32xf32>
    %179 = tpu.concatenate %169, %172, %175, %178 in 1 : vector<64x32xf32>, vector<64x32xf32>, vector<64x32xf32>, vector<64x32xf32> -> vector<64x128xf32>
    %180 = arith.truncf %179 : vector<64x128xf32> to vector<64x128xbf16>
    %c0_174 = arith.constant 0 : index
    %c0_175 = arith.constant 0 : index
    %181 = vector.load %arg19[%c0_174, %c0_175] : memref<128x4xbf16, #tpu.memory_space<vmem>>, vector<128x4xbf16>
    %cst_176 = arith.constant dense<0.000000e+00> : vector<64x4xf32>
    %182 = tpu.matmul %180, %181, %cst_176 {dimension_numbers = #tpu.dot_dimension_numbers<[1], [0], [0], [1], [0, 0, 1, 1], [], []>} : vector<64x128xbf16>, vector<128x4xbf16>, vector<64x4xf32> -> vector<64x4xf32>
    %c0_177 = arith.constant 0 : index
    %c0_178 = arith.constant 0 : index
    %183 = vector.load %arg20[%c0_177, %c0_178] : memref<1x4xf32, #tpu.memory_space<vmem>>, vector<1x4xf32>
    %184 = vector.broadcast %183 : vector<1x4xf32> to vector<64x4xf32>
    %185 = arith.addf %182, %184 : vector<64x4xf32>
    %186 = arith.negf %185 : vector<64x4xf32>
    %187 = math.exp %186 : vector<64x4xf32>
    %cst_179 = arith.constant 1.000000e+00 : f32
    %188 = vector.broadcast %cst_179 : f32 to vector<64x4xf32>
    %189 = arith.addf %188, %187 : vector<64x4xf32>
    %190 = arith.divf %188, %189 : vector<64x4xf32>
    %c0_180 = arith.constant 0 : index
    %c0_181 = arith.constant 0 : index
    %191 = vector.load %arg21[%c0_180, %c0_181] : memref<64x4xf32, #tpu.memory_space<vmem>>, vector<64x4xf32>
    tpu.vector_store %arg21[%c0_180, %c0_181], %190 {strides = array<i32>} : memref<64x4xf32, #tpu.memory_space<vmem>>, vector<64x4xf32>,
    return
  }
  func.func @transform_0(%arg0: i32) -> (i32, i32) {
    %c0_i32 = arith.constant 0 : i32
    %c0_i32_0 = arith.constant 0 : i32
    return %arg0, %c0_i32 : i32, i32
  }
  func.func @transform_1(%arg0: i32) -> (i32, i32) {
    %c0_i32 = arith.constant 0 : i32
    %c0_i32_0 = arith.constant 0 : i32
    %c0_i32_1 = arith.constant 0 : i32
    return %c0_i32, %c0_i32_0 : i32, i32
  }
  func.func @transform_2(%arg0: i32) -> (i32, i32) {
    %c0_i32 = arith.constant 0 : i32
    %c0_i32_0 = arith.constant 0 : i32
    %c0_i32_1 = arith.constant 0 : i32
    return %c0_i32, %c0_i32_0 : i32, i32
  }
  func.func @transform_3(%arg0: i32) -> (i32, i32, i32) {
    %c0_i32 = arith.constant 0 : i32
    %c0_i32_0 = arith.constant 0 : i32
    %c0_i32_1 = arith.constant 0 : i32
    %c0_i32_2 = arith.constant 0 : i32
    return %c0_i32, %c0_i32_0, %c0_i32_1 : i32, i32, i32
  }
  func.func @transform_4(%arg0: i32) -> (i32, i32) {
    %c0_i32 = arith.constant 0 : i32
    %c0_i32_0 = arith.constant 0 : i32
    %c0_i32_1 = arith.constant 0 : i32
    return %c0_i32, %c0_i32_0 : i32, i32
  }
  func.func @transform_5(%arg0: i32) -> (i32, i32) {
    %c0_i32 = arith.constant 0 : i32
    %c0_i32_0 = arith.constant 0 : i32
    %c0_i32_1 = arith.constant 0 : i32
    return %c0_i32, %c0_i32_0 : i32, i32
  }
  func.func @transform_6(%arg0: i32) -> (i32, i32, i32) {
    %c0_i32 = arith.constant 0 : i32
    %c0_i32_0 = arith.constant 0 : i32
    %c0_i32_1 = arith.constant 0 : i32
    %c0_i32_2 = arith.constant 0 : i32
    return %c0_i32, %c0_i32_0, %c0_i32_1 : i32, i32, i32
  }
  func.func @transform_7(%arg0: i32) -> (i32, i32) {
    %c0_i32 = arith.constant 0 : i32
    %c0_i32_0 = arith.constant 0 : i32
    %c0_i32_1 = arith.constant 0 : i32
    return %c0_i32, %c0_i32_0 : i32, i32
  }
  func.func @transform_8(%arg0: i32) -> (i32, i32) {
    %c0_i32 = arith.constant 0 : i32
    %c0_i32_0 = arith.constant 0 : i32
    %c0_i32_1 = arith.constant 0 : i32
    return %c0_i32, %c0_i32_0 : i32, i32
  }
  func.func @transform_9(%arg0: i32) -> (i32, i32, i32) {
    %c0_i32 = arith.constant 0 : i32
    %c0_i32_0 = arith.constant 0 : i32
    %c0_i32_1 = arith.constant 0 : i32
    %c0_i32_2 = arith.constant 0 : i32
    return %c0_i32, %c0_i32_0, %c0_i32_1 : i32, i32, i32
  }
  func.func @transform_10(%arg0: i32) -> (i32, i32) {
    %c0_i32 = arith.constant 0 : i32
    %c0_i32_0 = arith.constant 0 : i32
    %c0_i32_1 = arith.constant 0 : i32
    return %c0_i32, %c0_i32_0 : i32, i32
  }
  func.func @transform_11(%arg0: i32) -> (i32, i32) {
    %c0_i32 = arith.constant 0 : i32
    %c0_i32_0 = arith.constant 0 : i32
    %c0_i32_1 = arith.constant 0 : i32
    return %c0_i32, %c0_i32_0 : i32, i32
  }
  func.func @transform_12(%arg0: i32) -> (i32, i32, i32) {
    %c0_i32 = arith.constant 0 : i32
    %c0_i32_0 = arith.constant 0 : i32
    %c0_i32_1 = arith.constant 0 : i32
    %c0_i32_2 = arith.constant 0 : i32
    return %c0_i32, %c0_i32_0, %c0_i32_1 : i32, i32, i32
  }
  func.func @transform_13(%arg0: i32) -> (i32, i32, i32) {
    %c0_i32 = arith.constant 0 : i32
    %c0_i32_0 = arith.constant 0 : i32
    %c0_i32_1 = arith.constant 0 : i32
    %c0_i32_2 = arith.constant 0 : i32
    return %c0_i32, %c0_i32_0, %c0_i32_1 : i32, i32, i32
  }
  func.func @transform_14(%arg0: i32) -> (i32, i32) {
    %c0_i32 = arith.constant 0 : i32
    %c0_i32_0 = arith.constant 0 : i32
    %c0_i32_1 = arith.constant 0 : i32
    return %c0_i32, %c0_i32_0 : i32, i32
  }
  func.func @transform_15(%arg0: i32) -> (i32, i32) {
    %c0_i32 = arith.constant 0 : i32
    %c0_i32_0 = arith.constant 0 : i32
    %c0_i32_1 = arith.constant 0 : i32
    return %c0_i32, %c0_i32_0 : i32, i32
  }
  func.func @transform_16(%arg0: i32) -> (i32, i32, i32) {
    %c0_i32 = arith.constant 0 : i32
    %c0_i32_0 = arith.constant 0 : i32
    %c0_i32_1 = arith.constant 0 : i32
    %c0_i32_2 = arith.constant 0 : i32
    return %c0_i32, %c0_i32_0, %c0_i32_1 : i32, i32, i32
  }
  func.func @transform_17(%arg0: i32) -> (i32, i32, i32) {
    %c0_i32 = arith.constant 0 : i32
    %c0_i32_0 = arith.constant 0 : i32
    %c0_i32_1 = arith.constant 0 : i32
    %c0_i32_2 = arith.constant 0 : i32
    return %c0_i32, %c0_i32_0, %c0_i32_1 : i32, i32, i32
  }
  func.func @transform_18(%arg0: i32) -> (i32, i32) {
    %c0_i32 = arith.constant 0 : i32
    %c0_i32_0 = arith.constant 0 : i32
    %c0_i32_1 = arith.constant 0 : i32
    return %c0_i32, %c0_i32_0 : i32, i32
  }
  func.func @transform_19(%arg0: i32) -> (i32, i32) {
    %c0_i32 = arith.constant 0 : i32
    %c0_i32_0 = arith.constant 0 : i32
    %c0_i32_1 = arith.constant 0 : i32
    return %c0_i32, %c0_i32_0 : i32, i32
  }
  func.func @transform_20(%arg0: i32) -> (i32, i32) {
    %c0_i32 = arith.constant 0 : i32
    %c0_i32_0 = arith.constant 0 : i32
    return %arg0, %c0_i32 : i32, i32
  }
}

</mosaic_0001>

<bundles_post_ra>
// kernel: cnn_autoencoder_forward.1
= control target key start
LH: loop header
LB: loop body
LE: loop exit
PB: predicated region body
PF: predicated region fallthrough
CT: control target
= control target key end

     0   :  { %s8070_s0 = inlined_call_operand.vmem [shape: bf16[128,9], index: 0, kind: input, shape index: {}]   ;;  %s8071_s1 = inlined_call_operand.hbm [shape: bf16[9,32], index: 1, kind: input, shape index: {}]   ;;  %s8072_s2 = inlined_call_operand.vmem [shape: f32[1,32], index: 2, kind: input, shape index: {}]   ;;  %s8073_s3 = inlined_call_operand.vmem [shape: bf16[9,16,64], index: 3, kind: input, shape index: {}]   ;;  %s8074_s4 = inlined_call_operand.vmem [shape: bf16[288,64], index: 4, kind: input, shape index: {}]   ;;  %s8075_s5 = inlined_call_operand.hbm [shape: f32[1,64], index: 5, kind: input, shape index: {}]   ;;  %s8076_s6 = inlined_call_operand.hbm [shape: bf16[9,4,16], index: 6, kind: input, shape index: {}]   ;;  %s8077_s7 = inlined_call_operand.vmem [shape: bf16[576,128], index: 7, kind: input, shape index: {}]   ;;  %s8078_s8 = inlined_call_operand.hbm [shape: f32[1,128], index: 8, kind: input, shape index: {}]   ;;  %s8079_s9 = inlined_call_operand.hbm [shape: bf16[4,4,4], index: 9, kind: input, shape index: {}]   ;;  %s8080_s10 = inlined_call_operand.vmem [shape: bf16[512,256], index: 10, kind: input, shape index: {}]   ;;  %s8081_s11 = inlined_call_operand.hbm [shape: f32[1,256], index: 11, kind: input, shape index: {}]   ;;  %s8082_s12 = inlined_call_operand.vmem [shape: bf16[4,16,4], index: 12, kind: input, shape index: {}]   ;;  %s8083_s13 = inlined_call_operand.hbm [shape: bf16[4,16,16], index: 13, kind: input, shape index: {}]   ;;  %s8084_s14 = inlined_call_operand.vmem [shape: bf16[256,128], index: 14, kind: input, shape index: {}]   ;;  %s8085_s15 = inlined_call_operand.hbm [shape: f32[1,128], index: 15, kind: input, shape index: {}]   ;;  %s8086_s16 = inlined_call_operand.vmem [shape: bf16[4,64,16], index: 16, kind: input, shape index: {}]   ;;  %s8087_s17 = inlined_call_operand.hbm [shape: bf16[4,64,64], index: 17, kind: input, shape index: {}]   ;;  %s8088_s18 = inlined_call_operand.vmem [shape: bf16[128,4], index: 18, kind: input, shape index: {}]   ;;  %s8089_s19 = inlined_call_operand.vmem [shape: f32[1,4], index: 19, kind: input, shape index: {}]   ;;  %s8090_s20 = inlined_call_operand.vmem [shape: f32[128,4], index: 20, kind: output, shape index: {}]  }
   0x1   :  { %8105 = sst [smem:[#allocation21_spill]] %s8070_s0 }
   0x2   :  { %8106 = sst [smem:[#allocation22_spill]] %s8071_s1 }
   0x3   :  { %8107 = sst [smem:[#allocation23_spill]] %s8072_s2 }
   0x4   :  { %8108 = sst [smem:[#allocation24_spill]] %s8073_s3 }
   0x5   :  { %8109 = sst [smem:[#allocation25_spill]] %s8074_s4 }
   0x6   :  { %8110 = sst [smem:[#allocation26_spill]] %s8075_s5 }
   0x7   :  { %25 = vsyncpa [#allocation3], 0 }
   0x8   :  { %26 = vsyncpa [#allocation5], 0 }
   0x9   :  { %27 = vsyncpa [#allocation8], 0 }
   0xa   :  { %28 = vsyncpa [#allocation11], 0 }
   0xb   :  { %29 = vsyncpa [#allocation14], 0  ;;  %s7023_s1 = smov 0  }
   0xc LB: > { %s6899_s22 = smov [#allocation4]   ;;  %s8093_s24 = sadd.s32 4294967295, %s6897_s1   ;;  %s6897_s1 = sphi %s7023_s1, %s35_s1  }
   0xd   : > { %s526_s23 = sshll.u32 %s6899_s22, 4  ;;  %p5164_p0 = scmp.ge.s32.totalorder %s6897_s1, 1  ;;  %s527_s23 = int_to_ptr.vmem [resolvable:$true] %s526_s23 }
   0xe   : > { %p491_p1 = scmp.lt.s32.totalorder %s6897_s1, 3  ;;  %p7033_p2 = scmp.eq.s32.totalorder %s8093_s24, 0 }
   0xf   : > { %s6900_s3 = smov [#allocation7]   ;;  %s6901_s27 = smov [#allocation10]  }
  0x10   : > { %s8111_s2 = scalar_select %p7033_p2, 1, 0 }
  0x11   : > { %p7037_p3 = pnand %p5164_p0, %p491_p1  ;;  %s553_s26 = sshll.u32 %s6900_s3, 4  ;;  %s7043_s26 = int_to_ptr.vmem [resolvable:$true] %s553_s26 }
  0x12   : > { %s580_s28 = sshll.u32 %s6901_s27, 4  ;;  %s6902_s29 = smov [#allocation13]   ;;  %s7051_s28 = int_to_ptr.vmem [resolvable:$true] %s580_s28 }
  0x13   : > { %s8112_s25 = scalar_select %p7037_p3, 1, 0 }
  0x14   : > { %p6194_p4 = pneg %p7037_p3  ;;  %s610_s30 = sshll.u32 %s6902_s29, 4  ;;  %s7053_s30 = int_to_ptr.vmem [resolvable:$true] %s610_s30 }
  0x15   : > { %s6648_s21 = scalar_lea.vmem %s527_s23, 16  ;;  %s6655_s22 = scalar_lea.vmem %s527_s23, 32 }
  0x16   : > { %p7047_p5 = pnand %p7033_p2, %p6194_p4  ;;  %p6649_p7 = scmp.ne.s32.totalorder %s527_s23, %s6648_s21 }
  0x17   : > { %p6656_p10 = scmp.lt.s32.totalorder %s527_s23, %s527_s23  ;;  %p6657_p11 = scmp.lt.s32.totalorder %s6655_s22, %s6648_s21 }
  0x18   : > { %p7057_p6 = pneg %p7047_p5 }
  0x19   : > { %p6658_p12 = por %p6657_p11, %p6656_p10 }
  0x1a   : > { %p6651_p8 = pnand %p6649_p7, %p7057_p6 }
  0x1c   : > { %p6652_p9 = pneg %p6651_p8 }
  0x1e   : > { %p6659_p13 = pnand %p6658_p12, %p6652_p9 }
  0x20   : > { %6662 = shalt.err (!%p6659_p13)
}
  0x21   : > { %s8115_s5 = sld [smem:[#allocation26_spill]]  ;;  %s6674_s29 = scalar_lea.vmem %s7043_s26, 16 }
  0x22   : > { %p6675_p0 = scmp.ne.s32.totalorder %s7043_s26, %s6674_s29  ;;  %s6681_s21 = scalar_lea.vmem %s7043_s26, 32 }
  0x23   : > { %p6682_p7 = scmp.lt.s32.totalorder %s7043_s26, %s7043_s26  ;;  %p6683_p8 = scmp.lt.s32.totalorder %s6681_s21, %s6674_s29 }
  0x24   : > { %p6677_p1 = pnand %p6675_p0, %p7057_p6 }
  0x25   : > { %p6684_p9 = por %p6683_p8, %p6682_p7 }
  0x26   : > { %p6678_p4 = pneg %p6677_p1 }
  0x27   : > { %6200 = dma.hbm_to_vmem [thread:$0]  (!%p7047_p5), %s8115_s5, 16, %s527_s23, [#allocation5]  }
  0x28   : > { %p6685_p10 = pnand %p6684_p9, %p6678_p4 }
  0x2a   : > { %6688 = shalt.err (!%p6685_p10)
}
  0x2b   : > { %6206 = dma.hbm_to_vmem [thread:$0]  (!%p7047_p5), %s8078_s8, 16, %s7043_s26, [#allocation8]  }
  0x2c   : > { %s6700_s23 = scalar_lea.vmem %s7051_s28, 32  ;;  %p6708_p0 = scmp.lt.s32.totalorder %s7051_s28, %s7051_s28 }
  0x2d   : > { %p6701_p11 = scmp.ne.s32.totalorder %s7051_s28, %s6700_s23  ;;  %p6709_p1 = scmp.lt.s32.totalorder %s6700_s23, %s6700_s23 }
  0x2f   : > { %p6703_p12 = pnand %p6701_p11, %p7057_p6  ;;  %p6710_p4 = por %p6709_p1, %p6708_p0 }
  0x31   : > { %p6704_p13 = pneg %p6703_p12 }
  0x33   : > { %p6711_p7 = pnand %p6710_p4, %p6704_p13 }
  0x35   : > { %6714 = shalt.err (!%p6711_p7)
}
  0x36   : > { %6212 = dma.hbm_to_vmem [thread:$0]  (!%p7047_p5), %s8081_s11, 32, %s7051_s28, [#allocation11]  }
  0x37   : > { %s6726_s26 = scalar_lea.vmem %s7053_s30, 16  ;;  %s6733_s21 = scalar_lea.vmem %s7053_s30, 32 }
  0x38   : > { %p6727_p8 = scmp.ne.s32.totalorder %s7053_s30, %s6726_s26  ;;  %p6734_p11 = scmp.lt.s32.totalorder %s7053_s30, %s7053_s30 }
  0x39   : > { %p6735_p12 = scmp.lt.s32.totalorder %s6733_s21, %s6726_s26 }
  0x3a   : > { %p6729_p9 = pnand %p6727_p8, %p7057_p6 }
  0x3b   : > { %p6736_p13 = por %p6735_p12, %p6734_p11 }
  0x3c   : > { %p6730_p10 = pneg %p6729_p9 }
  0x3e   : > { %p6737_p0 = pnand %p6736_p13, %p6730_p10 }
  0x40   : > { %6740 = shalt.err (!%p6737_p0)
}
  0x41   : > { %6218 = dma.hbm_to_vmem [thread:$0]  (!%p7047_p5), %s8085_s15, 16, %s7053_s30, [#allocation14]  }
  0x42   : > { %s6903_s28 = smov [#allocation2]  }
  0x43   : > { %s503_s23 = sshll.u32 %s6903_s28, 4  ;;  %s504_s23 = int_to_ptr.vmem [resolvable:$true] %s503_s23 }
  0x44   : > { %s6752_s27 = scalar_lea.vmem %s504_s23, 128  ;;  %p6760_p8 = scmp.lt.s32.totalorder %s504_s23, %s504_s23 }
  0x45   : > { %p6753_p1 = scmp.ne.s32.totalorder %s504_s23, %s6752_s27  ;;  %p6761_p9 = scmp.lt.s32.totalorder %s6752_s27, %s6752_s27 }
  0x47   : > { %p6755_p4 = pnand %p6753_p1, %p7057_p6  ;;  %p6762_p10 = por %p6761_p9, %p6760_p8 }
  0x49   : > { %p6756_p7 = pneg %p6755_p4 }
  0x4b   : > { %p6763_p11 = pnand %p6762_p10, %p6756_p7 }
  0x4d   : > { %6766 = shalt.err (!%p6763_p11)
}
  0x4e   : > { %s8094_s29 = smov 64   ;;  %s8096_s26 = smov 4  }
  0x4f   : > { %s8116_s22 = sld [smem:[#allocation22_spill]]  ;;  %s6906_s3 = smov [#allocation6]  }
  0x50   : > { %s536_s28 = sshll.u32 %s6906_s3, 4  ;;  %s537_s28 = int_to_ptr.vmem [resolvable:$true] %s536_s28 }
  0x51   : > { %s6778_s24 = scalar_lea.vmem %s537_s28, 288  ;;  %p6786_p1 = scmp.lt.s32.totalorder %s537_s28, %s537_s28 }
  0x52   : > { %p6779_p12 = scmp.ne.s32.totalorder %s537_s28, %s6778_s24  ;;  %p6787_p4 = scmp.lt.s32.totalorder %s6778_s24, %s6778_s24 }
  0x54   : > { %p6781_p13 = pnand %p6779_p12, %p7057_p6  ;;  %p6788_p7 = por %p6787_p4, %p6786_p1 }
  0x55   : > { %6197 = dma.hbm_to_vmem [thread:$0]  (!%p7047_p5), %s8116_s22, 128, %s504_s23, [#allocation3], %s8094_s29, %s8094_s29, %s8096_s26  }
  0x56   : > { %p6782_p0 = pneg %p6781_p13 }
  0x58   : > { %p6789_p8 = pnand %p6788_p7, %p6782_p0 }
  0x5a   : > { %6792 = shalt.err (!%p6789_p8)
}
  0x5b   : > { %s6907_s27 = smov 32   ;;  %s6908_s5 = smov 2  }
  0x5c   : > { %6203 = dma.hbm_to_vmem [thread:$0]  (!%p7047_p5), %s8076_s6, 288, %s537_s28, [#allocation5], %s6907_s27, %s6907_s27, %s6908_s5  }
  0x5d   : > { %s6909_s21 = smov [#allocation9]   ;;  %s6910_s3 = smov [#allocation12]  }
  0x5e   : > { %s563_s22 = sshll.u32 %s6909_s21, 4  ;;  %s593_s29 = sshll.u32 %s6910_s3, 4  ;;  %s564_s22 = int_to_ptr.vmem [resolvable:$true] %s563_s22  ;;  %s594_s29 = int_to_ptr.vmem [resolvable:$true] %s593_s29 }
  0x5f   : > { %s6804_s26 = scalar_lea.vmem %s564_s22, 128  ;;  %p6812_p12 = scmp.lt.s32.totalorder %s564_s22, %s564_s22 }
  0x60   : > { %p6805_p9 = scmp.ne.s32.totalorder %s564_s22, %s6804_s26  ;;  %p6813_p13 = scmp.lt.s32.totalorder %s6804_s26, %s6804_s26 }
  0x62   : > { %p6807_p10 = pnand %p6805_p9, %p7057_p6  ;;  %p6814_p0 = por %p6813_p13, %p6812_p12 }
  0x64   : > { %p6808_p11 = pneg %p6807_p10 }
  0x66   : > { %p6815_p1 = pnand %p6814_p0, %p6808_p11 }
  0x68   : > { %6818 = shalt.err (!%p6815_p1)
}
  0x69   : > { %6209 = dma.hbm_to_vmem [thread:$0]  (!%p7047_p5), %s8079_s9, 128, %s564_s22, [#allocation8], %s6907_s27, %s6907_s27, %s6908_s5  }
  0x6a   : > { %s6830_s28 = scalar_lea.vmem %s594_s29, 512  ;;  %p6838_p9 = scmp.lt.s32.totalorder %s594_s29, %s594_s29 }
  0x6b   : > { %p6831_p4 = scmp.ne.s32.totalorder %s594_s29, %s6830_s28  ;;  %p6839_p10 = scmp.lt.s32.totalorder %s6830_s28, %s6830_s28 }
  0x6d   : > { %p6833_p7 = pnand %p6831_p4, %p7057_p6  ;;  %p6840_p2 = por %p6839_p10, %p6838_p9 }
  0x6f   : > { %p6834_p8 = pneg %p6833_p7 }
  0x71   : > { %p6841_p3 = pnand %p6840_p2, %p6834_p8 }
  0x73   : > { %6844 = shalt.err (!%p6841_p3)
}
  0x74   : > { %s8117_s26 = smov 4   ;;  %s8118_s23 = smov 64  }
  0x75   : > { %6215 = dma.hbm_to_vmem [thread:$0]  (!%p7047_p5), %s8083_s13, 512, %s594_s29, [#allocation11], %s8118_s23, %s8118_s23, %s8117_s26  }
  0x76   : > { %s6911_s5 = smov [#allocation15]  }
  0x77   : > { %s623_s27 = sshll.u32 %s6911_s5, 4  ;;  %s624_s27 = int_to_ptr.vmem [resolvable:$true] %s623_s27 }
  0x78   : > { %s6856_s22 = scalar_lea.vmem %s624_s27, 2048  ;;  %p6864_p2 = scmp.lt.s32.totalorder %s624_s27, %s624_s27 }
  0x79   : > { %p6857_p11 = scmp.ne.s32.totalorder %s624_s27, %s6856_s22  ;;  %p6865_p3 = scmp.lt.s32.totalorder %s6856_s22, %s6856_s22 }
  0x7b   : > { %p6859_p12 = pnand %p6857_p11, %p7057_p6  ;;  %p6866_p0 = por %p6865_p3, %p6864_p2 }
  0x7d   : > { %p6860_p13 = pneg %p6859_p12 }
  0x7f   : > { %p6867_p1 = pnand %p6866_p0, %p6860_p13 }
  0x81   : > { %6870 = shalt.err (!%p6867_p1)
}
  0x82   : > { %6221 = dma.hbm_to_vmem [thread:$0]  (!%p7047_p5), %s8087_s17, 2048, %s624_s27, [#allocation14], %s8118_s23, %s8118_s23, %s8117_s26  }
  0x83   : > { %p8119_p4 = scmp.ne.s32.totalorder %s8112_s25, 0 }
  0x84   : > { %p8120_p6 = scmp.ne.s32.totalorder (!%p8119_p4), %s8111_s2, 0 }
  0x85   : > { %654 = sbr.rel (%p8119_p4) target bundleno = 3777 (0xec1), region = 100 }
  0x8a   : > { %6876 = dma.done.wait (%p8120_p6), [#allocation3], 128  }
  0x8b   : > { %6878 = vsyncadd (%p8120_p6), [#allocation3], 4294967168 }
  0x8c   : > { %6880 = dma.done.wait (%p8120_p6), [#allocation5], 304  }
  0x8d   : > { %6882 = vsyncadd (%p8120_p6), [#allocation5], 4294966992 }
  0x8e   : > { %6884 = dma.done.wait (%p8120_p6), [#allocation8], 144  }
  0x8f   : > { %6886 = vsyncadd (%p8120_p6), [#allocation8], 4294967152 }
  0x90   : > { %6888 = dma.done.wait (%p8120_p6), [#allocation11], 544  }
  0x91   : > { %6890 = vsyncadd (%p8120_p6), [#allocation11], 4294966752 }
  0x92   : > { %6892 = dma.done.wait (%p8120_p6), [#allocation14], 2064  }
  0x93   : > { %6894 = vsyncadd (%p8120_p6), [#allocation14], 4294965232  ;;  %vm812_vm0 = vcmask 1043456   ;;  %s8121_s25 = sadd.s32 4294967295, %s6897_s1   ;;  %vm813_vm1 = vcmask 1044480   ;;  %v6912_v0 = vmov 65535  }
  0x94   : > { %s5185_s4 = sshll.u32 %s8121_s25, 3  ;;  %v814_v1 = vsel %vm812_vm0, 4294967295, %v6912_v0  ;;  %s8122_s26 = sld [smem:[#allocation21_spill]]  ;;  %vm799_vm2 = vcmask 72704   ;;  %v6377_v3 = vld [vmem:[#allocation2] sm:$0x1f]  }
  0x95   : > { %p745_p5 = scmp.lt.s32.totalorder %s5185_s4, 15  ;;  %v815_v2 = vsel %vm813_vm1, %v814_v1, 0  ;;  %v6913_v9 = vmov 0.0   ;;  %vm6914_vm3 = vmmov 0   ;;  %s8123_s3 = sld [smem:[#allocation23_spill]]  ;;  %vm903_vm4 = vcmask 523264  }
  0x96   : > { %v817_v5 = vand.u32 %v6377_v3, %v815_v2  ;;  %5800 = vmatprep.subr.bf16.mxu1 %v6913_v9  ;;  %5808 = vmatprep.mubr.msk.bf16.mxu1 %vm6914_vm3, %v6913_v9  ;;  %s8124_s22 = sld [smem:[#allocation24_spill]]  ;;  %s8103_s30 = smov 32   ;;  %vm1412_vm5 = vcmask 261120   ;;  %vm1417_vm6 = vcmask 785408   ;;  %vm1669_vm7 = vcmask 130048  }
  0x97   : > { %s8129_s4 = smov (!%p745_p5, %s5185_s4), 15  ;;  %s8126_s24 = smov 64   ;;  %vm2523_vm8 = vcmask 1041408   ;;  %vm2519_vm9 = vcmask 31744  }
  0x98   : > { %s5186_s0 = sshll.u32 %s8129_s4, 2  ;;  %5766 = vmatprep.subr.bf16.mxu0 %v817_v5 }
  0x99   : > { %5767 = vmatpush3.bf16.msra.mxu0 %v817_v5 }
  0x9a   : > { %s748_s23 = scalar_lea.vmem %s8122_s26, %s5186_s0  ;;  %5776 = vmatprep.subr.bf16.mxu0 %v6913_v9  ;;  %s8101_s0 = smov 64  }
  0x9b   : > { %v6378_v4 = vld [vmem:[%s748_s23] sm:$0xff]   ;;  %v6379_v6 = vld [vmem:[%s748_s23 + $0x8] sm:$0xff]   ;;  %v6380_v7 = vld [vmem:[%s748_s23 + $0x10] sm:$0xff]  }
  0x9c   : > { %5768 = vmatprep.mubr.msk.bf16.mxu0 %vm799_vm2, %v6378_v4  ;;  %v6381_v8 = vld [vmem:[%s748_s23 + $0x18] sm:$0xff]   ;;  %v5189_v15 = vld [vmem:[%s8123_s3] ss:$0 sm:$0xff]  ;;  %v6383_v40 = vld [vmem:[%s8124_s22 + $0x10] sm:$0xff]   ;;  %s8125_s23 = sld [smem:[#allocation25_spill]]  ;;  %s6917_s3 = smov 96  }
  0x9d   : > { %5769 = vmatmul.mubr.msk.bf16.vlgmr.msra.gmra.mxu0 %vm799_vm2, %v6379_v6  ;;  %v6382_v39 = vld [vmem:[%s8124_s22] sm:$0xff]   ;;  %v6384_v41 = vld [vmem:[%s8124_s22 + $0x8] sm:$0xff]   ;;  %v6386_v43 = vld [vmem:[%s8124_s22 + $0x18] sm:$0xff]  }
  0x9e   : > { %5772 = vmatprep.mubr.msk.bf16.mxu0 %vm799_vm2, %v6380_v7  ;;  %v6385_v42 = vld [vmem:[%s8124_s22 + $0x20] sm:$0xff]   ;;  %v6387_v44 = vld [vmem:[%s8124_s22 + $0x30] sm:$0xff]   ;;  %v6388_v45 = vld [vmem:[%s8124_s22 + $0x28] sm:$0xff]  }
  0x9f   : > { %v6390_v46 = vld [vmem:[%s8124_s22 + $0x40] sm:$0xff]   ;;  %v6389_v47 = vld [vmem:[%s8124_s22 + $0x38] sm:$0xff]  }
  0xa2   : > { %v6391_v2 = vld [vmem:[%s8125_s23 + $0x78] sm:$0xff]   ;;  %v6393_v6 = vld [vmem:[%s8125_s23 + $0x70] sm:$0xff]  }
  0xa3   : > { %v6392_v3 = vld [vmem:[%s8125_s23 + $0x38] sm:$0xff]   ;;  %v6394_v7 = vld [vmem:[%s8125_s23 + $0x30] sm:$0xff]  }
  0xa5   : > { %5773 = vmatmul.mubr.msk.bf16.gmra.mxu0 %vm799_vm2, %v6381_v8 }
  0xa6   : > { %5784 = vmatprep.mubr.msk.bf16.mxu0 %vm6914_vm3, %v6913_v9 }
 0x15d   : > { %v5770_v10 = vpop.f32.mrf.mxu0 }
 0x15e   : > { %v862_v28 = vadd.f32 %v5770_v10, %v5189_v15 }
 0x15f   : > { %v853_v11 = vpop.f32.mrf.mxu0 }
 0x160   : > { %v886_v33 = vmax.f32 %v862_v28, 0.0  ;;  %v854_v34 = vadd.f32 %v5189_v15, %v853_v11  ;;  %v6395_v11 = vld [vmem:[%s8125_s23 + $0x68] sm:$0xff]   ;;  %v6402_v28 = vld [vmem:[%s8125_s23 + $0x10] sm:$0xff]  }
 0x161   : > { %v5771_v12 = vpop.f32.mrf.mxu0 }
 0x162   : > { %v865_v25 = vadd.f32 %v5771_v12, %v5189_v15  ;;  %v884_v37 = vmax.f32 %v854_v34, 0.0 }
 0x163   : > { %v856_v13 = vpop.f32.mrf.mxu0 }
 0x164   : > { %v887_v30 = vmax.f32 %v865_v25, 0.0  ;;  %v857_v31 = vadd.f32 %v5189_v15, %v856_v13  ;;  %v6406_v25 = vld [vmem:[%s8125_s23 + $0x80] sm:$0xff]  }
 0x165   : > { %v5774_v14 = vpop.f32.mrf.mxu0 }
 0x166   : > { %v878_v17 = vadd.f32 %v5774_v14, %v5189_v15  ;;  %v7201_v35 = vpack.c.bf16 %v887_v30, %v886_v33  ;;  %v885_v36 = vmax.f32 %v857_v31, 0.0  ;;  %v6404_v31 = vld [vmem:[%s8125_s23 + $0x48] sm:$0xff]  }
 0x167   : > { %v869_v16 = vpop.f32.mrf.mxu0 }
 0x168   : > { %v890_v21 = vmax.f32 %v878_v17, 0.0  ;;  %v870_v22 = vadd.f32 %v5189_v15, %v869_v16  ;;  %v7207_v38 = vpack.c.bf16 %v885_v36, %v884_v37  ;;  %v6405_v36 = vld [vmem:[%s8125_s23 + $0x8] sm:$0xff]  }
 0x169   : > { %v5775_v18 = vpop.f32.mrf.mxu0 }
 0x16a   : > { %v881_v19 = vadd.f32 %v5775_v18, %v5189_v15  ;;  %v888_v29 = vmax.f32 %v870_v22, 0.0  ;;  %v6400_v22 = vld [vmem:[%s8125_s23 + $0x18] sm:$0xff]  }
 0x16b   : > { %v872_v20 = vpop.f32.mrf.mxu0 }
 0x16c   : > { %v891_v23 = vmax.f32 %v881_v19, 0.0  ;;  %v873_v24 = vadd.f32 %v5189_v15, %v872_v20  ;;  %v6396_v15 = vld [vmem:[%s8125_s23 + $0x28] sm:$0xff]   ;;  %v6397_v19 = vld [vmem:[%s8125_s23 + $0x60] sm:$0xff]  }
 0x16d   : > { %v6398_v20 = vld [vmem:[%s8125_s23 + $0x20] sm:$0xff]  }
 0x16e   : > { %v7189_v26 = vpack.c.bf16 %v891_v23, %v890_v21  ;;  %v889_v27 = vmax.f32 %v873_v24, 0.0  ;;  %v6399_v21 = vld [vmem:[%s8125_s23 + $0x58] sm:$0xff]   ;;  %v6403_v23 = vld [vmem:[%s8125_s23 + $0x88] sm:$0xff]   ;;  %v6401_v24 = vld [vmem:[%s8125_s23 + $0x50] sm:$0xff]  }
 0x170   : > { %5777 = vmatpush3.bf16.msra.mxu0 %v7189_v26  ;;  %5801 = vmatpush3.bf16.msra.mxu1 %v7189_v26  ;;  %v7195_v32 = vpack.c.bf16 %v889_v27, %v888_v29 }
 0x171   : > { %5778 = vmatprep.subr.bf16.mxu0 %v6913_v9  ;;  %5802 = vmatprep.subr.bf16.mxu1 %v6913_v9 }
 0x174   : > { %5779 = vmatpush3.bf16.msra.mxu0 %v7195_v32  ;;  %5803 = vmatpush3.bf16.msra.mxu1 %v7195_v32 }
 0x175   : > { %5780 = vmatprep.subr.bf16.mxu0 %v6913_v9  ;;  %5804 = vmatprep.subr.bf16.mxu1 %v6913_v9 }
 0x178   : > { %5781 = vmatpush3.bf16.msra.mxu0 %v7201_v35  ;;  %5805 = vmatpush3.bf16.msra.mxu1 %v7201_v35 }
 0x179   : > { %5782 = vmatprep.subr.bf16.mxu0 %v6913_v9  ;;  %5806 = vmatprep.subr.bf16.mxu1 %v6913_v9 }
 0x17c   : > { %5783 = vmatpush3.bf16.msra.mxu0 %v7207_v38  ;;  %5807 = vmatpush3.bf16.msra.mxu1 %v7207_v38 }
 0x17d   : > { %5788 = vmatprep.subr.bf16.mxu0 %v6913_v9  ;;  %5824 = vmatprep.subr.bf16.mxu1 %v6913_v9 }
 0x17f   : > { %5785 = vmatmul.mubr.msk.bf16.vlgmr.msra.gmra.mxu0 %vm903_vm4, %v6382_v39  ;;  %5809 = vmatmul.mubr.msk.bf16.vlgmr.msra.gmra.mxu1 %vm903_vm4, %v6383_v40  ;;  %v6407_v39 = vld [vmem:[%s8125_s23 + $0x40] sm:$0xff]  }
 0x180   : > { %5789 = vmatpush3.bf16.msra.mxu0 %v7189_v26  ;;  %5825 = vmatpush3.bf16.msra.mxu1 %v7189_v26  ;;  %v6408_v40 = vld [vmem:[%s8125_s23] sm:$0xff]  }
 0x181   : > { %5790 = vmatprep.subr.bf16.mxu0 %v6913_v9  ;;  %5826 = vmatprep.subr.bf16.mxu1 %v6913_v9 }
 0x182   : > { %5796 = vmatprep.mubr.msk.bf16.mxu0 %vm6914_vm3, %v6913_v9  ;;  %5832 = vmatprep.mubr.msk.bf16.mxu1 %vm6914_vm3, %v6913_v9 }
 0x184   : > { %5791 = vmatpush3.bf16.msra.mxu0 %v7195_v32  ;;  %5827 = vmatpush3.bf16.msra.mxu1 %v7195_v32 }
 0x185   : > { %5792 = vmatprep.subr.bf16.mxu0 %v6913_v9  ;;  %5828 = vmatprep.subr.bf16.mxu1 %v6913_v9 }
 0x188   : > { %5793 = vmatpush3.bf16.msra.mxu0 %v7201_v35  ;;  %5829 = vmatpush3.bf16.msra.mxu1 %v7201_v35 }
 0x189   : > { %5794 = vmatprep.subr.bf16.mxu0 %v6913_v9  ;;  %5830 = vmatprep.subr.bf16.mxu1 %v6913_v9 }
 0x18c   : > { %5795 = vmatpush3.bf16.msra.mxu0 %v7207_v38  ;;  %5831 = vmatpush3.bf16.msra.mxu1 %v7207_v38 }
 0x18d   : > { %5812 = vmatprep.subr.bf16.mxu0 %v6913_v9  ;;  %5848 = vmatprep.subr.bf16.mxu1 %v6913_v9 }
 0x18f   : > { %5797 = vmatmul.mubr.msk.bf16.vlgmr.msra.gmra.mxu0 %vm903_vm4, %v6384_v41  ;;  %5833 = vmatmul.mubr.msk.bf16.vlgmr.msra.gmra.mxu1 %vm903_vm4, %v6385_v42 }
 0x190   : > { %5813 = vmatpush3.bf16.msra.mxu0 %v7189_v26  ;;  %5849 = vmatpush3.bf16.msra.mxu1 %v7189_v26 }
 0x191   : > { %5814 = vmatprep.subr.bf16.mxu0 %v6913_v9  ;;  %5850 = vmatprep.subr.bf16.mxu1 %v6913_v9 }
 0x192   : > { %5820 = vmatprep.mubr.msk.bf16.mxu0 %vm6914_vm3, %v6913_v9  ;;  %5856 = vmatprep.mubr.msk.bf16.mxu1 %vm6914_vm3, %v6913_v9 }
 0x194   : > { %5815 = vmatpush3.bf16.msra.mxu0 %v7195_v32  ;;  %5851 = vmatpush3.bf16.msra.mxu1 %v7195_v32 }
 0x195   : > { %5816 = vmatprep.subr.bf16.mxu0 %v6913_v9  ;;  %5852 = vmatprep.subr.bf16.mxu1 %v6913_v9 }
 0x198   : > { %5817 = vmatpush3.bf16.msra.mxu0 %v7201_v35  ;;  %5853 = vmatpush3.bf16.msra.mxu1 %v7201_v35 }
 0x199   : > { %5818 = vmatprep.subr.bf16.mxu0 %v6913_v9  ;;  %5854 = vmatprep.subr.bf16.mxu1 %v6913_v9 }
 0x19c   : > { %5819 = vmatpush3.bf16.msra.mxu0 %v7207_v38  ;;  %5855 = vmatpush3.bf16.msra.mxu1 %v7207_v38 }
 0x19d   : > { %5836 = vmatprep.subr.bf16.mxu0 %v6913_v9  ;;  %5872 = vmatprep.subr.bf16.mxu1 %v6913_v9 }
 0x19f   : > { %5821 = vmatmul.mubr.msk.bf16.vlgmr.msra.gmra.mxu0 %vm903_vm4, %v6386_v43  ;;  %5857 = vmatmul.mubr.msk.bf16.vlgmr.msra.gmra.mxu1 %vm903_vm4, %v6387_v44 }
 0x1a0   : > { %5837 = vmatpush3.bf16.msra.mxu0 %v7189_v26  ;;  %5873 = vmatpush3.bf16.msra.mxu1 %v7189_v26 }
 0x1a1   : > { %5838 = vmatprep.subr.bf16.mxu0 %v6913_v9  ;;  %5874 = vmatprep.subr.bf16.mxu1 %v6913_v9 }
 0x1a2   : > { %5844 = vmatprep.mubr.msk.bf16.mxu0 %vm6914_vm3, %v6913_v9  ;;  %5880 = vmatprep.mubr.msk.bf16.mxu1 %vm6914_vm3, %v6913_v9 }
 0x1a4   : > { %5839 = vmatpush3.bf16.msra.mxu0 %v7195_v32  ;;  %5875 = vmatpush3.bf16.msra.mxu1 %v7195_v32 }
 0x1a5   : > { %5840 = vmatprep.subr.bf16.mxu0 %v6913_v9  ;;  %5876 = vmatprep.subr.bf16.mxu1 %v6913_v9 }
 0x1a8   : > { %5841 = vmatpush3.bf16.msra.mxu0 %v7201_v35  ;;  %5877 = vmatpush3.bf16.msra.mxu1 %v7201_v35 }
 0x1a9   : > { %5842 = vmatprep.subr.bf16.mxu0 %v6913_v9  ;;  %5878 = vmatprep.subr.bf16.mxu1 %v6913_v9 }
 0x1ac   : > { %5843 = vmatpush3.bf16.msra.mxu0 %v7207_v38  ;;  %5879 = vmatpush3.bf16.msra.mxu1 %v7207_v38 }
 0x1ad   : > { %5860 = vmatprep.subr.bf16.mxu0 %v6913_v9  ;;  %5884 = vmatprep.subr.bf16.mxu1 %v6913_v9 }
 0x1af   : > { %5845 = vmatmul.mubr.msk.bf16.vlgmr.msra.gmra.mxu0 %vm903_vm4, %v6388_v45  ;;  %5881 = vmatmul.mubr.msk.bf16.vlgmr.msra.gmra.mxu1 %vm903_vm4, %v6390_v46 }
 0x1b0   : > { %5861 = vmatpush3.bf16.msra.mxu0 %v7189_v26  ;;  %5868 = vmatprep.mubr.msk.bf16.mxu0 %vm6914_vm3, %v6913_v9 }
 0x1b1   : > { %5862 = vmatprep.subr.bf16.mxu0 %v6913_v9  ;;  %5888 = vmatprep.mubr.msk.bf16.mxu1 %vm6914_vm3, %v6913_v9 }
 0x1b2   : > { %5885 = vmatpush3.bf16.msra.mxu1 %v6403_v23 }
 0x1b3   : > { %5886 = vmatprep.subr.bf16.mxu1 %v6913_v9 }
 0x1b4   : > { %5863 = vmatpush3.bf16.msra.mxu0 %v7195_v32 }
 0x1b5   : > { %5864 = vmatprep.subr.bf16.mxu0 %v6913_v9 }
 0x1b6   : > { %5887 = vmatpush3.bf16.msra.mxu1 %v6406_v25 }
 0x1b7   : > { %5892 = vmatprep.subr.bf16.mxu1 %v6913_v9 }
 0x1b8   : > { %5865 = vmatpush3.bf16.msra.mxu0 %v7201_v35 }
 0x1b9   : > { %5866 = vmatprep.subr.bf16.mxu0 %v6913_v9 }
 0x1bc   : > { %5867 = vmatpush3.bf16.msra.mxu0 %v7207_v38 }
 0x1bd   : > { %5564 = vmatprep.subr.bf16.mxu0 %v6391_v2 }
 0x1bf   : > { %5869 = vmatmul.mubr.msk.bf16.vlgmr.msra.gmra.mxu0 %vm903_vm4, %v6389_v47 }
 0x1c0   : > { %5565 = vmatpush3.bf16.msra.mxu0 %v6392_v3 }
 0x1c1   : > { %5566 = vmatprep.subr.bf16.mxu0 %v6393_v6 }
 0x1c4   : > { %5567 = vmatpush3.bf16.msra.mxu0 %v6394_v7 }
 0x1c5   : > { %5568 = vmatprep.subr.bf16.mxu0 %v6395_v11 }
 0x1c8   : > { %5569 = vmatpush3.bf16.msra.mxu0 %v6396_v15 }
 0x1c9   : > { %5570 = vmatprep.subr.bf16.mxu0 %v6397_v19 }
 0x1cc   : > { %5571 = vmatpush3.bf16.msra.mxu0 %v6398_v20  ;;  %v5233_v20 = vld [vmem:[#allocation4] ss:$0 sm:$0xff] }
 0x1cd   : > { %5572 = vmatprep.subr.bf16.mxu0 %v6399_v21 }
 0x1d0   : > { %5573 = vmatpush3.bf16.msra.mxu0 %v6400_v22 }
 0x1d1   : > { %5574 = vmatprep.subr.bf16.mxu0 %v6401_v24 }
 0x1d4   : > { %5575 = vmatpush3.bf16.msra.mxu0 %v6402_v28 }
 0x1d5   : > { %5576 = vmatprep.subr.bf16.mxu0 %v6404_v31 }
 0x1d8   : > { %5577 = vmatpush3.bf16.msra.mxu0 %v6405_v36  ;;  %v1849_v36 = vld [vmem:[#allocation6 + $0x8] sm:$0x3] }
 0x1d9   : > { %5578 = vmatprep.subr.bf16.mxu0 %v6407_v39  ;;  %v1894_v39 = vld [vmem:[#allocation6 + $0xa] sm:$0x3] }
 0x1dc   : > { %5579 = vmatpush3.bf16.msra.mxu0 %v6408_v40  ;;  %v2029_v40 = vld [vmem:[#allocation6 + $0x10] sm:$0x3] }
 0x1dd   : > { %5904 = vmatprep.subr.bf16.mxu0 %v6913_v9 }
 0x23f   : > { %v7320_v48 = vpop.f32.mrf.mxu0  ;;  %v1045_v49 = vpop.f32.mrf.mxu1 }
 0x241   : > { %v5786_v50 = vpop.f32.mrf.mxu0  ;;  %v5810_v51 = vpop.f32.mrf.mxu1 }
 0x243   : > { %v7322_v52 = vpop.f32.mrf.mxu0  ;;  %v1048_v53 = vpop.f32.mrf.mxu1 }
 0x244   : > { %v6267_v54 = vpack.i.bf16 %v1048_v53, %v1045_v49 }
 0x245   : > { %v5787_v55 = vpop.f32.mrf.mxu0  ;;  %v5811_v56 = vpop.f32.mrf.mxu1 }
 0x246   : > { %6268 = vrot.lane.b32.xlu1 %v6267_v54, %s8101_s0 }
 0x24f   : > { %v993_v57 = vpop.f32.mrf.mxu0  ;;  %v7325_v58 = vpop.f32.mrf.mxu1 }
 0x251   : > { %v5798_v59 = vpop.f32.mrf.mxu0  ;;  %v5834_v60 = vpop.f32.mrf.mxu1 }
 0x253   : > { %v996_v61 = vpop.f32.mrf.mxu0  ;;  %v7327_v62 = vpop.f32.mrf.mxu1 }
 0x254   : > { %v6272_v63 = vpack.i.bf16 %v996_v61, %v993_v57 }
 0x255   : > { %v5799_v0 = vpop.f32.mrf.mxu0  ;;  %v5835_v1 = vpop.f32.mrf.mxu1 }
 0x256   : > { %6273 = vrot.lane.b32.xlu0 %v6272_v63, %s8103_s30 }
 0x25f   : > { %v1097_v4 = vpop.f32.mrf.mxu0  ;;  %v1253_v5 = vpop.f32.mrf.mxu1 }
 0x261   : > { %v5822_v8 = vpop.f32.mrf.mxu0  ;;  %v5858_v10 = vpop.f32.mrf.mxu1 }
 0x263   : > { %v1100_v12 = vpop.f32.mrf.mxu0  ;;  %v1256_v13 = vpop.f32.mrf.mxu1 }
 0x264   : > { %v6277_v14 = vpack.i.bf16 %v1256_v13, %v1253_v5  ;;  %v6292_v18 = vpack.i.bf16 %v1100_v12, %v1097_v4 }
 0x265   : > { %v5823_v16 = vpop.f32.mrf.mxu0  ;;  %v5859_v17 = vpop.f32.mrf.mxu1 }
 0x266   : > { %6278 = vrot.lane.b32.xlu1 %v6277_v14, %s8101_s0 }
 0x26a   : > { %6293 = vrot.lane.b32.xlu1 %v6292_v18, %s6917_s3 }
 0x26f   : > { %v1201_v26 = vpop.f32.mrf.mxu0  ;;  %v1357_v27 = vpop.f32.mrf.mxu1 }
 0x271   : > { %v5846_v29 = vpop.f32.mrf.mxu0  ;;  %v5882_v30 = vpop.f32.mrf.mxu1 }
 0x273   : > { %v1204_v32 = vpop.f32.mrf.mxu0  ;;  %v1360_v33 = vpop.f32.mrf.mxu1 }
 0x274   : > { %v6282_v34 = vpack.i.bf16 %v1204_v32, %v1201_v26  ;;  %v1428_v35 = vpack.c.bf16 %v1360_v33, %v1357_v27  ;;  %v1668_v33 = vld [vmem:[#allocation6] sm:$0x3] }
 0x275   : > { %v5847_v37 = vpop.f32.mrf.mxu0  ;;  %v5883_v38 = vpop.f32.mrf.mxu1 }
 0x276   : > { %6283 = vrot.lane.b32.xlu0 %v6282_v34, %s8103_s30  ;;  %5889 = vmatmul.mubr.msk.bf16.vlgmr.msra.gmra.mxu1 %vm1412_vm5, %v1428_v35  ;;  %v1759_v34 = vld [vmem:[#allocation6 + $0x4] sm:$0x3]  ;;  %v1714_v35 = vld [vmem:[#allocation6 + $0x2] sm:$0x3]  ;;  %v1804_v37 = vld [vmem:[#allocation6 + $0x6] sm:$0x3] }
 0x277   : > { %5894 = vmatprep.mubr.msk.bf16.mxu1 %vm6914_vm3, %v6913_v9  ;;  %v1939_v38 = vld [vmem:[#allocation6 + $0xc] sm:$0x3]  ;;  %s8127_s30 = smov 32  }
 0x27f   : > { %v1305_v41 = vpop.f32.mrf.mxu0 }
 0x281   : > { %v5870_v42 = vpop.f32.mrf.mxu0 }
 0x282   : > { %v6409_v42 = vld [vmem:[%s8077_s7 + $0x78] sm:$0xff]  }
 0x283   : > { %v1308_v43 = vpop.f32.mrf.mxu0 }
 0x284   : > { %v6287_v44 = vpack.i.bf16 %v1308_v43, %v1305_v41  ;;  %v1984_v41 = vld [vmem:[#allocation6 + $0xe] sm:$0x3] }
 0x285   : > { %v5871_v45 = vpop.f32.mrf.mxu0  ;;  %v6410_v43 = vld [vmem:[%s8077_s7 + $0x38] sm:$0xff]  }
 0x286   : > { %6288 = vrot.lane.b32.xlu0 %v6287_v44, %s6917_s3  ;;  %v6411_v44 = vld [vmem:[%s8077_s7 + $0x70] sm:$0xff]  }
 0x287   : > { %v6412_v45 = vld [vmem:[%s8077_s7 + $0x30] sm:$0xff]  }
 0x2b8   : > { %v6269_v46 = vpop.permute.xlu1 %6268 }
 0x2b9   : > { %v6271_v60 = vunpack.i.h.bf16 %v6269_v46  ;;  %v6270_v61 = vunpack.i.l.bf16 %v6269_v46  ;;  %v6418_v46 = vld [vmem:[%s8077_s7 + $0xf8] sm:$0xff]  }
 0x2c8   : > { %v6274_v47 = vpop.permute.xlu0 %6273 }
 0x2c9   : > { %v6276_v51 = vunpack.i.h.bf16 %v6274_v47  ;;  %v6275_v53 = vunpack.i.l.bf16 %v6274_v47  ;;  %v6420_v47 = vld [vmem:[%s8077_s7 + $0xb8] sm:$0xff]  }
 0x2cb   : > { %v1414_v57 = vsel %vm1412_vm5, %v7322_v52, %v6276_v51  ;;  %v1413_v59 = vsel %vm1412_vm5, %v7320_v48, %v6275_v53  ;;  %v6424_v51 = vld [vmem:[%s8077_s7 + $0xb0] sm:$0xff]   ;;  %v6414_v53 = vld [vmem:[%s8077_s7 + $0x28] sm:$0xff]  }
 0x2cc   : > { %v1415_v6 = vsel %vm903_vm4, %v1413_v59, %v6270_v61  ;;  %v1416_v52 = vsel %vm903_vm4, %v1414_v57, %v6271_v60  ;;  %v6416_v57 = vld [vmem:[%s8077_s7 + $0x20] sm:$0xff]   ;;  %v6417_v59 = vld [vmem:[%s8077_s7 + $0x58] sm:$0xff]   ;;  %v6421_v61 = vld [vmem:[%s8077_s7 + $0x50] sm:$0xff]  }
 0x2cd   : > { %v6419_v60 = vld [vmem:[%s8077_s7 + $0x18] sm:$0xff]  }
 0x2d8   : > { %v6279_v49 = vpop.permute.xlu1 %6278 }
 0x2d9   : > { %v6281_v63 = vunpack.i.h.bf16 %v6279_v49  ;;  %v6280_v0 = vunpack.i.l.bf16 %v6279_v49  ;;  %v6413_v49 = vld [vmem:[%s8077_s7 + $0x68] sm:$0xff]  }
 0x2dc   : > { %v6294_v54 = vpop.permute.xlu1 %6293 }
 0x2dd   : > { %v6296_v1 = vunpack.i.h.bf16 %v6294_v54  ;;  %v6295_v2 = vunpack.i.l.bf16 %v6294_v54  ;;  %v6426_v54 = vld [vmem:[%s8077_s7 + $0xe8] sm:$0xff]  }
 0x2df   : > { %v1419_v8 = vsel %vm1417_vm6, %v1416_v52, %v6296_v1  ;;  %v1418_v10 = vsel %vm1417_vm6, %v1415_v6, %v6295_v2  ;;  %v6427_v1 = vld [vmem:[%s8077_s7 + $0x8] sm:$0xff]  }
 0x2e0   : > { %v1426_v14 = vpack.c.bf16 %v1419_v8, %v1418_v10  ;;  %v6429_v8 = vld [vmem:[%s8077_s7 + $0x40] sm:$0xff]  }
 0x2e1   : > { %v6430_v10 = vld [vmem:[%s8077_s7 + $0xe0] sm:$0xff]  }
 0x2e8   : > { %v6284_v50 = vpop.permute.xlu0 %6283 }
 0x2e9   : > { %v6286_v55 = vunpack.i.h.bf16 %v6284_v50  ;;  %v6285_v56 = vunpack.i.l.bf16 %v6284_v50  ;;  %v6422_v50 = vld [vmem:[%s8077_s7 + $0xf0] sm:$0xff]  }
 0x2eb   : > { %v1421_v3 = vsel %vm1412_vm5, %v7327_v62, %v6286_v55  ;;  %v1420_v4 = vsel %vm1412_vm5, %v7325_v58, %v6285_v56  ;;  %v6415_v55 = vld [vmem:[%s8077_s7 + $0x60] sm:$0xff]   ;;  %v6428_v56 = vld [vmem:[%s8077_s7 + $0xa8] sm:$0xff]  }
 0x2ec   : > { %v1422_v11 = vsel %vm903_vm4, %v1420_v4, %v6280_v0  ;;  %v1423_v12 = vsel %vm903_vm4, %v1421_v3, %v6281_v63  ;;  %v6423_v63 = vld [vmem:[%s8077_s7 + $0x10] sm:$0xff]   ;;  %v6425_v0 = vld [vmem:[%s8077_s7 + $0x48] sm:$0xff]  }
 0x2f8   : > { %v6289_v5 = vpop.permute.xlu0 %6288 }
 0x2f9   : > { %v6291_v7 = vunpack.i.h.bf16 %v6289_v5  ;;  %v6290_v48 = vunpack.i.l.bf16 %v6289_v5 }
 0x2fb   : > { %v1424_v62 = vsel %vm1417_vm6, %v1422_v11, %v6290_v48  ;;  %v1425_v13 = vsel %vm1417_vm6, %v1423_v12, %v6291_v7  ;;  %v6431_v12 = vld [vmem:[%s8077_s7] sm:$0xff]  }
 0x2fc   : > { %v1427_v58 = vpack.c.bf16 %v1425_v13, %v1424_v62  ;;  %v6432_v62 = vld [vmem:[%s8077_s7 + $0xa0] sm:$0xff]  }
 0x2fe   : > { %1615 = vmatprep.mubr.bf16.mxu0 %v1427_v58 }
 0x2ff   : > { %1616 = vmatmul.mubr.bf16.vlgmr.msra.gmra.mxu0 %v1426_v14 }
 0x300   : > { %5906 = vmatprep.mubr.msk.bf16.mxu0 %vm6914_vm3, %v6913_v9 }
 0x336   : > { %v1658_v15 = vpop.f32.mrf.mxu1 }
 0x338   : > { %v5890_v16 = vpop.f32.mrf.mxu1 }
 0x33a   : > { %v1661_v17 = vpop.f32.mrf.mxu1 }
 0x33c   : > { %v5891_v18 = vpop.f32.mrf.mxu1 }
 0x3bf   : > { %v5580_v19 = vpop.f32.mrf.mxu0 }
 0x3c1   : > { %v5581_v21 = vpop.f32.mrf.mxu0 }
 0x3c2   : > { %v5582_v22 = vadd.f32 %v5581_v21, %v5580_v19  ;;  %v6436_v19 = vld [vmem:[%s8077_s7 + $0xd0] sm:$0xff]  }
 0x3c3   : > { %v5583_v23 = vpop.f32.mrf.mxu0  ;;  %v6437_v21 = vld [vmem:[%s8077_s7 + $0x90] sm:$0xff]  }
 0x3c4   : > { %v1618_v24 = vadd.f32 %v5582_v22, %v5233_v20 }
 0x3c5   : > { %v5584_v25 = vpop.f32.mrf.mxu0 }
 0x3c6   : > { %v5585_v26 = vadd.f32 %v5584_v25, %v5583_v23  ;;  %v1659_v27 = vadd.f32 %v1658_v15, %v1618_v24  ;;  %v6433_v15 = vld [vmem:[%s8077_s7 + $0xd8] sm:$0xff]  }
 0x3c8   : > { %v1621_v28 = vadd.f32 %v5585_v26, %v5233_v20  ;;  %v1665_v30 = vmax.f32 %v1659_v27, 0.0  ;;  %v6439_v26 = vld [vmem:[%s8077_s7 + $0xc8] sm:$0xff]  }
 0x3ca   : > { %v1662_v29 = vadd.f32 %v1661_v17, %v1621_v28  ;;  %v6434_v17 = vld [vmem:[%s8077_s7 + $0x98] sm:$0xff]   ;;  %v6440_v28 = vld [vmem:[%s8077_s7 + $0x88] sm:$0xff]  }
 0x3cc   : > { %v1666_v31 = vmax.f32 %v1662_v29, 0.0 }
 0x3ce   : > { %v1667_v32 = vpack.c.bf16 %v1666_v31, %v1665_v30 }
 0x3d0   : > { %5893 = vmatpush3.bf16.msra.mxu1 %v1667_v32  ;;  %5905 = vmatpush3.bf16.msra.mxu0 %v1667_v32 }
 0x3d1   : > { %5898 = vmatprep.subr.bf16.mxu1 %v6913_v9  ;;  %5916 = vmatprep.subr.bf16.mxu0 %v6913_v9 }
 0x3d3   : > { %5895 = vmatmul.mubr.msk.bf16.vlgmr.msra.gmra.mxu1 %vm1669_vm7, %v1668_v33  ;;  %5907 = vmatmul.mubr.msk.bf16.vlgmr.msra.gmra.mxu0 %vm1669_vm7, %v1759_v34  ;;  %v6442_v34 = vld [vmem:[%s8077_s7 + $0xc0] sm:$0xff]  }
 0x3d4   : > { %5899 = vmatpush3.bf16.msra.mxu1 %v1667_v32  ;;  %5917 = vmatpush3.bf16.msra.mxu0 %v1667_v32 }
 0x3d5   : > { %5900 = vmatprep.mubr.msk.bf16.mxu1 %vm6914_vm3, %v6913_v9  ;;  %5910 = vmatprep.subr.bf16.mxu1 %v6913_v9 }
 0x3d6   : > { %5918 = vmatprep.mubr.msk.bf16.mxu0 %vm6914_vm3, %v6913_v9  ;;  %5928 = vmatprep.subr.bf16.mxu0 %v6913_v9 }
 0x3db   : > { %5901 = vmatmul.mubr.msk.bf16.vlgmr.msra.gmra.mxu1 %vm1669_vm7, %v1714_v35  ;;  %5919 = vmatmul.mubr.msk.bf16.vlgmr.msra.gmra.mxu0 %vm1669_vm7, %v1849_v36  ;;  %v6443_v36 = vld [vmem:[%s8077_s7 + $0x80] sm:$0xff]  }
 0x3dc   : > { %5911 = vmatpush3.bf16.msra.mxu1 %v1667_v32  ;;  %5929 = vmatpush3.bf16.msra.mxu0 %v1667_v32 }
 0x3dd   : > { %5912 = vmatprep.mubr.msk.bf16.mxu1 %vm6914_vm3, %v6913_v9  ;;  %5922 = vmatprep.subr.bf16.mxu1 %v6913_v9 }
 0x3de   : > { %5930 = vmatprep.mubr.msk.bf16.mxu0 %vm6914_vm3, %v6913_v9  ;;  %5940 = vmatprep.subr.bf16.mxu0 %v6913_v9 }
 0x3e3   : > { %5913 = vmatmul.mubr.msk.bf16.vlgmr.msra.gmra.mxu1 %vm1669_vm7, %v1804_v37  ;;  %5931 = vmatmul.mubr.msk.bf16.vlgmr.msra.gmra.mxu0 %vm1669_vm7, %v1939_v38 }
 0x3e4   : > { %5923 = vmatpush3.bf16.msra.mxu1 %v1667_v32  ;;  %5941 = vmatpush3.bf16.msra.mxu0 %v1667_v32 }
 0x3e5   : > { %5924 = vmatprep.mubr.msk.bf16.mxu1 %vm6914_vm3, %v6913_v9  ;;  %5934 = vmatprep.subr.bf16.mxu1 %v6913_v9 }
 0x3e6   : > { %5942 = vmatprep.mubr.msk.bf16.mxu0 %vm6914_vm3, %v6913_v9  ;;  %5629 = vmatprep.subr.bf16.mxu0 %v6418_v46 }
 0x3eb   : > { %5925 = vmatmul.mubr.msk.bf16.vlgmr.msra.gmra.mxu1 %vm1669_vm7, %v1894_v39  ;;  %5943 = vmatmul.mubr.msk.bf16.vlgmr.msra.gmra.mxu0 %vm1669_vm7, %v2029_v40 }
 0x3ec   : > { %5935 = vmatpush3.bf16.msra.mxu1 %v1667_v32  ;;  %5936 = vmatprep.mubr.msk.bf16.mxu1 %vm6914_vm3, %v6913_v9 }
 0x3ed   : > { %5607 = vmatprep.subr.bf16.mxu1 %v6409_v42  ;;  %5630 = vmatpush3.bf16.msra.mxu0 %v6420_v47 }
 0x3ee   : > { %5631 = vmatprep.subr.bf16.mxu0 %v6422_v50 }
 0x3f1   : > { %5632 = vmatpush3.bf16.msra.mxu0 %v6424_v51 }
 0x3f2   : > { %5633 = vmatprep.subr.bf16.mxu0 %v6426_v54 }
 0x3f3   : > { %5937 = vmatmul.mubr.msk.bf16.vlgmr.msra.gmra.mxu1 %vm1669_vm7, %v1984_v41 }
 0x3f4   : > { %5608 = vmatpush3.bf16.msra.mxu1 %v6410_v43 }
 0x3f5   : > { %5609 = vmatprep.subr.bf16.mxu1 %v6411_v44  ;;  %5634 = vmatpush3.bf16.msra.mxu0 %v6428_v56 }
 0x3f6   : > { %5635 = vmatprep.subr.bf16.mxu0 %v6430_v10 }
 0x3f8   : > { %5610 = vmatpush3.bf16.msra.mxu1 %v6412_v45 }
 0x3f9   : > { %5611 = vmatprep.subr.bf16.mxu1 %v6413_v49  ;;  %5636 = vmatpush3.bf16.msra.mxu0 %v6432_v62 }
 0x3fa   : > { %5637 = vmatprep.subr.bf16.mxu0 %v6433_v15 }
 0x3fc   : > { %5612 = vmatpush3.bf16.msra.mxu1 %v6414_v53 }
 0x3fd   : > { %5613 = vmatprep.subr.bf16.mxu1 %v6415_v55  ;;  %5638 = vmatpush3.bf16.msra.mxu0 %v6434_v17 }
 0x3fe   : > { %5639 = vmatprep.subr.bf16.mxu0 %v6436_v19 }
 0x400   : > { %5614 = vmatpush3.bf16.msra.mxu1 %v6416_v57 }
 0x401   : > { %5615 = vmatprep.subr.bf16.mxu1 %v6417_v59  ;;  %5640 = vmatpush3.bf16.msra.mxu0 %v6437_v21  ;;  %v6435_v59 = vld [vmem:[%s8077_s7 + $0x118] sm:$0xff]  }
 0x402   : > { %5641 = vmatprep.subr.bf16.mxu0 %v6439_v26 }
 0x404   : > { %5616 = vmatpush3.bf16.msra.mxu1 %v6419_v60  ;;  %v6438_v60 = vld [vmem:[%s8077_s7 + $0x110] sm:$0xff]  }
 0x405   : > { %5617 = vmatprep.subr.bf16.mxu1 %v6421_v61  ;;  %5642 = vmatpush3.bf16.msra.mxu0 %v6440_v28  ;;  %v6441_v61 = vld [vmem:[%s8077_s7 + $0x108] sm:$0xff]   ;;  %v2613_v28 = vld [vmem:[#allocation9 + $0x4] sm:$0x3] }
 0x406   : > { %5643 = vmatprep.subr.bf16.mxu0 %v6442_v34  ;;  %v6451_v34 = vld [vmem:[%s8080_s10 + $0x50] ss:$8 sps:$4 sm:$0xff]  }
 0x408   : > { %5618 = vmatpush3.bf16.msra.mxu1 %v6423_v63 }
 0x409   : > { %5619 = vmatprep.subr.bf16.mxu1 %v6425_v0  ;;  %5644 = vmatpush3.bf16.msra.mxu0 %v6443_v36  ;;  %v6444_v0 = vld [vmem:[%s8077_s7 + $0x100] sm:$0xff]  }
 0x40a   : > { %5958 = vmatprep.subr.bf16.mxu0 %v6913_v9  ;;  %v6459_v36 = vld [vmem:[%s8080_s10 + $0x44] ss:$8 sps:$4 sm:$0xff]  }
 0x40c   : > { %5620 = vmatpush3.bf16.msra.mxu1 %v6427_v1 }
 0x40d   : > { %5621 = vmatprep.subr.bf16.mxu1 %v6429_v8 }
 0x410   : > { %5622 = vmatpush3.bf16.msra.mxu1 %v6431_v12  ;;  %v5262_v12 = vld [vmem:[#allocation7] ss:$0 sm:$0xff] }
 0x411   : > { %5946 = vmatprep.subr.bf16.mxu1 %v6913_v9 }
 0x493   : > { %v7502_v2 = vpop.f32.mrf.mxu1  ;;  %v7504_v3 = vpop.f32.mrf.mxu0 }
 0x495   : > { %v5896_v4 = vpop.f32.mrf.mxu1  ;;  %v5908_v5 = vpop.f32.mrf.mxu0 }
 0x497   : > { %v1710_v6 = vpop.f32.mrf.mxu1  ;;  %v1800_v52 = vpop.f32.mrf.mxu0 }
 0x499   : > { %v5897_v7 = vpop.f32.mrf.mxu1  ;;  %v5909_v48 = vpop.f32.mrf.mxu0 }
 0x49b   : > { %v1752_v11 = vpop.f32.mrf.mxu1  ;;  %v7518_v13 = vpop.f32.mrf.mxu0 }
 0x49d   : > { %v5902_v58 = vpop.f32.mrf.mxu1  ;;  %v5920_v14 = vpop.f32.mrf.mxu0 }
 0x49f   : > { %v1755_v16 = vpop.f32.mrf.mxu1  ;;  %v1890_v18 = vpop.f32.mrf.mxu0 }
 0x4a1   : > { %v5903_v20 = vpop.f32.mrf.mxu1  ;;  %v5921_v22 = vpop.f32.mrf.mxu0 }
 0x4a3   : > { %v1842_v23 = vpop.f32.mrf.mxu1  ;;  %v1977_v25 = vpop.f32.mrf.mxu0 }
 0x4a4   : > { %v6297_v24 = vpack.i.bf16 %v1752_v11, %v1842_v23 }
 0x4a5   : > { %v5914_v27 = vpop.f32.mrf.mxu1  ;;  %v5932_v29 = vpop.f32.mrf.mxu0 }
 0x4a6   : > { %6298 = vrot.lane.b32.xlu0 %v6297_v24, %s8126_s24  ;;  %v2518_v27 = vld [vmem:[#allocation9] sm:$0x3]  ;;  %v6445_v29 = vld [vmem:[%s8080_s10 + $0x70] ss:$8 sps:$4 sm:$0xff]  }
 0x4a7   : > { %v1845_v30 = vpop.f32.mrf.mxu1  ;;  %v1980_v31 = vpop.f32.mrf.mxu0 }
 0x4a8   : > { %v6450_v30 = vld [vmem:[%s8080_s10 + $0x64] ss:$8 sps:$4 sm:$0xff]   ;;  %v6448_v31 = vld [vmem:[%s8080_s10 + $0x60] ss:$8 sps:$4 sm:$0xff]  }
 0x4a9   : > { %v5915_v32 = vpop.f32.mrf.mxu1  ;;  %v5933_v33 = vpop.f32.mrf.mxu0 }
 0x4aa   : > { %v6453_v32 = vld [vmem:[%s8080_s10 + $0x54] ss:$8 sps:$4 sm:$0xff]   ;;  %v2568_v33 = vld [vmem:[#allocation9 + $0x2] sm:$0x3] }
 0x4ab   : > { %v1932_v35 = vpop.f32.mrf.mxu1  ;;  %v2067_v37 = vpop.f32.mrf.mxu0 }
 0x4ac   : > { %v2097_v4 = vpack.c.bf16 %v2067_v37, %v2067_v37  ;;  %v6457_v37 = vld [vmem:[%s8080_s10 + $0x40] ss:$8 sps:$4 sm:$0xff]  }
 0x4ad   : > { %v5926_v38 = vpop.f32.mrf.mxu1  ;;  %v5944_v39 = vpop.f32.mrf.mxu0 }
 0x4ae   : > { %v6465_v38 = vld [vmem:[%s8080_s10 + $0x34] ss:$8 sps:$4 sm:$0xff]   ;;  %v2658_v39 = vld [vmem:[#allocation9 + $0x6] sm:$0x3] }
 0x4af   : > { %v1935_v40 = vpop.f32.mrf.mxu1  ;;  %v2070_v41 = vpop.f32.mrf.mxu0 }
 0x4b0   : > { %v6454_v40 = vld [vmem:[%s8080_s10 + $0x170] ss:$8 sps:$4 sm:$0xff]   ;;  %v6462_v41 = vld [vmem:[%s8080_s10 + $0x164] ss:$8 sps:$4 sm:$0xff]  }
 0x4b1   : > { %v5927_v42 = vpop.f32.mrf.mxu1  ;;  %v5945_v43 = vpop.f32.mrf.mxu0 }
 0x4b2   : > { %v6463_v42 = vld [vmem:[%s8080_s10 + $0x30] ss:$8 sps:$4 sm:$0xff]   ;;  %v6471_v43 = vld [vmem:[%s8080_s10 + $0x24] ss:$8 sps:$4 sm:$0xff]  }
 0x4b3   : > { %v2022_v44 = vpop.f32.mrf.mxu1 }
 0x4b4   : > { %v6302_v45 = vpack.i.bf16 %v1932_v35, %v2022_v44  ;;  %v6456_v35 = vld [vmem:[%s8080_s10 + $0x174] ss:$8 sps:$4 sm:$0xff]   ;;  %v6460_v44 = vld [vmem:[%s8080_s10 + $0x160] ss:$8 sps:$4 sm:$0xff]  }
 0x4b5   : > { %v5938_v46 = vpop.f32.mrf.mxu1 }
 0x4b6   : > { %6303 = vrot.lane.b32.xlu1 %v6302_v45, %s8126_s24  ;;  %v6468_v45 = vld [vmem:[%s8080_s10 + $0x154] ss:$8 sps:$4 sm:$0xff]   ;;  %v6469_v46 = vld [vmem:[%s8080_s10 + $0x20] ss:$8 sps:$4 sm:$0xff]  }
 0x4b7   : > { %v2025_v47 = vpop.f32.mrf.mxu1 }
 0x4b8   : > { %v6477_v47 = vld [vmem:[%s8080_s10 + $0x14] ss:$8 sps:$4 sm:$0xff]  }
 0x4b9   : > { %v5939_v49 = vpop.f32.mrf.mxu1 }
 0x4ba   : > { %v6466_v49 = vld [vmem:[%s8080_s10 + $0x150] ss:$8 sps:$4 sm:$0xff]  }
 0x518   : > { %v6299_v50 = vpop.permute.xlu0 %6298 }
 0x519   : > { %v6301_v51 = vunpack.i.h.bf16 %v6299_v50  ;;  %v6300_v53 = vunpack.i.l.bf16 %v6299_v50  ;;  %v6474_v50 = vld [vmem:[%s8080_s10 + $0x144] ss:$8 sps:$4 sm:$0xff]  }
 0x51b   : > { %v2089_v54 = vsel %vm903_vm4, %v7502_v2, %v6301_v51  ;;  %v2090_v55 = vsel %vm903_vm4, %v7504_v3, %v6300_v53  ;;  %v6475_v51 = vld [vmem:[%s8080_s10 + $0x10] ss:$8 sps:$4 sm:$0xff]   ;;  %v6483_v53 = vld [vmem:[%s8080_s10 + $0x4] ss:$8 sps:$4 sm:$0xff]  }
 0x51c   : > { %v2093_v56 = vpack.c.bf16 %v2089_v54, %v2089_v54  ;;  %v2094_v57 = vpack.c.bf16 %v2090_v55, %v2090_v55  ;;  %v6472_v54 = vld [vmem:[%s8080_s10 + $0x140] ss:$8 sps:$4 sm:$0xff]   ;;  %v6480_v55 = vld [vmem:[%s8080_s10 + $0x134] ss:$8 sps:$4 sm:$0xff]  }
 0x51e   : > { %2428 = vmatprep.mubr.bf16.mxu1 %v2094_v57  ;;  %v6489_v57 = vld [vmem:[%s8080_s10 + $0xf4] ss:$8 sps:$4 sm:$0xff]  }
 0x51f   : > { %2429 = vmatmul.mubr.bf16.vlgmr.msra.gmra.mxu1 %v2093_v56  ;;  %v6481_v56 = vld [vmem:[%s8080_s10] ss:$8 sps:$4 sm:$0xff]  }
 0x520   : > { %5947 = vmatpush3.bf16.msra.mxu1 %v6435_v59  ;;  %5954 = vmatprep.mubr.msk.bf16.mxu1 %vm6914_vm3, %v6913_v9  ;;  %v6478_v59 = vld [vmem:[%s8080_s10 + $0x130] ss:$8 sps:$4 sm:$0xff]  }
 0x521   : > { %5948 = vmatprep.subr.bf16.mxu1 %v6913_v9 }
 0x524   : > { %5949 = vmatpush3.bf16.msra.mxu1 %v6438_v60  ;;  %v6486_v60 = vld [vmem:[%s8080_s10 + $0x124] ss:$8 sps:$4 sm:$0xff]  }
 0x525   : > { %5950 = vmatprep.subr.bf16.mxu1 %v6913_v9 }
 0x528   : > { %5951 = vmatpush3.bf16.msra.mxu1 %v6441_v61  ;;  %v6304_v63 = vpop.permute.xlu1 %6303  ;;  %v6487_v61 = vld [vmem:[%s8080_s10 + $0xf0] ss:$8 sps:$4 sm:$0xff]  }
 0x529   : > { %v6306_v1 = vunpack.i.h.bf16 %v6304_v63  ;;  %v6305_v2 = vunpack.i.l.bf16 %v6304_v63  ;;  %5952 = vmatprep.subr.bf16.mxu1 %v6913_v9  ;;  %v6495_v63 = vld [vmem:[%s8080_s10 + $0xe4] ss:$8 sps:$4 sm:$0xff]  }
 0x52b   : > { %v2091_v3 = vsel %vm903_vm4, %v7518_v13, %v6306_v1  ;;  %v2092_v5 = vsel %vm903_vm4, %v1977_v25, %v6305_v2  ;;  %v6447_v25 = vld [vmem:[%s8080_s10 + $0x74] ss:$8 sps:$4 sm:$0xff]   ;;  %v6493_v2 = vld [vmem:[%s8080_s10 + $0xe0] ss:$8 sps:$4 sm:$0xff]  }
 0x52c   : > { %v2095_v6 = vpack.c.bf16 %v2091_v3, %v2091_v3  ;;  %5953 = vmatpush3.bf16.msra.mxu1 %v6444_v0  ;;  %v2096_v52 = vpack.c.bf16 %v2092_v5, %v2092_v5  ;;  %v6484_v0 = vld [vmem:[%s8080_s10 + $0x120] ss:$8 sps:$4 sm:$0xff]   ;;  %v6492_v1 = vld [vmem:[%s8080_s10 + $0x114] ss:$8 sps:$4 sm:$0xff]   ;;  %v6498_v5 = vld [vmem:[%s8080_s10 + $0x104] ss:$8 sps:$4 sm:$0xff]  }
 0x52d   : > { %5970 = vmatprep.subr.bf16.mxu1 %v6913_v9  ;;  %v6501_v3 = vld [vmem:[%s8080_s10 + $0xd4] ss:$8 sps:$4 sm:$0xff]  }
 0x52e   : > { %2468 = vmatprep.mubr.bf16.mxu0 %v2096_v52  ;;  %v6507_v52 = vld [vmem:[%s8080_s10 + $0xc4] ss:$8 sps:$4 sm:$0xff]  }
 0x52f   : > { %2469 = vmatmul.mubr.bf16.vlgmr.msra.gmra.mxu0 %v2095_v6  ;;  %5955 = vmatmul.mubr.msk.bf16.vlgmr.msra.gmra.mxu1 %vm903_vm4, %v2097_v4  ;;  %v6490_v4 = vld [vmem:[%s8080_s10 + $0x110] ss:$8 sps:$4 sm:$0xff]  }
 0x530   : > { %5960 = vmatprep.mubr.msk.bf16.mxu0 %vm6914_vm3, %v6913_v9  ;;  %5972 = vmatprep.mubr.msk.bf16.mxu1 %vm6914_vm3, %v6913_v9  ;;  %v6499_v6 = vld [vmem:[%s8080_s10 + $0xd0] ss:$8 sps:$4 sm:$0xff]  }
 0x5df   : > { %v5623_v7 = vpop.f32.mrf.mxu1 }
 0x5e1   : > { %v5624_v48 = vpop.f32.mrf.mxu1 }
 0x5e2   : > { %v5625_v11 = vadd.f32 %v5624_v48, %v5623_v7  ;;  %v6496_v7 = vld [vmem:[%s8080_s10 + $0x100] ss:$8 sps:$4 sm:$0xff]   ;;  %v6504_v48 = vld [vmem:[%s8080_s10 + $0x1f4] ss:$8 sps:$4 sm:$0xff]  }
 0x5e3   : > { %v5626_v8 = vpop.f32.mrf.mxu1 }
 0x5e4   : > { %v2431_v15 = vadd.f32 %v5625_v11, %v5262_v12  ;;  %v6505_v8 = vld [vmem:[%s8080_s10 + $0xc0] ss:$8 sps:$4 sm:$0xff]   ;;  %v6502_v11 = vld [vmem:[%s8080_s10 + $0x1f0] ss:$8 sps:$4 sm:$0xff]   ;;  %v6510_v12 = vld [vmem:[%s8080_s10 + $0x1e4] ss:$8 sps:$4 sm:$0xff]  }
 0x5e5   : > { %v5627_v10 = vpop.f32.mrf.mxu1 }
 0x5e6   : > { %v6513_v10 = vld [vmem:[%s8080_s10 + $0xb4] ss:$8 sps:$4 sm:$0xff]  }
 0x5ef   : > { %v5645_v62 = vpop.f32.mrf.mxu0  ;;  %v2510_v13 = vpop.f32.mrf.mxu1 }
 0x5f1   : > { %v5646_v58 = vpop.f32.mrf.mxu0  ;;  %v5956_v14 = vpop.f32.mrf.mxu1 }
 0x5f2   : > { %v5647_v16 = vadd.f32 %v5646_v58, %v5645_v62  ;;  %v6511_v62 = vld [vmem:[%s8080_s10 + $0xb0] ss:$8 sps:$4 sm:$0xff]   ;;  %v6516_v58 = vld [vmem:[%s8080_s10 + $0x1d4] ss:$8 sps:$4 sm:$0xff]  }
 0x5f3   : > { %v5648_v17 = vpop.f32.mrf.mxu0  ;;  %v2513_v18 = vpop.f32.mrf.mxu1  ;;  %v6514_v14 = vld [vmem:[%s8080_s10 + $0x1d0] ss:$8 sps:$4 sm:$0xff]  }
 0x5f4   : > { %v2471_v19 = vadd.f32 %v5647_v16, %v2431_v15  ;;  %v6519_v15 = vld [vmem:[%s8080_s10 + $0xa4] ss:$8 sps:$4 sm:$0xff]   ;;  %v6517_v17 = vld [vmem:[%s8080_s10 + $0xa0] ss:$8 sps:$4 sm:$0xff]  }
 0x5f5   : > { %v5649_v20 = vpop.f32.mrf.mxu0  ;;  %v5957_v21 = vpop.f32.mrf.mxu1  ;;  %v6522_v16 = vld [vmem:[%s8080_s10 + $0x1c4] ss:$8 sps:$4 sm:$0xff]   ;;  %v6520_v18 = vld [vmem:[%s8080_s10 + $0x1c0] ss:$8 sps:$4 sm:$0xff]  }
 0x5f6   : > { %v2511_v22 = vadd.f32 %v2510_v13, %v2471_v19  ;;  %v6508_v13 = vld [vmem:[%s8080_s10 + $0x1e0] ss:$8 sps:$4 sm:$0xff]   ;;  %v6525_v19 = vld [vmem:[%s8080_s10 + $0x94] ss:$8 sps:$4 sm:$0xff]   ;;  %v6523_v21 = vld [vmem:[%s8080_s10 + $0x90] ss:$8 sps:$4 sm:$0xff]  }
 0x5f7   : > { %v6528_v20 = vld [vmem:[%s8080_s10 + $0x1b4] ss:$8 sps:$4 sm:$0xff]  }
 0x5f8   : > { %v2516_v23 = vmax.f32 %v2511_v22, 0.0  ;;  %v6526_v22 = vld [vmem:[%s8080_s10 + $0x1b0] ss:$8 sps:$4 sm:$0xff]  }
 0x5fa   : > { %v2517_v24 = vpack.c.bf16 %v2516_v23, %v2516_v23  ;;  %v6531_v23 = vld [vmem:[%s8080_s10 + $0x84] ss:$8 sps:$4 sm:$0xff]  }
 0x5fc   : > { %v2525_v26 = vsel %vm2523_vm8, %v2517_v24, 0  ;;  %v6534_v24 = vld [vmem:[%s8080_s10 + $0x1a4] ss:$8 sps:$4 sm:$0xff]  }
 0x5fd   : > { %5959 = vmatpush3.bf16.msra.mxu0 %v2525_v26  ;;  %5971 = vmatpush3.bf16.msra.mxu1 %v2525_v26 }
 0x5fe   : > { %5964 = vmatprep.subr.bf16.mxu0 %v6913_v9  ;;  %3102 = vmatprep.subr.bf16.mxu1 %v6447_v25  ;;  %v6529_v25 = vld [vmem:[%s8080_s10 + $0x80] ss:$8 sps:$4 sm:$0xff]  }
 0x600   : > { %5961 = vmatmul.mubr.msk.bf16.vlgmr.msra.gmra.mxu0 %vm2519_vm9, %v2518_v27  ;;  %5973 = vmatmul.mubr.msk.bf16.vlgmr.msra.gmra.mxu1 %vm2519_vm9, %v2613_v28  ;;  %v6537_v27 = vld [vmem:[%s8080_s10 + $0x194] ss:$8 sps:$4 sm:$0xff]   ;;  %v6535_v28 = vld [vmem:[%s8080_s10 + $0x190] ss:$8 sps:$4 sm:$0xff]  }
 0x601   : > { %5965 = vmatpush3.bf16.msra.mxu0 %v2525_v26  ;;  %5966 = vmatprep.mubr.msk.bf16.mxu0 %vm6914_vm3, %v6913_v9 }
 0x602   : > { %5976 = vmatprep.subr.bf16.mxu0 %v6913_v9  ;;  %3103 = vmatpush1.bf16.msra.mxu1 %v6445_v29  ;;  %v6540_v29 = vld [vmem:[%s8080_s10 + $0x184] ss:$8 sps:$4 sm:$0xff]  }
 0x603   : > { %3104 = vmatprep.subr.bf16.mxu1 %v6450_v30  ;;  %v6538_v30 = vld [vmem:[%s8080_s10 + $0x180] ss:$8 sps:$4 sm:$0xff]  }
 0x606   : > { %3105 = vmatpush1.bf16.msra.mxu1 %v6448_v31 }
 0x607   : > { %3106 = vmatprep.subr.bf16.mxu1 %v6453_v32 }
 0x608   : > { %5967 = vmatmul.mubr.msk.bf16.vlgmr.msra.gmra.mxu0 %vm2519_vm9, %v2568_v33 }
 0x609   : > { %5977 = vmatpush3.bf16.msra.mxu0 %v2525_v26  ;;  %5978 = vmatprep.mubr.msk.bf16.mxu0 %vm6914_vm3, %v6913_v9  ;;  %v6532_v26 = vld [vmem:[%s8080_s10 + $0x1a0] ss:$8 sps:$4 sm:$0xff]  }
 0x60a   : > { %3143 = vmatprep.subr.bf16.mxu0 %v6456_v35  ;;  %3107 = vmatpush1.bf16.msra.mxu1 %v6451_v34 }
 0x60b   : > { %3108 = vmatprep.subr.bf16.mxu1 %v6459_v36 }
 0x60e   : > { %3109 = vmatpush1.bf16.msra.mxu1 %v6457_v37 }
 0x60f   : > { %3110 = vmatprep.subr.bf16.mxu1 %v6465_v38 }
 0x610   : > { %5979 = vmatmul.mubr.msk.bf16.vlgmr.msra.gmra.mxu0 %vm2519_vm9, %v2658_v39 }
 0x611   : > { %3144 = vmatpush1.bf16.msra.mxu0 %v6454_v40 }
 0x612   : > { %3145 = vmatprep.subr.bf16.mxu0 %v6462_v41  ;;  %3111 = vmatpush1.bf16.msra.mxu1 %v6463_v42 }
 0x613   : > { %3112 = vmatprep.subr.bf16.mxu1 %v6471_v43 }
 0x615   : > { %3146 = vmatpush1.bf16.msra.mxu0 %v6460_v44 }
 0x616   : > { %3147 = vmatprep.subr.bf16.mxu0 %v6468_v45  ;;  %3113 = vmatpush1.bf16.msra.mxu1 %v6469_v46 }
 0x617   : > { %3114 = vmatprep.subr.bf16.mxu1 %v6477_v47 }
 0x619   : > { %3148 = vmatpush1.bf16.msra.mxu0 %v6466_v49 }
 0x61a   : > { %3149 = vmatprep.subr.bf16.mxu0 %v6474_v50  ;;  %3115 = vmatpush1.bf16.msra.mxu1 %v6475_v51 }
 0x61b   : > { %3116 = vmatprep.subr.bf16.mxu1 %v6483_v53  ;;  %v2772_v53 = vlaneseq }
 0x61d   : > { %3150 = vmatpush1.bf16.msra.mxu0 %v6472_v54  ;;  %v2773_v54 = vshrl.u32 %v2772_v53, 7  ;;  %v6553_v53 = vld [vmem:[%s8084_s14 + $0x68] sm:$0xff]  }
 0x61e   : > { %3151 = vmatprep.subr.bf16.mxu0 %v6480_v55  ;;  %3117 = vmatpush1.bf16.msra.mxu1 %v6481_v56  ;;  %v2770_v56 = vld [vmem:[#allocation10] sm:$0x3] }
 0x61f   : > { %3118 = vmatprep.subr.bf16.mxu1 %v6489_v57  ;;  %v2774_v55 = vsub.s32 0, %v2773_v54 }
 0x621   : > { %3152 = vmatpush1.bf16.msra.mxu0 %v6478_v59  ;;  %v2778_v59 = vsub.s32 1, %v2773_v54  ;;  %v6554_v54 = vld [vmem:[%s8084_s14 + $0x28] sm:$0xff]  }
 0x622   : > { %3153 = vmatprep.subr.bf16.mxu0 %v6486_v60  ;;  %3119 = vmatpush2.bf16.msra.mxu1 %v6487_v61  ;;  %v2775_v61 = vrot.slane %v2770_v56, %v2774_v55  ;;  %v6555_v55 = vld [vmem:[%s8084_s14 + $0x60] sm:$0xff]  }
 0x623   : > { %3120 = vmatprep.subr.bf16.mxu1 %v6495_v63 }
 0x625   : > { %3154 = vmatpush1.bf16.msra.mxu0 %v6484_v0  ;;  %v2779_v0 = vrot.slane %v2770_v56, %v2778_v59  ;;  %v6556_v56 = vld [vmem:[%s8084_s14 + $0x20] sm:$0xff]   ;;  %v6558_v59 = vld [vmem:[%s8084_s14 + $0x18] sm:$0xff]  }
 0x626   : > { %3155 = vmatprep.subr.bf16.mxu0 %v6492_v1  ;;  %3121 = vmatpush2.bf16.msra.mxu1 %v6493_v2 }
 0x627   : > { %3122 = vmatprep.subr.bf16.mxu1 %v6501_v3 }
 0x629   : > { %3156 = vmatpush1.bf16.msra.mxu0 %v6490_v4 }
 0x62a   : > { %3157 = vmatprep.subr.bf16.mxu0 %v6498_v5  ;;  %3123 = vmatpush2.bf16.msra.mxu1 %v6499_v6 }
 0x62b   : > { %3124 = vmatprep.subr.bf16.mxu1 %v6507_v52 }
 0x62d   : > { %3158 = vmatpush1.bf16.msra.mxu0 %v6496_v7 }
 0x62e   : > { %3159 = vmatprep.subr.bf16.mxu0 %v6504_v48  ;;  %3125 = vmatpush2.bf16.msra.mxu1 %v6505_v8 }
 0x62f   : > { %3126 = vmatprep.subr.bf16.mxu1 %v6513_v10 }
 0x631   : > { %3160 = vmatpush2.bf16.msra.mxu0 %v6502_v11 }
 0x632   : > { %3161 = vmatprep.subr.bf16.mxu0 %v6510_v12  ;;  %3127 = vmatpush2.bf16.msra.mxu1 %v6511_v62 }
 0x633   : > { %3128 = vmatprep.subr.bf16.mxu1 %v6519_v15 }
 0x635   : > { %3162 = vmatpush2.bf16.msra.mxu0 %v6508_v13  ;;  %v6541_v13 = vld [vmem:[%s8082_s12 + $0x10] sm:$0xff]  }
 0x636   : > { %3163 = vmatprep.subr.bf16.mxu0 %v6516_v58  ;;  %3129 = vmatpush2.bf16.msra.mxu1 %v6517_v17  ;;  %v6543_v17 = vld [vmem:[%s8082_s12 + $0x8] sm:$0xff]  }
 0x637   : > { %3130 = vmatprep.subr.bf16.mxu1 %v6525_v19 }
 0x639   : > { %3164 = vmatpush2.bf16.msra.mxu0 %v6514_v14  ;;  %v6542_v14 = vld [vmem:[%s8082_s12] sm:$0xff]  }
 0x63a   : > { %3165 = vmatprep.subr.bf16.mxu0 %v6522_v16  ;;  %3131 = vmatpush2.bf16.msra.mxu1 %v6523_v21 }
 0x63b   : > { %3132 = vmatprep.subr.bf16.mxu1 %v6531_v23 }
 0x63d   : > { %3166 = vmatpush2.bf16.msra.mxu0 %v6520_v18 }
 0x63e   : > { %3167 = vmatprep.subr.bf16.mxu0 %v6528_v20  ;;  %3133 = vmatpush2.bf16.msra.mxu1 %v6529_v25  ;;  %v6544_v20 = vld [vmem:[%s8082_s12 + $0x18] sm:$0xff]  }
 0x63f   : > { %5982 = vmatprep.subr.bf16.mxu1 %v6913_v9 }
 0x641   : > { %3168 = vmatpush2.bf16.msra.mxu0 %v6526_v22 }
 0x642   : > { %3169 = vmatprep.subr.bf16.mxu0 %v6534_v24 }
 0x645   : > { %3170 = vmatpush2.bf16.msra.mxu0 %v6532_v26 }
 0x646   : > { %3171 = vmatprep.subr.bf16.mxu0 %v6537_v27 }
 0x649   : > { %3172 = vmatpush2.bf16.msra.mxu0 %v6535_v28 }
 0x64a   : > { %3173 = vmatprep.subr.bf16.mxu0 %v6540_v29 }
 0x64d   : > { %3174 = vmatpush2.bf16.msra.mxu0 %v6538_v30 }
 0x64e   : > { %5988 = vmatprep.subr.bf16.mxu0 %v6913_v9 }
 0x6c0   : > { %v2561_v31 = vpop.f32.mrf.mxu0  ;;  %v2651_v32 = vpop.f32.mrf.mxu1 }
 0x6c1   : > { %v2702_v41 = vpack.c.bf16 %v2561_v31, %v2561_v31  ;;  %v2704_v45 = vpack.c.bf16 %v2651_v32, %v2651_v32 }
 0x6c2   : > { %v5962_v33 = vpop.f32.mrf.mxu0  ;;  %v5974_v34 = vpop.f32.mrf.mxu1 }
 0x6c4   : > { %v2564_v35 = vpop.f32.mrf.mxu0  ;;  %v2654_v36 = vpop.f32.mrf.mxu1 }
 0x6c6   : > { %v5963_v37 = vpop.f32.mrf.mxu0  ;;  %v5975_v38 = vpop.f32.mrf.mxu1 }
 0x6c8   : > { %v2606_v39 = vpop.f32.mrf.mxu0 }
 0x6c9   : > { %v2703_v40 = vpack.c.bf16 %v2606_v39, %v2606_v39 }
 0x6ca   : > { %v5968_v42 = vpop.f32.mrf.mxu0 }
 0x6cb   : > { %3134 = vmatprep.mubr.bf16.mxu1 %v2703_v40 }
 0x6cc   : > { %v2609_v43 = vpop.f32.mrf.mxu0  ;;  %3135 = vmatmul.mubr.bf16.vlgmr.msra.gmra.mxu1 %v2702_v41 }
 0x6cd   : > { %5984 = vmatprep.mubr.msk.bf16.mxu1 %vm6914_vm3, %v6913_v9 }
 0x6ce   : > { %v5969_v44 = vpop.f32.mrf.mxu0 }
 0x6cf   : > { %v6545_v44 = vld [vmem:[#allocation12 + $0x8] sm:$0xff]  }
 0x6d0   : > { %v2696_v46 = vpop.f32.mrf.mxu0 }
 0x6d1   : > { %v2705_v47 = vpack.c.bf16 %v2696_v46, %v2696_v46  ;;  %v6547_v46 = vld [vmem:[#allocation12 + $0x18] sm:$0xff]  }
 0x6d2   : > { %v5980_v49 = vpop.f32.mrf.mxu0 }
 0x6d3   : > { %3175 = vmatprep.mubr.bf16.mxu0 %v2705_v47  ;;  %v6548_v47 = vld [vmem:[#allocation12 + $0x10] sm:$0xff]  }
 0x6d4   : > { %v2699_v50 = vpop.f32.mrf.mxu0  ;;  %3176 = vmatmul.mubr.bf16.vlgmr.msra.gmra.mxu0 %v2704_v45  ;;  %v6546_v45 = vld [vmem:[#allocation12] sm:$0xff]   ;;  %v6549_v49 = vld [vmem:[%s8084_s14 + $0x78] sm:$0xff]  }
 0x6d5   : > { %5990 = vmatprep.mubr.msk.bf16.mxu0 %vm6914_vm3, %v6913_v9  ;;  %v6550_v50 = vld [vmem:[%s8084_s14 + $0x38] sm:$0xff]  }
 0x6d6   : > { %v5981_v51 = vpop.f32.mrf.mxu0 }
 0x6d7   : > { %v6551_v51 = vld [vmem:[%s8084_s14 + $0x70] sm:$0xff]  }
 0x78c   : > { %v3136_v57 = vpop.f32.mrf.mxu1 }
 0x78d   : > { %v3137_v2 = vadd.f32 %v3136_v57, %v2775_v61  ;;  %v6557_v57 = vld [vmem:[%s8084_s14 + $0x58] sm:$0xff]   ;;  %v6560_v61 = vld [vmem:[%s8084_s14 + $0x10] sm:$0xff]  }
 0x78e   : > { %v3138_v60 = vpop.f32.mrf.mxu1 }
 0x78f   : > { %v3139_v4 = vadd.f32 %v3138_v60, %v2779_v0  ;;  %v6559_v60 = vld [vmem:[%s8084_s14 + $0x50] sm:$0xff]   ;;  %v6562_v0 = vld [vmem:[%s8084_s14 + $0x8] sm:$0xff]  }
 0x790   : > { %v3140_v63 = vpop.f32.mrf.mxu1 }
 0x791   : > { %v6561_v63 = vld [vmem:[%s8084_s14 + $0x48] sm:$0xff]  }
 0x792   : > { %v3141_v1 = vpop.f32.mrf.mxu1 }
 0x794   : > { %v3177_v3 = vpop.f32.mrf.mxu0 }
 0x795   : > { %v3178_v5 = vadd.f32 %v3177_v3, %v3137_v2 }
 0x796   : > { %v3179_v6 = vpop.f32.mrf.mxu0 }
 0x797   : > { %v3184_v52 = vmax.f32 %v3178_v5, 0.0  ;;  %v3180_v7 = vadd.f32 %v3179_v6, %v3139_v4  ;;  %v6563_v5 = vld [vmem:[%s8084_s14 + $0x40] sm:$0xff]  }
 0x798   : > { %v3181_v48 = vpop.f32.mrf.mxu0  ;;  %v6564_v6 = vld [vmem:[%s8084_s14] sm:$0xff]  }
 0x799   : > { %v3186_v8 = vpack.c.bf16 %v3184_v52, %v3184_v52  ;;  %v3185_v10 = vmax.f32 %v3180_v7, 0.0 }
 0x79a   : > { %v3182_v11 = vpop.f32.mrf.mxu0 }
 0x79b   : > { %v3187_v12 = vpack.c.bf16 %v3185_v10, %v3185_v10  ;;  %3199 = vrot.lane.b32.xlu0 %v3186_v8, %s8126_s24  ;;  %v3370_v58 = vsel %vm2523_vm8, %v3186_v8, 0 }
 0x79d   : > { %3312 = vrot.lane.b32.xlu1 %v3187_v12, %s8126_s24  ;;  %v3260_v62 = vsel %vm2523_vm8, %v3187_v12, 0 }
 0x79e   : > { %5989 = vmatpush3.bf16.msra.mxu0 %v3260_v62 }
 0x79f   : > { %6000 = vmatprep.subr.bf16.mxu0 %v6913_v9 }
 0x7a1   : > { %5991 = vmatmul.mubr.msk.bf16.vlgmr.msra.gmra.mxu0 %vm2519_vm9, %v6541_v13 }
 0x7a2   : > { %6001 = vmatpush3.bf16.msra.mxu0 %v3370_v58  ;;  %6002 = vmatprep.mubr.msk.bf16.mxu0 %vm6914_vm3, %v6913_v9 }
 0x7a3   : > { %6012 = vmatprep.subr.bf16.mxu0 %v6913_v9 }
 0x7a9   : > { %6003 = vmatmul.mubr.msk.bf16.vlgmr.msra.gmra.mxu0 %vm2519_vm9, %v6542_v14 }
 0x7aa   : > { %6014 = vmatprep.mubr.msk.bf16.mxu0 %vm6914_vm3, %v6913_v9 }
 0x80d   : > { %v3200_v15 = vpop.permute.xlu0 %3199 }
 0x80e   : > { %v3205_v16 = vsel %vm2523_vm8, %v3200_v15, 0 }
 0x80f   : > { %v3313_v18 = vpop.permute.xlu1 %3312  ;;  %5983 = vmatpush3.bf16.msra.mxu1 %v3205_v16 }
 0x810   : > { %5994 = vmatprep.subr.bf16.mxu1 %v6913_v9  ;;  %v3318_v19 = vsel %vm2523_vm8, %v3313_v18, 0 }
 0x812   : > { %5985 = vmatmul.mubr.msk.bf16.vlgmr.msra.gmra.mxu1 %vm2519_vm9, %v6543_v17 }
 0x813   : > { %5995 = vmatpush3.bf16.msra.mxu1 %v3318_v19  ;;  %5996 = vmatprep.mubr.msk.bf16.mxu1 %vm6914_vm3, %v6913_v9 }
 0x814   : > { %6006 = vmatprep.subr.bf16.mxu1 %v6913_v9 }
 0x81a   : > { %5997 = vmatmul.mubr.msk.bf16.vlgmr.msra.gmra.mxu1 %vm2519_vm9, %v6544_v20 }
 0x81b   : > { %6008 = vmatprep.mubr.msk.bf16.mxu1 %vm6914_vm3, %v6913_v9 }
 0x861   : > { %v3296_v21 = vpop.f32.mrf.mxu0 }
 0x863   : > { %v5992_v22 = vpop.f32.mrf.mxu0 }
 0x865   : > { %v3299_v23 = vpop.f32.mrf.mxu0 }
 0x867   : > { %v5993_v24 = vpop.f32.mrf.mxu0 }
 0x869   : > { %v3406_v25 = vpop.f32.mrf.mxu0 }
 0x86b   : > { %v6004_v26 = vpop.f32.mrf.mxu0 }
 0x86d   : > { %v3409_v27 = vpop.f32.mrf.mxu0 }
 0x86f   : > { %v6005_v28 = vpop.f32.mrf.mxu0 }
 0x8d2   : > { %v3241_v29 = vpop.f32.mrf.mxu1 }
 0x8d3   : > { %v3407_v33 = vadd.f32 %v3406_v25, %v3241_v29 }
 0x8d4   : > { %v5986_v30 = vpop.f32.mrf.mxu1 }
 0x8d5   : > { %v3413_v37 = vadd.f32 %v3407_v33, %v3296_v21  ;;  %v5390_v33 = vld [vmem:[#allocation13] ss:$0 sm:$0xff] }
 0x8d6   : > { %v3244_v31 = vpop.f32.mrf.mxu1 }
 0x8d7   : > { %v3410_v34 = vadd.f32 %v3409_v27, %v3244_v31 }
 0x8d8   : > { %v5987_v32 = vpop.f32.mrf.mxu1 }
 0x8d9   : > { %v3414_v38 = vadd.f32 %v3410_v34, %v3299_v23 }
 0x8da   : > { %v3354_v35 = vpop.f32.mrf.mxu1 }
 0x8db   : > { %v3415_v40 = vadd.f32 %v3413_v37, %v3354_v35  ;;  %v6565_v35 = vld [vmem:[%s8086_s16 + $0x20] sm:$0xff]  }
 0x8dc   : > { %v5998_v36 = vpop.f32.mrf.mxu1 }
 0x8de   : > { %v3357_v39 = vpop.f32.mrf.mxu1 }
 0x8df   : > { %v3416_v41 = vadd.f32 %v3414_v38, %v3357_v39 }
 0x8e0   : > { %v5999_v42 = vpop.f32.mrf.mxu1 }
 0x8e1   : > { %v3417_v43 = vpack.c.bf16 %v3416_v41, %v3415_v40 }
 0x8e3   : > { %6007 = vmatpush3.bf16.msra.mxu1 %v3417_v43  ;;  %6013 = vmatpush3.bf16.msra.mxu0 %v3417_v43 }
 0x8e4   : > { %6018 = vmatprep.subr.bf16.mxu1 %v6913_v9  ;;  %6024 = vmatprep.subr.bf16.mxu0 %v6913_v9 }
 0x8e6   : > { %6015 = vmatmul.mubr.msk.bf16.vlgmr.msra.gmra.mxu0 %vm1669_vm7, %v6545_v44  ;;  %6009 = vmatmul.mubr.msk.bf16.vlgmr.msra.gmra.mxu1 %vm1669_vm7, %v6546_v45  ;;  %v6566_v45 = vld [vmem:[%s8086_s16 + $0x28] sm:$0xff]  }
 0x8e7   : > { %6019 = vmatpush3.bf16.msra.mxu1 %v3417_v43  ;;  %6025 = vmatpush3.bf16.msra.mxu0 %v3417_v43  ;;  %v6575_v43 = vld [vmem:[%s8086_s16 + $0x60] sm:$0xff]  }
 0x8e8   : > { %6026 = vmatprep.mubr.msk.bf16.mxu0 %vm6914_vm3, %v6913_v9  ;;  %6020 = vmatprep.mubr.msk.bf16.mxu1 %vm6914_vm3, %v6913_v9  ;;  %v6552_v9 = vld [vmem:[%s8084_s14 + $0x30] sm:$0xff]  }
 0x8e9   : > { %5680 = vmatprep.subr.bf16.mxu1 %v6549_v49 }
 0x8ee   : > { %6027 = vmatmul.mubr.msk.bf16.vlgmr.msra.gmra.mxu0 %vm1669_vm7, %v6547_v46  ;;  %6021 = vmatmul.mubr.msk.bf16.vlgmr.msra.gmra.mxu1 %vm1669_vm7, %v6548_v47  ;;  %v6567_v47 = vld [vmem:[%s8086_s16 + $0x30] sm:$0xff]  }
 0x8ef   : > { %5681 = vmatpush3.bf16.msra.mxu1 %v6550_v50  ;;  %6032 = vmatprep.mubr.msk.bf16.mxu0 %vm1669_vm7, %v6565_v35  ;;  %v6576_v50 = vld [vmem:[%s8086_s16 + $0x68] sm:$0xff]  }
 0x8f0   : > { %5682 = vmatprep.subr.bf16.mxu1 %v6551_v51  ;;  %v6579_v51 = vld [vmem:[%s8086_s16 + $0x70] sm:$0xff]  }
 0x8f3   : > { %5683 = vmatpush3.bf16.msra.mxu1 %v6552_v9  ;;  %v6568_v9 = vld [vmem:[%s8086_s16 + $0x38] sm:$0xff]  }
 0x8f4   : > { %5684 = vmatprep.subr.bf16.mxu1 %v6553_v53  ;;  %v6569_v53 = vld [vmem:[%s8086_s16 + $0x40] sm:$0xff]  }
 0x8f7   : > { %5685 = vmatpush3.bf16.msra.mxu1 %v6554_v54  ;;  %v6580_v54 = vld [vmem:[%s8086_s16 + $0x78] sm:$0xff]  }
 0x8f8   : > { %5686 = vmatprep.subr.bf16.mxu1 %v6555_v55  ;;  %v6570_v55 = vld [vmem:[%s8086_s16 + $0x48] sm:$0xff]  }
 0x8fb   : > { %5687 = vmatpush3.bf16.msra.mxu1 %v6556_v56  ;;  %v6571_v56 = vld [vmem:[%s8086_s16 + $0x50] sm:$0xff]  }
 0x8fc   : > { %5688 = vmatprep.subr.bf16.mxu1 %v6557_v57  ;;  %v6572_v57 = vld [vmem:[%s8086_s16 + $0x58] sm:$0xff]  }
 0x8ff   : > { %5689 = vmatpush3.bf16.msra.mxu1 %v6558_v59  ;;  %v6573_v59 = vld [vmem:[%s8086_s16] sm:$0xff]  }
 0x900   : > { %5690 = vmatprep.subr.bf16.mxu1 %v6559_v60  ;;  %v6574_v60 = vld [vmem:[%s8086_s16 + $0x8] sm:$0xff]  }
 0x903   : > { %5691 = vmatpush3.bf16.msra.mxu1 %v6560_v61  ;;  %v6577_v61 = vld [vmem:[%s8086_s16 + $0x10] sm:$0xff]  }
 0x904   : > { %5692 = vmatprep.subr.bf16.mxu1 %v6561_v63  ;;  %v6578_v63 = vld [vmem:[%s8086_s16 + $0x18] sm:$0xff]  }
 0x907   : > { %5693 = vmatpush3.bf16.msra.mxu1 %v6562_v0  ;;  %v6581_v0 = vld [vmem:[#allocation15] sm:$0xff]  }
 0x908   : > { %5694 = vmatprep.subr.bf16.mxu1 %v6563_v5 }
 0x90b   : > { %5695 = vmatpush3.bf16.msra.mxu1 %v6564_v6 }
 0x9a6   : > { %v3514_v1 = vpop.f32.mrf.mxu0  ;;  %v3462_v2 = vpop.f32.mrf.mxu1 }
 0x9a8   : > { %v6016_v3 = vpop.f32.mrf.mxu0  ;;  %v6010_v4 = vpop.f32.mrf.mxu1 }
 0x9aa   : > { %v3517_v52 = vpop.f32.mrf.mxu0  ;;  %v3465_v7 = vpop.f32.mrf.mxu1 }
 0x9ab   : > { %v6312_v48 = vpack.i.bf16 %v3517_v52, %v3514_v1  ;;  %v6582_v1 = vld [vmem:[#allocation15 + $0x20] sm:$0xff]  }
 0x9ac   : > { %v6017_v8 = vpop.f32.mrf.mxu0  ;;  %v6011_v10 = vpop.f32.mrf.mxu1 }
 0x9ad   : > { %6313 = vrot.lane.b32.xlu1 %v6312_v48, %s8126_s24 }
 0x9ae   : > { %v3618_v11 = vpop.f32.mrf.mxu0  ;;  %v3566_v12 = vpop.f32.mrf.mxu1 }
 0x9b0   : > { %v6028_v62 = vpop.f32.mrf.mxu0  ;;  %v6022_v13 = vpop.f32.mrf.mxu1 }
 0x9b2   : > { %v3621_v58 = vpop.f32.mrf.mxu0  ;;  %v3569_v14 = vpop.f32.mrf.mxu1 }
 0x9b3   : > { %v6307_v15 = vpack.i.bf16 %v3621_v58, %v3618_v11 }
 0x9b4   : > { %v6029_v16 = vpop.f32.mrf.mxu0  ;;  %v6023_v17 = vpop.f32.mrf.mxu1 }
 0x9b5   : > { %6308 = vrot.lane.b32.xlu0 %v6307_v15, %s8126_s24 }
 0xa1f   : > { %v6314_v18 = vpop.permute.xlu1 %6313 }
 0xa20   : > { %v6316_v19 = vunpack.i.h.bf16 %v6314_v18  ;;  %v6315_v20 = vunpack.i.l.bf16 %v6314_v18 }
 0xa22   : > { %v3642_v24 = vsel %vm903_vm4, %v3465_v7, %v6316_v19  ;;  %v3641_v25 = vsel %vm903_vm4, %v3462_v2, %v6315_v20 }
 0xa23   : > { %v3645_v29 = vpack.c.bf16 %v3642_v24, %v3641_v25 }
 0xa27   : > { %v6309_v21 = vpop.permute.xlu0 %6308 }
 0xa28   : > { %v6311_v22 = vunpack.i.h.bf16 %v6309_v21  ;;  %v6310_v23 = vunpack.i.l.bf16 %v6309_v21 }
 0xa2a   : > { %v3643_v26 = vsel %vm903_vm4, %v3566_v12, %v6310_v23  ;;  %v3644_v27 = vsel %vm903_vm4, %v3569_v14, %v6311_v22 }
 0xa2b   : > { %v3646_v28 = vpack.c.bf16 %v3644_v27, %v3643_v26 }
 0xa2d   : > { %3814 = vmatprep.mubr.bf16.mxu1 %v3646_v28 }
 0xa2e   : > { %3815 = vmatmul.mubr.bf16.vlgmr.msra.gmra.mxu1 %v3645_v29 }
 0xa2f   : > { %6052 = vmatprep.mubr.msk.bf16.mxu1 %vm1669_vm7, %v6575_v43 }
 0xaee   : > { %v5696_v30 = vpop.f32.mrf.mxu1 }
 0xaf0   : > { %v5697_v31 = vpop.f32.mrf.mxu1 }
 0xaf1   : > { %v5698_v32 = vadd.f32 %v5697_v31, %v5696_v30 }
 0xaf2   : > { %v5699_v34 = vpop.f32.mrf.mxu1 }
 0xaf3   : > { %v3817_v37 = vadd.f32 %v5698_v32, %v5390_v33 }
 0xaf4   : > { %v5700_v36 = vpop.f32.mrf.mxu1 }
 0xaf5   : > { %v5701_v38 = vadd.f32 %v5700_v36, %v5699_v34  ;;  %v3823_v40 = vmax.f32 %v3817_v37, 0.0 }
 0xaf7   : > { %v3820_v39 = vadd.f32 %v5701_v38, %v5390_v33 }
 0xaf9   : > { %v3824_v41 = vmax.f32 %v3820_v39, 0.0 }
 0xafb   : > { %v3825_v42 = vpack.c.bf16 %v3824_v41, %v3823_v40 }
 0xafd   : > { %3973 = vrot.lane.b32.xlu1 %v3825_v42, %s8126_s24  ;;  %3864 = vrot.lane.b32.xlu0 %v3825_v42, %s6917_s3 }
 0xb01   : > { %4082 = vrot.lane.b32.xlu0 %v3825_v42, %s8127_s30 }
 0xb6f   : > { %v3865_v44 = vpop.permute.xlu0 %3864  ;;  %v3974_v46 = vpop.permute.xlu1 %3973 }
 0xb70   : > { %6030 = vmatprep.subr.bf16.mxu0 %v3865_v44 }
 0xb71   : > { %6031 = vmatpush3.bf16.msra.mxu0 %v3865_v44 }
 0xb72   : > { %6040 = vmatprep.subr.bf16.mxu0 %v3974_v46 }
 0xb73   : > { %v4083_v49 = vpop.permute.xlu0 %4082 }
 0xb74   : > { %6033 = vmatmul.mubr.msk.bf16.vlgmr.msra.gmra.mxu0 %vm1669_vm7, %v6566_v45  ;;  %6050 = vmatprep.subr.bf16.mxu1 %v4083_v49 }
 0xb75   : > { %6041 = vmatpush3.bf16.msra.mxu0 %v3974_v46  ;;  %6051 = vmatpush3.bf16.msra.mxu1 %v4083_v49 }
 0xb76   : > { %6060 = vmatprep.subr.bf16.mxu0 %v3825_v42  ;;  %6036 = vmatprep.mubr.msk.bf16.mxu0 %vm1669_vm7, %v6567_v47 }
 0xb78   : > { %6053 = vmatmul.mubr.msk.bf16.vlgmr.msra.gmra.mxu1 %vm1669_vm7, %v6576_v50 }
 0xb79   : > { %6056 = vmatprep.mubr.msk.bf16.mxu1 %vm1669_vm7, %v6579_v51 }
 0xb7c   : > { %6037 = vmatmul.mubr.msk.bf16.gmra.mxu0 %vm1669_vm7, %v6568_v9 }
 0xb7d   : > { %6042 = vmatprep.mubr.msk.bf16.mxu0 %vm1669_vm7, %v6569_v53 }
 0xb80   : > { %6057 = vmatmul.mubr.msk.bf16.gmra.mxu1 %vm1669_vm7, %v6580_v54 }
 0xb81   : > { %6078 = vmatprep.mubr.msk.bf16.mxu1 %vm903_vm4, %v6581_v0  ;;  %v6585_v0 = vld [vmem:[#allocation15 + $0x10] sm:$0xff]  }
 0xb84   : > { %6043 = vmatmul.mubr.msk.bf16.vlgmr.msra.gmra.mxu0 %vm1669_vm7, %v6570_v55 }
 0xb85   : > { %6061 = vmatpush3.bf16.msra.mxu0 %v3825_v42  ;;  %6046 = vmatprep.mubr.msk.bf16.mxu0 %vm1669_vm7, %v6571_v56 }
 0xb8c   : > { %6047 = vmatmul.mubr.msk.bf16.gmra.mxu0 %vm1669_vm7, %v6572_v57 }
 0xb8d   : > { %6062 = vmatprep.mubr.msk.bf16.mxu0 %vm1669_vm7, %v6573_v59 }
 0xb94   : > { %6063 = vmatmul.mubr.msk.bf16.vlgmr.msra.gmra.mxu0 %vm1669_vm7, %v6574_v60 }
 0xb95   : > { %6066 = vmatprep.mubr.msk.bf16.mxu0 %vm1669_vm7, %v6577_v61  ;;  %v6583_v61 = vld [vmem:[#allocation15 + $0x8] sm:$0xff]  }
 0xb9c   : > { %6067 = vmatmul.mubr.msk.bf16.gmra.mxu0 %vm1669_vm7, %v6578_v63  ;;  %v6584_v63 = vld [vmem:[#allocation15 + $0x28] sm:$0xff]  }
 0xb9d   : > { %6094 = vmatprep.mubr.msk.bf16.mxu0 %vm903_vm4, %v6582_v1  ;;  %v6586_v1 = vld [vmem:[#allocation15 + $0x30] sm:$0xff]  }
 0xc34   : > { %v6034_v2 = vpop.f32.mrf.mxu0 }
 0xc36   : > { %v3913_v3 = vpop.f32.mrf.mxu0 }
 0xc38   : > { %v6035_v4 = vpop.f32.mrf.mxu0  ;;  %v6054_v62 = vpop.f32.mrf.mxu1 }
 0xc3a   : > { %v3916_v5 = vpop.f32.mrf.mxu0  ;;  %v4131_v14 = vpop.f32.mrf.mxu1 }
 0xc3c   : > { %v6038_v6 = vpop.f32.mrf.mxu0  ;;  %v6055_v17 = vpop.f32.mrf.mxu1 }
 0xc3e   : > { %v3929_v52 = vpop.f32.mrf.mxu0  ;;  %v4134_v20 = vpop.f32.mrf.mxu1 }
 0xc40   : > { %v6039_v7 = vpop.f32.mrf.mxu0  ;;  %v6058_v23 = vpop.f32.mrf.mxu1 }
 0xc42   : > { %v3932_v48 = vpop.f32.mrf.mxu0  ;;  %v4147_v27 = vpop.f32.mrf.mxu1 }
 0xc44   : > { %v6044_v8 = vpop.f32.mrf.mxu0  ;;  %v6059_v34 = vpop.f32.mrf.mxu1 }
 0xc46   : > { %v4022_v10 = vpop.f32.mrf.mxu0  ;;  %v4150_v45 = vpop.f32.mrf.mxu1 }
 0xc48   : > { %v6045_v11 = vpop.f32.mrf.mxu0 }
 0xc4a   : > { %v4025_v12 = vpop.f32.mrf.mxu0 }
 0xc4c   : > { %v6048_v13 = vpop.f32.mrf.mxu0 }
 0xc4e   : > { %v4038_v58 = vpop.f32.mrf.mxu0 }
 0xc50   : > { %v6049_v15 = vpop.f32.mrf.mxu0 }
 0xc52   : > { %v4041_v16 = vpop.f32.mrf.mxu0 }
 0xc54   : > { %v6064_v18 = vpop.f32.mrf.mxu0 }
 0xc55   : > { %v4237_v33 = vadd.f32 %v6064_v18, %v6034_v2  ;;  %v6587_v2 = vld [vmem:[#allocation15 + $0x18] sm:$0xff]  }
 0xc56   : > { %v4228_v19 = vpop.f32.mrf.mxu0 }
 0xc57   : > { %v4261_v44 = vadd.f32 %v6044_v8, %v4237_v33  ;;  %v4229_v46 = vadd.f32 %v4228_v19, %v3913_v3  ;;  %v6588_v3 = vld [vmem:[#allocation15 + $0x38] sm:$0xff]  }
 0xc58   : > { %v6065_v21 = vpop.f32.mrf.mxu0  ;;  %v6594_v8 = vld [vmem:[#allocation15 + $0x58] sm:$0xff]  }
 0xc59   : > { %v4240_v29 = vadd.f32 %v6065_v21, %v6035_v4  ;;  %v4269_v54 = vadd.f32 %v6054_v62, %v4261_v44  ;;  %v4259_v55 = vadd.f32 %v4229_v46, %v4022_v10  ;;  %v6589_v4 = vld [vmem:[#allocation15 + $0x40] sm:$0xff]   ;;  %v6596_v10 = vld [vmem:[#allocation15 + $0x78] sm:$0xff]  }
 0xc5a   : > { %v4231_v22 = vpop.f32.mrf.mxu0  ;;  %v6599_v62 = vld [vmem:[%s8088_s18 + $0x28] sm:$0xff]  }
 0xc5b   : > { %v4262_v39 = vadd.f32 %v6045_v11, %v4240_v29  ;;  %v4232_v40 = vadd.f32 %v4231_v22, %v3916_v5  ;;  %v4267_v59 = vadd.f32 %v4259_v55, %v4131_v14  ;;  %v6591_v5 = vld [vmem:[#allocation15 + $0x60] sm:$0xff]   ;;  %v6597_v11 = vld [vmem:[%s8088_s18 + $0x38] sm:$0xff]   ;;  %v6600_v14 = vld [vmem:[%s8088_s18 + $0x20] sm:$0xff]  }
 0xc5c   : > { %v6068_v24 = vpop.f32.mrf.mxu0 }
 0xc5d   : > { %v4253_v25 = vadd.f32 %v6068_v24, %v6038_v6  ;;  %v4270_v51 = vadd.f32 %v6055_v17, %v4262_v39  ;;  %v4260_v9 = vadd.f32 %v4232_v40, %v4025_v12  ;;  %v6590_v6 = vld [vmem:[#allocation15 + $0x48] sm:$0xff]  }
 0xc5e   : > { %v4244_v26 = vpop.f32.mrf.mxu0  ;;  %v6598_v12 = vld [vmem:[%s8088_s18 + $0x30] sm:$0xff]  }
 0xc5f   : > { %v4245_v28 = vadd.f32 %v4244_v26, %v3929_v52  ;;  %v4265_v31 = vadd.f32 %v6048_v13, %v4253_v25  ;;  %v4276_v56 = vpack.c.bf16 %v4270_v51, %v4269_v54  ;;  %v4268_v57 = vadd.f32 %v4260_v9, %v4134_v20  ;;  %v6592_v52 = vld [vmem:[#allocation15 + $0x68] sm:$0xff]  }
 0xc60   : > { %v6069_v30 = vpop.f32.mrf.mxu0  ;;  %v6601_v20 = vld [vmem:[%s8088_s18 + $0x18] sm:$0xff]   ;;  %v6602_v26 = vld [vmem:[%s8088_s18 + $0x10] sm:$0xff]  }
 0xc61   : > { %v4256_v32 = vadd.f32 %v6069_v30, %v6039_v7  ;;  %v4263_v36 = vadd.f32 %v4245_v28, %v4038_v58  ;;  %v4273_v41 = vadd.f32 %v6058_v23, %v4265_v31  ;;  %v4275_v60 = vpack.c.bf16 %v4268_v57, %v4267_v59  ;;  %v6593_v7 = vld [vmem:[#allocation15 + $0x50] sm:$0xff]  }
 0xc62   : > { %v4247_v35 = vpop.f32.mrf.mxu0 }
 0xc63   : > { %v4266_v37 = vadd.f32 %v6049_v15, %v4256_v32  ;;  %v4248_v38 = vadd.f32 %v4247_v35, %v3932_v48  ;;  %v4271_v47 = vadd.f32 %v4263_v36, %v4147_v27  ;;  %v6595_v48 = vld [vmem:[#allocation15 + $0x70] sm:$0xff]   ;;  %v6603_v32 = vld [vmem:[%s8088_s18 + $0x8] sm:$0xff]  }
 0xc65   : > { %v4274_v42 = vadd.f32 %v6059_v34, %v4266_v37  ;;  %v4264_v43 = vadd.f32 %v4248_v38, %v4041_v16  ;;  %v6604_v38 = vld [vmem:[%s8088_s18] sm:$0xff]  }
 0xc67   : > { %v4278_v49 = vpack.c.bf16 %v4274_v42, %v4273_v41  ;;  %v4272_v50 = vadd.f32 %v4264_v43, %v4150_v45 }
 0xc69   : > { %v4277_v53 = vpack.c.bf16 %v4272_v50, %v4271_v47  ;;  %6070 = vmatprep.subr.bf16.mxu1 %v4278_v49  ;;  %6086 = vmatprep.subr.bf16.mxu0 %v4278_v49 }
 0xc6a   : > { %6071 = vmatpush3.bf16.msra.mxu1 %v4278_v49  ;;  %6087 = vmatpush3.bf16.msra.mxu0 %v4278_v49 }
 0xc6b   : > { %6072 = vmatprep.subr.bf16.mxu1 %v4277_v53  ;;  %6088 = vmatprep.subr.bf16.mxu0 %v4277_v53 }
 0xc6e   : > { %6073 = vmatpush3.bf16.msra.mxu1 %v4277_v53  ;;  %6089 = vmatpush3.bf16.msra.mxu0 %v4277_v53 }
 0xc6f   : > { %6074 = vmatprep.subr.bf16.mxu1 %v4276_v56  ;;  %6090 = vmatprep.subr.bf16.mxu0 %v4276_v56 }
 0xc72   : > { %6075 = vmatpush3.bf16.msra.mxu1 %v4276_v56  ;;  %6091 = vmatpush3.bf16.msra.mxu0 %v4276_v56 }
 0xc73   : > { %6076 = vmatprep.subr.bf16.mxu1 %v4275_v60  ;;  %6092 = vmatprep.subr.bf16.mxu0 %v4275_v60 }
 0xc76   : > { %6077 = vmatpush3.bf16.msra.mxu1 %v4275_v60  ;;  %6093 = vmatpush3.bf16.msra.mxu0 %v4275_v60 }
 0xc77   : > { %6102 = vmatprep.subr.bf16.mxu1 %v4278_v49  ;;  %6118 = vmatprep.subr.bf16.mxu0 %v4278_v49 }
 0xc79   : > { %6079 = vmatmul.mubr.msk.bf16.vlgmr.msra.gmra.mxu1 %vm903_vm4, %v6583_v61  ;;  %6095 = vmatmul.mubr.msk.bf16.vlgmr.msra.gmra.mxu0 %vm903_vm4, %v6584_v63 }
 0xc7a   : > { %6103 = vmatpush3.bf16.msra.mxu1 %v4278_v49  ;;  %6119 = vmatpush3.bf16.msra.mxu0 %v4278_v49 }
 0xc7b   : > { %6104 = vmatprep.subr.bf16.mxu1 %v4277_v53  ;;  %6120 = vmatprep.subr.bf16.mxu0 %v4277_v53 }
 0xc7c   : > { %6082 = vmatprep.mubr.msk.bf16.mxu1 %vm903_vm4, %v6585_v0  ;;  %6098 = vmatprep.mubr.msk.bf16.mxu0 %vm903_vm4, %v6586_v1 }
 0xc7e   : > { %6105 = vmatpush3.bf16.msra.mxu1 %v4277_v53  ;;  %6121 = vmatpush3.bf16.msra.mxu0 %v4277_v53 }
 0xc7f   : > { %6106 = vmatprep.subr.bf16.mxu1 %v4276_v56  ;;  %6122 = vmatprep.subr.bf16.mxu0 %v4276_v56 }
 0xc81   : > { %6083 = vmatmul.mubr.msk.bf16.gmra.mxu1 %vm903_vm4, %v6587_v2  ;;  %6099 = vmatmul.mubr.msk.bf16.gmra.mxu0 %vm903_vm4, %v6588_v3 }
 0xc82   : > { %6107 = vmatpush3.bf16.msra.mxu1 %v4276_v56  ;;  %6123 = vmatpush3.bf16.msra.mxu0 %v4276_v56 }
 0xc83   : > { %6108 = vmatprep.subr.bf16.mxu1 %v4275_v60  ;;  %6124 = vmatprep.subr.bf16.mxu0 %v4275_v60 }
 0xc84   : > { %6110 = vmatprep.mubr.msk.bf16.mxu1 %vm903_vm4, %v6589_v4  ;;  %6126 = vmatprep.mubr.msk.bf16.mxu0 %vm903_vm4, %v6591_v5 }
 0xc86   : > { %6109 = vmatpush3.bf16.msra.mxu1 %v4275_v60  ;;  %6125 = vmatpush3.bf16.msra.mxu0 %v4275_v60 }
 0xc87   : > { %6134 = vmatprep.subr.bf16.mxu1 %v6597_v11 }
 0xc89   : > { %6111 = vmatmul.mubr.msk.bf16.vlgmr.msra.gmra.mxu1 %vm903_vm4, %v6590_v6  ;;  %6127 = vmatmul.mubr.msk.bf16.vlgmr.msra.gmra.mxu0 %vm903_vm4, %v6592_v52 }
 0xc8a   : > { %6114 = vmatprep.mubr.msk.bf16.mxu1 %vm903_vm4, %v6593_v7  ;;  %6130 = vmatprep.mubr.msk.bf16.mxu0 %vm903_vm4, %v6595_v48 }
 0xc8b   : > { %6135 = vmatpush3.bf16.msra.mxu1 %v6597_v11 }
 0xc8c   : > { %6136 = vmatprep.subr.bf16.mxu1 %v6598_v12 }
 0xc8f   : > { %6137 = vmatpush3.bf16.msra.mxu1 %v6598_v12 }
 0xc90   : > { %6138 = vmatprep.subr.bf16.mxu1 %v6599_v62 }
 0xc91   : > { %6115 = vmatmul.mubr.msk.bf16.gmra.mxu1 %vm903_vm4, %v6594_v8  ;;  %6131 = vmatmul.mubr.msk.bf16.gmra.mxu0 %vm903_vm4, %v6596_v10 }
 0xc93   : > { %6139 = vmatpush3.bf16.msra.mxu1 %v6599_v62 }
 0xc94   : > { %6140 = vmatprep.subr.bf16.mxu1 %v6600_v14 }
 0xc97   : > { %6141 = vmatpush3.bf16.msra.mxu1 %v6600_v14 }
 0xc98   : > { %6142 = vmatprep.subr.bf16.mxu1 %v6601_v20 }
 0xc9b   : > { %6143 = vmatpush3.bf16.msra.mxu1 %v6601_v20 }
 0xc9c   : > { %6144 = vmatprep.subr.bf16.mxu1 %v6602_v26 }
 0xc9f   : > { %6145 = vmatpush3.bf16.msra.mxu1 %v6602_v26 }
 0xca0   : > { %6146 = vmatprep.subr.bf16.mxu1 %v6603_v32 }
 0xca3   : > { %6147 = vmatpush3.bf16.msra.mxu1 %v6603_v32 }
 0xca4   : > { %6148 = vmatprep.subr.bf16.mxu1 %v6604_v38 }
 0xca7   : > { %6149 = vmatpush3.bf16.msra.mxu1 %v6604_v38 }
 0xd39   : > { %v7977_v13 = vpop.f32.mrf.mxu1  ;;  %v6096_v58 = vpop.f32.mrf.mxu0 }
 0xd3b   : > { %v7982_v15 = vpop.f32.mrf.mxu1  ;;  %v4459_v16 = vpop.f32.mrf.mxu0 }
 0xd3d   : > { %v7984_v17 = vpop.f32.mrf.mxu1  ;;  %v6097_v18 = vpop.f32.mrf.mxu0 }
 0xd3e   : > { %v6317_v19 = vpack.i.bf16 %v6097_v18, %v6096_v58 }
 0xd3f   : > { %v7989_v21 = vpop.f32.mrf.mxu1  ;;  %v4462_v22 = vpop.f32.mrf.mxu0 }
 0xd40   : > { %v6322_v23 = vpack.i.bf16 %v4462_v22, %v4459_v16  ;;  %6318 = vrot.lane.b32.xlu0 %v6317_v19, %s8127_s30 }
 0xd41   : > { %v7992_v24 = vpop.f32.mrf.mxu1  ;;  %v6100_v25 = vpop.f32.mrf.mxu0 }
 0xd42   : > { %6323 = vrot.lane.b32.xlu1 %v6322_v23, %s8127_s30 }
 0xd43   : > { %v7998_v27 = vpop.f32.mrf.mxu1  ;;  %v4475_v28 = vpop.f32.mrf.mxu0 }
 0xd45   : > { %v8000_v29 = vpop.f32.mrf.mxu1  ;;  %v6101_v30 = vpop.f32.mrf.mxu0 }
 0xd46   : > { %v6327_v31 = vpack.i.bf16 %v6101_v30, %v6100_v25 }
 0xd47   : > { %v8005_v33 = vpop.f32.mrf.mxu1  ;;  %v4478_v34 = vpop.f32.mrf.mxu0 }
 0xd48   : > { %v6332_v35 = vpack.i.bf16 %v4478_v34, %v4475_v28  ;;  %6328 = vrot.lane.b32.xlu0 %v6327_v31, %s8127_s30 }
 0xd49   : > { %v6112_v36 = vpop.f32.mrf.mxu1  ;;  %v6128_v37 = vpop.f32.mrf.mxu0 }
 0xd4a   : > { %6333 = vrot.lane.b32.xlu1 %v6332_v35, %s8127_s30  ;;  %s5188_s30 = sshll.u32 %s8129_s4, 3 }
 0xd4b   : > { %v4565_v39 = vpop.f32.mrf.mxu1  ;;  %v4671_v40 = vpop.f32.mrf.mxu0  ;;  %s754_s5 = scalar_lea.vmem %s8090_s20, %s5188_s30 }
 0xd4d   : > { %v6113_v41 = vpop.f32.mrf.mxu1  ;;  %v6129_v42 = vpop.f32.mrf.mxu0 }
 0xd4e   : > { %v6337_v43 = vpack.i.bf16 %v6113_v41, %v6112_v36  ;;  %v6342_v50 = vpack.i.bf16 %v6129_v42, %v6128_v37 }
 0xd4f   : > { %v4568_v44 = vpop.f32.mrf.mxu1  ;;  %v4674_v45 = vpop.f32.mrf.mxu0 }
 0xd50   : > { %v6347_v46 = vpack.i.bf16 %v4568_v44, %v4565_v39  ;;  %6338 = vrot.lane.b32.xlu0 %v6337_v43, %s8126_s24  ;;  %v6352_v53 = vpack.i.bf16 %v4674_v45, %v4671_v40 }
 0xd51   : > { %v6116_v47 = vpop.f32.mrf.mxu1  ;;  %v6132_v49 = vpop.f32.mrf.mxu0 }
 0xd52   : > { %6348 = vrot.lane.b32.xlu1 %v6347_v46, %s8126_s24 }
 0xd53   : > { %v4581_v51 = vpop.f32.mrf.mxu1  ;;  %v4687_v9 = vpop.f32.mrf.mxu0 }
 0xd54   : > { %6343 = vrot.lane.b32.xlu0 %v6342_v50, %s6917_s3 }
 0xd55   : > { %v6117_v54 = vpop.f32.mrf.mxu1  ;;  %v6133_v55 = vpop.f32.mrf.mxu0 }
 0xd56   : > { %v6357_v56 = vpack.i.bf16 %v6117_v54, %v6116_v47  ;;  %6353 = vrot.lane.b32.xlu1 %v6352_v53, %s6917_s3  ;;  %v6372_v61 = vpack.i.bf16 %v6133_v55, %v6132_v49 }
 0xd57   : > { %v4584_v57 = vpop.f32.mrf.mxu1  ;;  %v4690_v60 = vpop.f32.mrf.mxu0 }
 0xd58   : > { %v6362_v59 = vpack.i.bf16 %v4584_v57, %v4581_v51  ;;  %6358 = vrot.lane.b32.xlu0 %v6357_v56, %s8126_s24  ;;  %v6367_v63 = vpack.i.bf16 %v4690_v60, %v4687_v9 }
 0xd5a   : > { %6363 = vrot.lane.b32.xlu1 %v6362_v59, %s8126_s24 }
 0xd5c   : > { %6373 = vrot.lane.b32.xlu0 %v6372_v61, %s6917_s3 }
 0xd5e   : > { %6368 = vrot.lane.b32.xlu1 %v6367_v63, %s6917_s3 }
 0xdb2   : > { %v6319_v0 = vpop.permute.xlu0 %6318 }
 0xdb3   : > { %v6321_v5 = vunpack.i.h.bf16 %v6319_v0  ;;  %v6320_v6 = vunpack.i.l.bf16 %v6319_v0  ;;  %v5495_v0 = vld [vmem:[%s8089_s19] ss:$0 sm:$0xff] }
 0xdb4   : > { %v6324_v1 = vpop.permute.xlu1 %6323 }
 0xdb5   : > { %v6326_v52 = vunpack.i.h.bf16 %v6324_v1  ;;  %v6325_v7 = vunpack.i.l.bf16 %v6324_v1  ;;  %v4800_v16 = vsel %vm1412_vm5, %v7977_v13, %v6320_v6  ;;  %v4801_v18 = vsel %vm1412_vm5, %v7984_v17, %v6321_v5 }
 0xdb7   : > { %v4798_v19 = vsel %vm1412_vm5, %v7982_v15, %v6325_v7  ;;  %v4799_v20 = vsel %vm1412_vm5, %v7989_v21, %v6326_v52 }
 0xdba   : > { %v6329_v2 = vpop.permute.xlu0 %6328 }
 0xdbb   : > { %v6331_v15 = vunpack.i.h.bf16 %v6329_v2  ;;  %v6330_v35 = vunpack.i.l.bf16 %v6329_v2 }
 0xdbc   : > { %v6334_v3 = vpop.permute.xlu1 %6333 }
 0xdbd   : > { %v6336_v36 = vunpack.i.h.bf16 %v6334_v3  ;;  %v6335_v37 = vunpack.i.l.bf16 %v6334_v3  ;;  %v4804_v49 = vsel %vm1412_vm5, %v7992_v24, %v6330_v35  ;;  %v4805_v50 = vsel %vm1412_vm5, %v8000_v29, %v6331_v15 }
 0xdbf   : > { %v4802_v51 = vsel %vm1412_vm5, %v7998_v27, %v6335_v37  ;;  %v4803_v9 = vsel %vm1412_vm5, %v8005_v33, %v6336_v36 }
 0xdc2   : > { %v6339_v4 = vpop.permute.xlu0 %6338 }
 0xdc3   : > { %v6341_v8 = vunpack.i.h.bf16 %v6339_v4  ;;  %v6340_v10 = vunpack.i.l.bf16 %v6339_v4 }
 0xdc4   : > { %v6349_v48 = vpop.permute.xlu1 %6348 }
 0xdc5   : > { %v6351_v11 = vunpack.i.h.bf16 %v6349_v48  ;;  %v6350_v12 = vunpack.i.l.bf16 %v6349_v48  ;;  %v4809_v23 = vsel %vm903_vm4, %v4801_v18, %v6341_v8  ;;  %v4808_v25 = vsel %vm903_vm4, %v4800_v16, %v6340_v10 }
 0xdc6   : > { %v6344_v62 = vpop.permute.xlu0 %6343 }
 0xdc7   : > { %v6346_v58 = vunpack.i.h.bf16 %v6344_v62  ;;  %v6345_v14 = vunpack.i.l.bf16 %v6344_v62  ;;  %v4807_v30 = vsel %vm903_vm4, %v4799_v20, %v6351_v11  ;;  %v4806_v13 = vsel %vm903_vm4, %v4798_v19, %v6350_v12 }
 0xdc8   : > { %v6354_v22 = vpop.permute.xlu1 %6353 }
 0xdc9   : > { %v6356_v26 = vunpack.i.h.bf16 %v6354_v22  ;;  %v6355_v28 = vunpack.i.l.bf16 %v6354_v22  ;;  %v4816_v31 = vsel %vm1417_vm6, %v4808_v25, %v6345_v14  ;;  %v4817_v17 = vsel %vm1417_vm6, %v4809_v23, %v6346_v58 }
 0xdca   : > { %v6359_v32 = vpop.permute.xlu0 %6358  ;;  %v4823_v40 = vpack.c.bf16 %v4817_v17, %v4816_v31 }
 0xdcb   : > { %v4814_v34 = vsel %vm1417_vm6, %v4806_v13, %v6355_v28  ;;  %v4815_v21 = vsel %vm1417_vm6, %v4807_v30, %v6356_v26  ;;  %v6361_v41 = vunpack.i.h.bf16 %v6359_v32  ;;  %v6360_v42 = vunpack.i.l.bf16 %v6359_v32 }
 0xdcc   : > { %v6364_v38 = vpop.permute.xlu1 %6363  ;;  %v4822_v39 = vpack.c.bf16 %v4815_v21, %v4814_v34 }
 0xdcd   : > { %v6366_v43 = vunpack.i.h.bf16 %v6364_v38  ;;  %v6365_v44 = vunpack.i.l.bf16 %v6364_v38  ;;  %v4813_v54 = vsel %vm903_vm4, %v4805_v50, %v6361_v41  ;;  %v4812_v55 = vsel %vm903_vm4, %v4804_v49, %v6360_v42 }
 0xdce   : > { %6150 = vmatprep.mubr.bf16.mxu1 %v4822_v39  ;;  %v6374_v45 = vpop.permute.xlu0 %6373 }
 0xdcf   : > { %v6376_v46 = vunpack.i.h.bf16 %v6374_v45  ;;  %v6375_v47 = vunpack.i.l.bf16 %v6374_v45  ;;  %6151 = vmatmul.mubr.bf16.vlgmr.msra.gmra.mxu1 %v4823_v40  ;;  %v4811_v59 = vsel %vm903_vm4, %v4803_v9, %v6366_v43  ;;  %v4810_v24 = vsel %vm903_vm4, %v4802_v51, %v6365_v44 }
 0xdd0   : > { %v6369_v53 = vpop.permute.xlu1 %6368 }
 0xdd1   : > { %v6371_v56 = vunpack.i.h.bf16 %v6369_v53  ;;  %v6370_v57 = vunpack.i.l.bf16 %v6369_v53  ;;  %v4820_v60 = vsel %vm1417_vm6, %v4812_v55, %v6375_v47  ;;  %v4821_v29 = vsel %vm1417_vm6, %v4813_v54, %v6376_v46 }
 0xdd2   : > { %v4825_v63 = vpack.c.bf16 %v4821_v29, %v4820_v60 }
 0xdd3   : > { %v4818_v27 = vsel %vm1417_vm6, %v4810_v24, %v6370_v57  ;;  %v4819_v61 = vsel %vm1417_vm6, %v4811_v59, %v6371_v56 }
 0xdd4   : > { %v4824_v33 = vpack.c.bf16 %v4819_v61, %v4818_v27 }
 0xdd6   : > { %6154 = vmatprep.mubr.bf16.mxu1 %v4824_v33 }
 0xdd7   : > { %6155 = vmatmul.mubr.bf16.gmra.mxu1 %v4825_v63 }
 0xe8f   : > { %v6152_v1 = vpop.f32.mrf.mxu1 }
 0xe90   : > { %v4940_v2 = vadd.f32 %v6152_v1, %v5495_v0 }
 0xe91   : > { %v4931_v3 = vpop.f32.mrf.mxu1 }
 0xe92   : > { %v5506_v4 = vmul.f32 -1.442695, %v4940_v2  ;;  %v4932_v5 = vadd.f32 %v5495_v0, %v4931_v3 }
 0xe93   : > { %v6153_v6 = vpop.f32.mrf.mxu1 }
 0xe94   : > { %6605 = vpow2.f32 %v5506_v4  ;;  %v5504_v52 = vmul.f32 -1.442695, %v4932_v5  ;;  %v4943_v7 = vadd.f32 %v6153_v6, %v5495_v0 }
 0xe95   : > { %v4934_v48 = vpop.f32.mrf.mxu1 }
 0xe96   : > { %6607 = vpow2.f32 %v5504_v52  ;;  %v5507_v8 = vmul.f32 -1.442695, %v4943_v7  ;;  %v4935_v10 = vadd.f32 %v5495_v0, %v4934_v48 }
 0xe97   : > { %v6156_v11 = vpop.f32.mrf.mxu1 }
 0xe98   : > { %6609 = vpow2.f32 %v5507_v8  ;;  %v5505_v12 = vmul.f32 -1.442695, %v4935_v10  ;;  %v4956_v62 = vadd.f32 %v6156_v11, %v5495_v0 }
 0xe99   : > { %v4947_v58 = vpop.f32.mrf.mxu1 }
 0xe9a   : > { %6611 = vpow2.f32 %v5505_v12  ;;  %v5510_v14 = vmul.f32 -1.442695, %v4956_v62  ;;  %v4948_v16 = vadd.f32 %v5495_v0, %v4947_v58 }
 0xe9b   : > { %v6157_v18 = vpop.f32.mrf.mxu1 }
 0xe9c   : > { %6613 = vpow2.f32 %v5510_v14  ;;  %v5508_v19 = vmul.f32 -1.442695, %v4948_v16  ;;  %v4959_v20 = vadd.f32 %v6157_v18, %v5495_v0 }
 0xe9d   : > { %v4950_v22 = vpop.f32.mrf.mxu1 }
 0xe9e   : > { %6615 = vpow2.f32 %v5508_v19  ;;  %v5511_v23 = vmul.f32 -1.442695, %v4959_v20  ;;  %v4951_v25 = vadd.f32 %v5495_v0, %v4950_v22 }
 0xea0   : > { %6617 = vpow2.f32 %v5511_v23  ;;  %v5509_v26 = vmul.f32 -1.442695, %v4951_v25 }
 0xea1   : > { %v6606_v28 = vpop.eup %6605 }
 0xea2   : > { %v4988_v30 = vadd.f32 1.0, %v6606_v28  ;;  %6619 = vpow2.f32 %v5509_v26 }
 0xea3   : > { %v6608_v13 = vpop.eup %6607 }
 0xea4   : > { %6621 = vrcp.f32 %v4988_v30  ;;  %v4986_v31 = vadd.f32 1.0, %v6608_v13 }
 0xea5   : > { %v6610_v17 = vpop.eup %6609 }
 0xea6   : > { %6623 = vrcp.f32 %v4986_v31  ;;  %v4989_v32 = vadd.f32 1.0, %v6610_v17 }
 0xea7   : > { %v6612_v15 = vpop.eup %6611 }
 0xea8   : > { %6625 = vrcp.f32 %v4989_v32  ;;  %v4987_v34 = vadd.f32 1.0, %v6612_v15 }
 0xea9   : > { %v6614_v21 = vpop.eup %6613 }
 0xeaa   : > { %6627 = vrcp.f32 %v4987_v34  ;;  %v4992_v35 = vadd.f32 1.0, %v6614_v21 }
 0xeab   : > { %v6616_v36 = vpop.eup %6615 }
 0xeac   : > { %6629 = vrcp.f32 %v4992_v35  ;;  %v4990_v37 = vadd.f32 1.0, %v6616_v36 }
 0xead   : > { %v6618_v38 = vpop.eup %6617 }
 0xeae   : > { %6631 = vrcp.f32 %v4990_v37  ;;  %v4993_v39 = vadd.f32 1.0, %v6618_v38 }
 0xeaf   : > { %v6620_v40 = vpop.eup %6619 }
 0xeb0   : > { %6633 = vrcp.f32 %v4993_v39  ;;  %v4991_v41 = vadd.f32 1.0, %v6620_v40 }
 0xeb1   : > { %v6622_v42 = vpop.eup %6621 }
 0xeb2   : > { %5012 = vst.msk [vmem:[%s754_s5 + $0x10] sm:$0xff] %vm2519_vm9, %v6622_v42  ;;  %6635 = vrcp.f32 %v4991_v41 }
 0xeb3   : > { %v6624_v43 = vpop.eup %6623 }
 0xeb4   : > { %5010 = vst.msk [vmem:[%s754_s5] sm:$0xff] %vm2519_vm9, %v6624_v43 }
 0xeb5   : > { %v6626_v44 = vpop.eup %6625 }
 0xeb6   : > { %5013 = vst.msk [vmem:[%s754_s5 + $0x18] sm:$0xff] %vm2519_vm9, %v6626_v44 }
 0xeb7   : > { %v6628_v45 = vpop.eup %6627 }
 0xeb8   : > { %5011 = vst.msk [vmem:[%s754_s5 + $0x8] sm:$0xff] %vm2519_vm9, %v6628_v45 }
 0xeb9   : > { %v6630_v46 = vpop.eup %6629 }
 0xeba   : > { %5016 = vst.msk [vmem:[%s754_s5 + $0x30] sm:$0xff] %vm2519_vm9, %v6630_v46 }
 0xebb   : > { %v6632_v47 = vpop.eup %6631 }
 0xebc   : > { %5014 = vst.msk [vmem:[%s754_s5 + $0x20] sm:$0xff] %vm2519_vm9, %v6632_v47 }
 0xebd   : > { %v6634_v49 = vpop.eup %6633 }
 0xebe   : > { %5017 = vst.msk [vmem:[%s754_s5 + $0x38] sm:$0xff] %vm2519_vm9, %v6634_v49 }
 0xebf   : > { %v6636_v50 = vpop.eup %6635 }
 0xec0   : > { %5015 = vst.msk [vmem:[%s754_s5 + $0x28] sm:$0xff] %vm2519_vm9, %v6636_v50 }
 0xec1 PF: > { %s35_s1 = sadd.s32 1, %s6897_s1  }
 0xec2   : > { %p32_p7 = scmp.ge.s32.totalorder %s35_s1, 4  }
 0xec4   :  { %34 = sbr.rel (!%p32_p7) target bundleno = 12 (0xc), region = 198 }
 0xec9   :  { %5040 = vsyncpa [#allocation3], 1 }
 0xeca   :  { %5042 = vsyncpa [#allocation3 + $0x1], 1 }
 0xecb   :  { %5043 = vsyncpa [#allocation5], 1 }
 0xecc   :  { %5044 = vsyncpa [#allocation8], 1 }
 0xecd   :  { %5045 = vsyncpa [#allocation11], 1 }
 0xece   :  { %5046 = vsyncpa [#allocation14], 1 }

</bundles_post_ra>
